<compile_context>
chip_gen: v5e
topology: v5e:2x2
jax: 0.10.0
libtpu: 0.0.40
codegen_flags: <defaults>
</compile_context>

<pallas_src>
import functools

import jax
import jax.numpy as jnp
import numpy as np
from jax.experimental import pallas as pl
from jax.experimental.pallas import tpu as pltpu


# ----------------------------------------------------------------------------
# Fused Pallas kernel
# ----------------------------------------------------------------------------
def _fused_lstm_classifier_kernel(x_ref, wih1_ref, whh1_ref, b1_ref,
                                  wih2_ref, whh2_ref, b2_ref,
                                  wfc_ref, bfc_ref, out_ref,
                                  gxc_ref, x2_ref, *, T, BB, H):
    """Whole classifier forward pass for one batch block of BB (=8) sequences.

      x_ref   : (T*BB, D)   time-major flattened input for this batch block
      wih*    : (D_in, 8H)  packed input->gate weights, both directions, gate order
                            [i_f,i_b | f_f,f_b | o_f,o_b | g_f,g_b]
      whh*    : (2H, 8H)    packed block-diagonal hidden->gate weights
      b*      : (1, 8H)     packed combined bias (b_ih + b_hh)
      wfc_ref : (1, 2H), bfc_ref : (1, 1)
      out_ref : (BB, 1)
      gxc_ref : VMEM (T*BB, 8H)  direction-combined x-gates (reused for both layers)
      x2_ref  : VMEM (T*BB, 2H)  layer-2 input (relu'd, re-paired layer-1 output)
    """
    H2 = 2 * H
    H8 = 8 * H
    f32 = jnp.float32

    # Column masks (hoisted; built once, reused everywhere).
    colg = jax.lax.broadcasted_iota(jnp.int32, (BB, H8), 1)
    fwd_cols = (colg % H2) < H          # within each 2H gate block: first H = fwd dir
    colh = jax.lax.broadcasted_iota(jnp.int32, (BB, H2), 1)
    fwd_half = colh < H                 # hidden-state layout: [fwd | bwd]

    def combine_dirs(gx):
        """Hoisted pre-work: gxc[s] = [fwd: x-gates(time s) | bwd: x-gates(time T-1-s)].

        Pure pre-work with no dependence on the recurrent state, so it overlaps the
        first recurrence steps instead of sitting on the h-dependency chain.
        """
        for s in range(T):
            gxc_ref[pl.ds(s * BB, BB), :] = jnp.where(
                fwd_cols,
                gx[s * BB:(s + 1) * BB, :],
                gx[(T - 1 - s) * BB:(T - s) * BB, :])

    def bilstm(whh):
        """Fused fwd+bwd recurrence reading direction-combined x-gates from gxc_ref.

        Returns hs[s] of shape (BB, 2H) = [h_fwd(time=s) | h_bwd(time=T-1-s)].
        """
        h = jnp.zeros((BB, H2), f32)
        c = jnp.zeros((BB, H2), f32)
        hs = []
        for s in range(T):                       # static T -> fully unrolled
            gates = gxc_ref[pl.ds(s * BB, BB), :] + jnp.dot(
                h, whh, preferred_element_type=f32)     # one 256-wide MXU push
            sg = jax.nn.sigmoid(gates[:, :3 * H2])       # i, f, o in one EUP span
            gg = jnp.tanh(gates[:, 3 * H2:])             # g in one EUP span
            i = sg[:, 0 * H2:1 * H2]
            f = sg[:, 1 * H2:2 * H2]
            o = sg[:, 2 * H2:3 * H2]
            c = f * c + i * gg
            h = o * jnp.tanh(c)
            hs.append(h)
        return hs

    # ---- layer 1 (bidirectional) -------------------------------------------------
    # Input projection hoisted out of the recurrence: one (T*BB, D) @ (D, 8H) matmul
    # produces x-gates for all timesteps and both directions at once.
    gx1 = jnp.dot(x_ref[...], wih1_ref[...], preferred_element_type=f32) + b1_ref[...]
    combine_dirs(gx1)
    hs1 = bilstm(whh1_ref[...])

    # dropout1 = identity (eval); relu1; re-pair fwd(t) with bwd(t) via a single
    # half-lane select per t, stored straight into the x2 VMEM scratch.
    for t in range(T):
        x2_ref[pl.ds(t * BB, BB), :] = jnp.maximum(
            jnp.where(fwd_half, hs1[t], hs1[T - 1 - t]), 0.0)

    # ---- layer 2 (bidirectional) -------------------------------------------------
    gx2 = jnp.dot(x2_ref[...], wih2_ref[...], preferred_element_type=f32) + b2_ref[...]
    combine_dirs(gx2)
    hs2 = bilstm(whh2_ref[...])

    # Only out[:, -1, :] is needed: fwd hidden at time T-1 (last loop step) and bwd
    # hidden at time T-1 (its first loop step). dropout2 = identity; relu2.
    last = jnp.maximum(jnp.where(fwd_half, hs2[T - 1], hs2[0]), 0.0)   # (BB, 2H)

    # FC (2H -> 1) as VPU multiply + lane reduction (avoids a 1-column MXU push/pop
    # at the very tail of the kernel), then sigmoid.
    z = jnp.sum(last * wfc_ref[...], axis=1, keepdims=True) + bfc_ref[...]
    out_ref[...] = jax.nn.sigmoid(z).astype(out_ref.dtype)


# ----------------------------------------------------------------------------
# Wrapper
# ----------------------------------------------------------------------------
def _pack_input(x, Bp, BB):
    """(B, T, D) -> block-major, time-major-within-block (nb*T*BB, D), zero-padded.

    NOTE: in production this packing (transpose + pad) would be done once at
    data-load time; it is one tiny fused XLA op here and is required anyway to
    pad the batch to a sublane multiple.
    """
    B, T, D = x.shape
    xt = jnp.transpose(x, (1, 0, 2))                      # (T, B, D)
    xt = jnp.pad(xt, ((0, 0), (0, Bp - B), (0, 0)))       # (T, Bp, D)
    nb = Bp // BB
    xt = xt.reshape(T, nb, BB, D).transpose(1, 0, 2, 3)   # (nb, T, BB, D)
    return xt.reshape(nb * T * BB, D)


def single_input_lstm_classifier(x, packed, hidden_units):
    """Full forward pass. x: (B, T, input_dim) -> (B, 1)."""
    B, T, D = x.shape
    H = hidden_units
    H2, H8 = 2 * H, 8 * H
    BB = 8                                   # batch block = one sublane tile; raise to
    Bp = max(BB, ((B + BB - 1) // BB) * BB)  # 64-128 for large production batches.
    x_packed = _pack_input(x, Bp, BB)

    kernel = functools.partial(_fused_lstm_classifier_kernel, T=T, BB=BB, H=H)
    full = lambda i: (0, 0)                  # weights: same full block every grid step

    out = pl.pallas_call(
        kernel,
        out_shape=jax.ShapeDtypeStruct((Bp, 1), jnp.float32),
        grid_spec=pltpu.PrefetchScalarGridSpec(
            num_scalar_prefetch=0,
            grid=(Bp // BB,),                # batch blocks; shards across TCs on v7x
            in_specs=[
                pl.BlockSpec((T * BB, D), lambda i: (i, 0)),   # x (per batch block)
                pl.BlockSpec((D, H8), full),                   # wih1
                pl.BlockSpec((H2, H8), full),                  # whh1
                pl.BlockSpec((1, H8), full),                   # b1
                pl.BlockSpec((H2, H8), full),                  # wih2
                pl.BlockSpec((H2, H8), full),                  # whh2
                pl.BlockSpec((1, H8), full),                   # b2
                pl.BlockSpec((1, H2), full),                   # w_fc (row vector)
                pl.BlockSpec((1, 1), full),                    # b_fc
            ],
            out_specs=pl.BlockSpec((BB, 1), lambda i: (i, 0)),
            scratch_shapes=[
                pltpu.VMEM((T * BB, H8), jnp.float32),         # gxc (both layers)
                pltpu.VMEM((T * BB, H2), jnp.float32),         # x2
            ]),
        compiler_params=pltpu.CompilerParams(
            dimension_semantics=("parallel",)),
    )(x_packed, packed["wih1"], packed["whh1"], packed["b1"],
      packed["wih2"], packed["whh2"], packed["b2"],
      packed["w_fc"], packed["b_fc"])
    return out[:B]


# ----------------------------------------------------------------------------
# Parameter init (PyTorch-style) + packing into the fused kernel layout
# ----------------------------------------------------------------------------
_GATE_SRC = (0, 1, 3, 2)   # packed order (i, f, o, g) <- PyTorch rows (i, f, g, o)


def _init_lstm_dir_raw(key, input_dim, H):
    k = 1.0 / np.sqrt(H)
    k1, k2, k3, k4 = jax.random.split(key, 4)
    w_ih = jax.random.uniform(k1, (4 * H, input_dim), jnp.float32, -k, k)
    w_hh = jax.random.uniform(k2, (4 * H, H), jnp.float32, -k, k)
    b_ih = jax.random.uniform(k3, (4 * H,), jnp.float32, -k, k)
    b_hh = jax.random.uniform(k4, (4 * H,), jnp.float32, -k, k)
    return w_ih, w_hh, b_ih, b_hh


def _pack_bilstm(fwd, bwd, input_dim, H):
    """Pack fwd/bwd PyTorch LSTM params into sigmoid-contiguous gate-major layout.

    Column layout (8H): [i_f, i_b, f_f, f_b, o_f, o_b, g_f, g_b], each block H wide
    (all sigmoid gates first, tanh gate last). whh is block-diagonal over direction:
    rows 0:H drive the *_f columns, rows H:2H the *_b columns.
    """
    wih = np.zeros((input_dim, 8 * H), np.float32)
    whh = np.zeros((2 * H, 8 * H), np.float32)
    b = np.zeros((1, 8 * H), np.float32)
    for d, (w_ih, w_hh, b_ih, b_hh) in enumerate((fwd, bwd)):
        w_ih = np.asarray(w_ih)
        w_hh = np.asarray(w_hh)
        bsum = np.asarray(b_ih) + np.asarray(b_hh)
        for gi, gs in enumerate(_GATE_SRC):
            cols = slice(gi * 2 * H + d * H, gi * 2 * H + (d + 1) * H)
            wih[:, cols] = w_ih[gs * H:(gs + 1) * H, :].T
            whh[d * H:(d + 1) * H, cols] = w_hh[gs * H:(gs + 1) * H, :].T
            b[0, cols] = bsum[gs * H:(gs + 1) * H]
    return jnp.asarray(wih), jnp.asarray(whh), jnp.asarray(b)


def init_params(key, input_dim, H):
    keys = jax.random.split(key, 6)
    kf = 1.0 / np.sqrt(2 * H)
    raw = {
        "l1_fwd": _init_lstm_dir_raw(keys[0], input_dim, H),
        "l1_bwd": _init_lstm_dir_raw(keys[1], input_dim, H),
        "l2_fwd": _init_lstm_dir_raw(keys[2], 2 * H, H),
        "l2_bwd": _init_lstm_dir_raw(keys[3], 2 * H, H),
        "fc_w": jax.random.uniform(keys[4], (1, 2 * H), jnp.float32, -kf, kf),
        "fc_b": jax.random.uniform(keys[5], (1,), jnp.float32, -kf, kf),
    }
    wih1, whh1, b1 = _pack_bilstm(raw["l1_fwd"], raw["l1_bwd"], input_dim, H)
    wih2, whh2, b2 = _pack_bilstm(raw["l2_fwd"], raw["l2_bwd"], 2 * H, H)
    packed = {
        "wih1": wih1, "whh1": whh1, "b1": b1,
        "wih2": wih2, "whh2": whh2, "b2": b2,
        "w_fc": jnp.asarray(raw["fc_w"]),              # (1, 2H) row vector
        "b_fc": jnp.asarray(raw["fc_b"]).reshape(1, 1),
    }
    return raw, packed


# ----------------------------------------------------------------------------
# Pure-JAX reference (PyTorch semantics) for correctness check
# ----------------------------------------------------------------------------
def _lstm_dir_ref(x_btd, w_ih, w_hh, b_ih, b_hh, H):
    B = x_btd.shape[0]
    wih_t, whh_t, b = w_ih.T, w_hh.T, b_ih + b_hh

    def step(carry, x_t):
        h, c = carry
        g = x_t @ wih_t + h @ whh_t + b
        i = jax.nn.sigmoid(g[:, :H])
        f = jax.nn.sigmoid(g[:, H:2 * H])
        gg = jnp.tanh(g[:, 2 * H:3 * H])
        o = jax.nn.sigmoid(g[:, 3 * H:])
        c = f * c + i * gg
        h = o * jnp.tanh(c)
        return (h, c), h

    h0 = jnp.zeros((B, H), jnp.float32)
    c0 = jnp.zeros((B, H), jnp.float32)
    _, hs = jax.lax.scan(step, (h0, c0), jnp.transpose(x_btd, (1, 0, 2)))
    return jnp.transpose(hs, (1, 0, 2))


def _bilstm_ref(x, fwd, bwd, H):
    of = _lstm_dir_ref(x, *fwd, H)
    ob = _lstm_dir_ref(x[:, ::-1, :], *bwd, H)[:, ::-1, :]
    return jnp.concatenate([of, ob], axis=-1)


def reference_forward(x, raw, H):
    out = jnp.maximum(_bilstm_ref(x, raw["l1_fwd"], raw["l1_bwd"], H), 0.0)
    out = jnp.maximum(_bilstm_ref(out, raw["l2_fwd"], raw["l2_bwd"], H), 0.0)
    return jax.nn.sigmoid(out[:, -1, :] @ raw["fc_w"].T + raw["fc_b"])


# ----------------------------------------------------------------------------
if __name__ == "__main__":
    B, T, INPUT_DIM, HIDDEN = 2, 8, 16, 32

    key = jax.random.PRNGKey(0)
    kx, kp = jax.random.split(key)
    x = jax.random.normal(kx, (B, T, INPUT_DIM), jnp.float32)
    raw, packed = init_params(kp, INPUT_DIM, HIDDEN)

    fwd = jax.jit(single_input_lstm_classifier, static_argnums=2)
    out = jax.block_until_ready(fwd(x, packed, HIDDEN))

    ref = jax.block_until_ready(reference_forward(x, raw, HIDDEN))

    assert out.shape == (B, 1), out.shape
    np.testing.assert_allclose(np.asarray(out), np.asarray(ref), atol=1e-5, rtol=1e-5)
    print("KERNEL_OK")
</pallas_src>

<mosaic_0001>
module attributes {stable_mosaic.version = 11 : i64} {
  func.func @_fused_lstm_classifier_kernel(%arg0: i32, %arg1: memref<64x16xf32, #tpu.memory_space<vmem>>, %arg2: memref<16x256xf32, #tpu.memory_space<vmem>>, %arg3: memref<64x256xf32, #tpu.memory_space<vmem>>, %arg4: memref<1x256xf32, #tpu.memory_space<vmem>>, %arg5: memref<64x256xf32, #tpu.memory_space<vmem>>, %arg6: memref<64x256xf32, #tpu.memory_space<vmem>>, %arg7: memref<1x256xf32, #tpu.memory_space<vmem>>, %arg8: memref<1x64xf32, #tpu.memory_space<vmem>>, %arg9: memref<1x1xf32, #tpu.memory_space<vmem>>, %arg10: memref<8x1xf32, #tpu.memory_space<vmem>>, %arg11: memref<64x256xf32, #tpu.memory_space<vmem>>, %arg12: memref<64x64xf32, #tpu.memory_space<vmem>>) attributes {dimension_semantics = [#tpu.dimension_semantics<parallel>], iteration_bounds = array<i64: 1>, scalar_prefetch = 0 : i64, scratch_operands = 2 : i64, tpu.core_type = #tpu.core_type<tc>, window_params = [{transform_indices = @transform_0, window_bounds = array<i64: 64, 16>}, {pipeline_mode = #tpu.pipeline_mode<synchronous>, transform_indices = @transform_1, window_bounds = array<i64: 16, 256>}, {pipeline_mode = #tpu.pipeline_mode<synchronous>, transform_indices = @transform_2, window_bounds = array<i64: 64, 256>}, {pipeline_mode = #tpu.pipeline_mode<synchronous>, transform_indices = @transform_3, window_bounds = array<i64: 1, 256>}, {pipeline_mode = #tpu.pipeline_mode<synchronous>, transform_indices = @transform_4, window_bounds = array<i64: 64, 256>}, {pipeline_mode = #tpu.pipeline_mode<synchronous>, transform_indices = @transform_5, window_bounds = array<i64: 64, 256>}, {pipeline_mode = #tpu.pipeline_mode<synchronous>, transform_indices = @transform_6, window_bounds = array<i64: 1, 256>}, {pipeline_mode = #tpu.pipeline_mode<synchronous>, transform_indices = @transform_7, window_bounds = array<i64: 1, 64>}, {pipeline_mode = #tpu.pipeline_mode<synchronous>, transform_indices = @transform_8, window_bounds = array<i64: 1, 1>}, {transform_indices = @transform_9, window_bounds = array<i64: 8, 1>}]} {
    %0 = tpu.iota {dimensions = array<i32: 1>} : vector<8x256xi32>
    %c64_i32 = arith.constant 64 : i32
    %c0_i32 = arith.constant 0 : i32
    %1 = arith.cmpi eq, %c64_i32, %c0_i32 : i32
    %c1_i32 = arith.constant 1 : i32
    %2 = arith.select %1, %c1_i32, %c64_i32 : i32
    %3 = vector.broadcast %2 : i32 to vector<8x256xi32>
    %4 = arith.remsi %0, %3 : vector<8x256xi32>
    %c0_i32_0 = arith.constant 0 : i32
    %5 = vector.broadcast %c0_i32_0 : i32 to vector<8x256xi32>
    %6 = arith.cmpi ne, %4, %5 : vector<8x256xi32>
    %c0_i32_1 = arith.constant 0 : i32
    %7 = vector.broadcast %c0_i32_1 : i32 to vector<8x256xi32>
    %8 = arith.cmpi slt, %4, %7 : vector<8x256xi32>
    %c0_i32_2 = arith.constant 0 : i32
    %9 = arith.cmpi slt, %2, %c0_i32_2 : i32
    %10 = vector.broadcast %9 : i1 to vector<8x256xi1>
    %11 = vector.broadcast %10 : vector<8x256xi1> to vector<8x256xi1>
    %12 = arith.xori %8, %11 : vector<8x256xi1>
    %13 = arith.andi %12, %6 : vector<8x256xi1>
    %14 = vector.broadcast %2 : i32 to vector<8x256xi32>
    %15 = arith.addi %4, %14 : vector<8x256xi32>
    %16 = arith.select %13, %15, %4 : vector<8x256xi1>, vector<8x256xi32>
    %c32_i32 = arith.constant 32 : i32
    %17 = vector.broadcast %c32_i32 : i32 to vector<8x256xi32>
    %18 = arith.cmpi slt, %16, %17 : vector<8x256xi32>
    %19 = tpu.iota {dimensions = array<i32: 1>} : vector<8x64xi32>
    %c32_i32_3 = arith.constant 32 : i32
    %20 = vector.broadcast %c32_i32_3 : i32 to vector<8x64xi32>
    %21 = arith.cmpi slt, %19, %20 : vector<8x64xi32>
    %c0 = arith.constant 0 : index
    %c0_4 = arith.constant 0 : index
    %22 = vector.load %arg1[%c0, %c0_4] : memref<64x16xf32, #tpu.memory_space<vmem>>, vector<64x16xf32>
    %c0_5 = arith.constant 0 : index
    %c0_6 = arith.constant 0 : index
    %23 = vector.load %arg2[%c0_5, %c0_6] : memref<16x256xf32, #tpu.memory_space<vmem>>, vector<16x256xf32>
    %cst = arith.constant dense<0.000000e+00> : vector<64x256xf32>
    %24 = tpu.matmul %22, %23, %cst {dimension_numbers = #tpu.dot_dimension_numbers<[1], [0], [0], [1], [0, 0, 1, 1], [], []>} : vector<64x16xf32>, vector<16x256xf32>, vector<64x256xf32> -> vector<64x256xf32>
    %c0_7 = arith.constant 0 : index
    %c0_8 = arith.constant 0 : index
    %25 = vector.load %arg4[%c0_7, %c0_8] : memref<1x256xf32, #tpu.memory_space<vmem>>, vector<1x256xf32>
    %26 = vector.broadcast %25 : vector<1x256xf32> to vector<64x256xf32>
    %27 = arith.addf %24, %26 : vector<64x256xf32>
    %28 = vector.extract_strided_slice %27 {offsets = [0, 0], sizes = [8, 256], strides = [1, 1]} : vector<64x256xf32> to vector<8x256xf32>
    %29 = vector.extract_strided_slice %27 {offsets = [56, 0], sizes = [8, 256], strides = [1, 1]} : vector<64x256xf32> to vector<8x256xf32>
    %30 = arith.select %18, %28, %29 : vector<8x256xi1>, vector<8x256xf32>
    %c0_9 = arith.constant 0 : index
    %c0_10 = arith.constant 0 : index
    %31 = vector.load %arg11[%c0_9, %c0_10] : memref<64x256xf32, #tpu.memory_space<vmem>>, vector<8x256xf32>
    tpu.vector_store %arg11[%c0_9, %c0_10], %30 {strides = array<i32>} : memref<64x256xf32, #tpu.memory_space<vmem>>, vector<8x256xf32>,
    %32 = vector.extract_strided_slice %27 {offsets = [8, 0], sizes = [8, 256], strides = [1, 1]} : vector<64x256xf32> to vector<8x256xf32>
    %33 = vector.extract_strided_slice %27 {offsets = [48, 0], sizes = [8, 256], strides = [1, 1]} : vector<64x256xf32> to vector<8x256xf32>
    %34 = arith.select %18, %32, %33 : vector<8x256xi1>, vector<8x256xf32>
    %c8 = arith.constant 8 : index
    %c0_11 = arith.constant 0 : index
    %35 = vector.load %arg11[%c8, %c0_11] : memref<64x256xf32, #tpu.memory_space<vmem>>, vector<8x256xf32>
    tpu.vector_store %arg11[%c8, %c0_11], %34 {strides = array<i32>} : memref<64x256xf32, #tpu.memory_space<vmem>>, vector<8x256xf32>,
    %36 = vector.extract_strided_slice %27 {offsets = [16, 0], sizes = [8, 256], strides = [1, 1]} : vector<64x256xf32> to vector<8x256xf32>
    %37 = vector.extract_strided_slice %27 {offsets = [40, 0], sizes = [8, 256], strides = [1, 1]} : vector<64x256xf32> to vector<8x256xf32>
    %38 = arith.select %18, %36, %37 : vector<8x256xi1>, vector<8x256xf32>
    %c16 = arith.constant 16 : index
    %c0_12 = arith.constant 0 : index
    %39 = vector.load %arg11[%c16, %c0_12] : memref<64x256xf32, #tpu.memory_space<vmem>>, vector<8x256xf32>
    tpu.vector_store %arg11[%c16, %c0_12], %38 {strides = array<i32>} : memref<64x256xf32, #tpu.memory_space<vmem>>, vector<8x256xf32>,
    %40 = vector.extract_strided_slice %27 {offsets = [24, 0], sizes = [8, 256], strides = [1, 1]} : vector<64x256xf32> to vector<8x256xf32>
    %41 = vector.extract_strided_slice %27 {offsets = [32, 0], sizes = [8, 256], strides = [1, 1]} : vector<64x256xf32> to vector<8x256xf32>
    %42 = arith.select %18, %40, %41 : vector<8x256xi1>, vector<8x256xf32>
    %c24 = arith.constant 24 : index
    %c0_13 = arith.constant 0 : index
    %43 = vector.load %arg11[%c24, %c0_13] : memref<64x256xf32, #tpu.memory_space<vmem>>, vector<8x256xf32>
    tpu.vector_store %arg11[%c24, %c0_13], %42 {strides = array<i32>} : memref<64x256xf32, #tpu.memory_space<vmem>>, vector<8x256xf32>,
    %44 = vector.extract_strided_slice %27 {offsets = [32, 0], sizes = [8, 256], strides = [1, 1]} : vector<64x256xf32> to vector<8x256xf32>
    %45 = vector.extract_strided_slice %27 {offsets = [24, 0], sizes = [8, 256], strides = [1, 1]} : vector<64x256xf32> to vector<8x256xf32>
    %46 = arith.select %18, %44, %45 : vector<8x256xi1>, vector<8x256xf32>
    %c32 = arith.constant 32 : index
    %c0_14 = arith.constant 0 : index
    %47 = vector.load %arg11[%c32, %c0_14] : memref<64x256xf32, #tpu.memory_space<vmem>>, vector<8x256xf32>
    tpu.vector_store %arg11[%c32, %c0_14], %46 {strides = array<i32>} : memref<64x256xf32, #tpu.memory_space<vmem>>, vector<8x256xf32>,
    %48 = vector.extract_strided_slice %27 {offsets = [40, 0], sizes = [8, 256], strides = [1, 1]} : vector<64x256xf32> to vector<8x256xf32>
    %49 = vector.extract_strided_slice %27 {offsets = [16, 0], sizes = [8, 256], strides = [1, 1]} : vector<64x256xf32> to vector<8x256xf32>
    %50 = arith.select %18, %48, %49 : vector<8x256xi1>, vector<8x256xf32>
    %c40 = arith.constant 40 : index
    %c0_15 = arith.constant 0 : index
    %51 = vector.load %arg11[%c40, %c0_15] : memref<64x256xf32, #tpu.memory_space<vmem>>, vector<8x256xf32>
    tpu.vector_store %arg11[%c40, %c0_15], %50 {strides = array<i32>} : memref<64x256xf32, #tpu.memory_space<vmem>>, vector<8x256xf32>,
    %52 = vector.extract_strided_slice %27 {offsets = [48, 0], sizes = [8, 256], strides = [1, 1]} : vector<64x256xf32> to vector<8x256xf32>
    %53 = vector.extract_strided_slice %27 {offsets = [8, 0], sizes = [8, 256], strides = [1, 1]} : vector<64x256xf32> to vector<8x256xf32>
    %54 = arith.select %18, %52, %53 : vector<8x256xi1>, vector<8x256xf32>
    %c48 = arith.constant 48 : index
    %c0_16 = arith.constant 0 : index
    %55 = vector.load %arg11[%c48, %c0_16] : memref<64x256xf32, #tpu.memory_space<vmem>>, vector<8x256xf32>
    tpu.vector_store %arg11[%c48, %c0_16], %54 {strides = array<i32>} : memref<64x256xf32, #tpu.memory_space<vmem>>, vector<8x256xf32>,
    %56 = vector.extract_strided_slice %27 {offsets = [56, 0], sizes = [8, 256], strides = [1, 1]} : vector<64x256xf32> to vector<8x256xf32>
    %57 = vector.extract_strided_slice %27 {offsets = [0, 0], sizes = [8, 256], strides = [1, 1]} : vector<64x256xf32> to vector<8x256xf32>
    %58 = arith.select %18, %56, %57 : vector<8x256xi1>, vector<8x256xf32>
    %c56 = arith.constant 56 : index
    %c0_17 = arith.constant 0 : index
    %59 = vector.load %arg11[%c56, %c0_17] : memref<64x256xf32, #tpu.memory_space<vmem>>, vector<8x256xf32>
    tpu.vector_store %arg11[%c56, %c0_17], %58 {strides = array<i32>} : memref<64x256xf32, #tpu.memory_space<vmem>>, vector<8x256xf32>,
    %c0_18 = arith.constant 0 : index
    %c0_19 = arith.constant 0 : index
    %60 = vector.load %arg3[%c0_18, %c0_19] : memref<64x256xf32, #tpu.memory_space<vmem>>, vector<64x256xf32>
    %cst_20 = arith.constant 0.000000e+00 : f32
    %61 = vector.broadcast %cst_20 : f32 to vector<8x64xf32>
    %cst_21 = arith.constant 0.000000e+00 : f32
    %62 = vector.broadcast %cst_21 : f32 to vector<8x64xf32>
    %c0_22 = arith.constant 0 : index
    %c0_23 = arith.constant 0 : index
    %63 = vector.load %arg11[%c0_22, %c0_23] : memref<64x256xf32, #tpu.memory_space<vmem>>, vector<8x256xf32>
    %cst_24 = arith.constant dense<0.000000e+00> : vector<8x256xf32>
    %64 = tpu.matmul %61, %60, %cst_24 {dimension_numbers = #tpu.dot_dimension_numbers<[1], [0], [0], [1], [0, 0, 1, 1], [], []>} : vector<8x64xf32>, vector<64x256xf32>, vector<8x256xf32> -> vector<8x256xf32>
    %65 = arith.addf %63, %64 : vector<8x256xf32>
    %66 = vector.extract_strided_slice %65 {offsets = [0, 0], sizes = [8, 192], strides = [1, 1]} : vector<8x256xf32> to vector<8x192xf32>
    %67 = arith.negf %66 : vector<8x192xf32>
    %68 = math.exp %67 : vector<8x192xf32>
    %cst_25 = arith.constant 1.000000e+00 : f32
    %69 = vector.broadcast %cst_25 : f32 to vector<8x192xf32>
    %70 = arith.addf %69, %68 : vector<8x192xf32>
    %71 = arith.divf %69, %70 : vector<8x192xf32>
    %72 = vector.extract_strided_slice %65 {offsets = [0, 192], sizes = [8, 64], strides = [1, 1]} : vector<8x256xf32> to vector<8x64xf32>
    %73 = math.tanh %72 : vector<8x64xf32>
    %74 = vector.extract_strided_slice %71 {offsets = [0, 0], sizes = [8, 64], strides = [1, 1]} : vector<8x192xf32> to vector<8x64xf32>
    %75 = vector.extract_strided_slice %71 {offsets = [0, 64], sizes = [8, 64], strides = [1, 1]} : vector<8x192xf32> to vector<8x64xf32>
    %76 = vector.extract_strided_slice %71 {offsets = [0, 128], sizes = [8, 64], strides = [1, 1]} : vector<8x192xf32> to vector<8x64xf32>
    %77 = arith.mulf %75, %62 : vector<8x64xf32>
    %78 = arith.mulf %74, %73 : vector<8x64xf32>
    %79 = arith.addf %77, %78 : vector<8x64xf32>
    %80 = math.tanh %79 : vector<8x64xf32>
    %81 = arith.mulf %76, %80 : vector<8x64xf32>
    %c8_26 = arith.constant 8 : index
    %c0_27 = arith.constant 0 : index
    %82 = vector.load %arg11[%c8_26, %c0_27] : memref<64x256xf32, #tpu.memory_space<vmem>>, vector<8x256xf32>
    %cst_28 = arith.constant dense<0.000000e+00> : vector<8x256xf32>
    %83 = tpu.matmul %81, %60, %cst_28 {dimension_numbers = #tpu.dot_dimension_numbers<[1], [0], [0], [1], [0, 0, 1, 1], [], []>} : vector<8x64xf32>, vector<64x256xf32>, vector<8x256xf32> -> vector<8x256xf32>
    %84 = arith.addf %82, %83 : vector<8x256xf32>
    %85 = vector.extract_strided_slice %84 {offsets = [0, 0], sizes = [8, 192], strides = [1, 1]} : vector<8x256xf32> to vector<8x192xf32>
    %86 = arith.negf %85 : vector<8x192xf32>
    %87 = math.exp %86 : vector<8x192xf32>
    %cst_29 = arith.constant 1.000000e+00 : f32
    %88 = vector.broadcast %cst_29 : f32 to vector<8x192xf32>
    %89 = arith.addf %88, %87 : vector<8x192xf32>
    %90 = arith.divf %88, %89 : vector<8x192xf32>
    %91 = vector.extract_strided_slice %84 {offsets = [0, 192], sizes = [8, 64], strides = [1, 1]} : vector<8x256xf32> to vector<8x64xf32>
    %92 = math.tanh %91 : vector<8x64xf32>
    %93 = vector.extract_strided_slice %90 {offsets = [0, 0], sizes = [8, 64], strides = [1, 1]} : vector<8x192xf32> to vector<8x64xf32>
    %94 = vector.extract_strided_slice %90 {offsets = [0, 64], sizes = [8, 64], strides = [1, 1]} : vector<8x192xf32> to vector<8x64xf32>
    %95 = vector.extract_strided_slice %90 {offsets = [0, 128], sizes = [8, 64], strides = [1, 1]} : vector<8x192xf32> to vector<8x64xf32>
    %96 = arith.mulf %94, %79 : vector<8x64xf32>
    %97 = arith.mulf %93, %92 : vector<8x64xf32>
    %98 = arith.addf %96, %97 : vector<8x64xf32>
    %99 = math.tanh %98 : vector<8x64xf32>
    %100 = arith.mulf %95, %99 : vector<8x64xf32>
    %c16_30 = arith.constant 16 : index
    %c0_31 = arith.constant 0 : index
    %101 = vector.load %arg11[%c16_30, %c0_31] : memref<64x256xf32, #tpu.memory_space<vmem>>, vector<8x256xf32>
    %cst_32 = arith.constant dense<0.000000e+00> : vector<8x256xf32>
    %102 = tpu.matmul %100, %60, %cst_32 {dimension_numbers = #tpu.dot_dimension_numbers<[1], [0], [0], [1], [0, 0, 1, 1], [], []>} : vector<8x64xf32>, vector<64x256xf32>, vector<8x256xf32> -> vector<8x256xf32>
    %103 = arith.addf %101, %102 : vector<8x256xf32>
    %104 = vector.extract_strided_slice %103 {offsets = [0, 0], sizes = [8, 192], strides = [1, 1]} : vector<8x256xf32> to vector<8x192xf32>
    %105 = arith.negf %104 : vector<8x192xf32>
    %106 = math.exp %105 : vector<8x192xf32>
    %cst_33 = arith.constant 1.000000e+00 : f32
    %107 = vector.broadcast %cst_33 : f32 to vector<8x192xf32>
    %108 = arith.addf %107, %106 : vector<8x192xf32>
    %109 = arith.divf %107, %108 : vector<8x192xf32>
    %110 = vector.extract_strided_slice %103 {offsets = [0, 192], sizes = [8, 64], strides = [1, 1]} : vector<8x256xf32> to vector<8x64xf32>
    %111 = math.tanh %110 : vector<8x64xf32>
    %112 = vector.extract_strided_slice %109 {offsets = [0, 0], sizes = [8, 64], strides = [1, 1]} : vector<8x192xf32> to vector<8x64xf32>
    %113 = vector.extract_strided_slice %109 {offsets = [0, 64], sizes = [8, 64], strides = [1, 1]} : vector<8x192xf32> to vector<8x64xf32>
    %114 = vector.extract_strided_slice %109 {offsets = [0, 128], sizes = [8, 64], strides = [1, 1]} : vector<8x192xf32> to vector<8x64xf32>
    %115 = arith.mulf %113, %98 : vector<8x64xf32>
    %116 = arith.mulf %112, %111 : vector<8x64xf32>
    %117 = arith.addf %115, %116 : vector<8x64xf32>
    %118 = math.tanh %117 : vector<8x64xf32>
    %119 = arith.mulf %114, %118 : vector<8x64xf32>
    %c24_34 = arith.constant 24 : index
    %c0_35 = arith.constant 0 : index
    %120 = vector.load %arg11[%c24_34, %c0_35] : memref<64x256xf32, #tpu.memory_space<vmem>>, vector<8x256xf32>
    %cst_36 = arith.constant dense<0.000000e+00> : vector<8x256xf32>
    %121 = tpu.matmul %119, %60, %cst_36 {dimension_numbers = #tpu.dot_dimension_numbers<[1], [0], [0], [1], [0, 0, 1, 1], [], []>} : vector<8x64xf32>, vector<64x256xf32>, vector<8x256xf32> -> vector<8x256xf32>
    %122 = arith.addf %120, %121 : vector<8x256xf32>
    %123 = vector.extract_strided_slice %122 {offsets = [0, 0], sizes = [8, 192], strides = [1, 1]} : vector<8x256xf32> to vector<8x192xf32>
    %124 = arith.negf %123 : vector<8x192xf32>
    %125 = math.exp %124 : vector<8x192xf32>
    %cst_37 = arith.constant 1.000000e+00 : f32
    %126 = vector.broadcast %cst_37 : f32 to vector<8x192xf32>
    %127 = arith.addf %126, %125 : vector<8x192xf32>
    %128 = arith.divf %126, %127 : vector<8x192xf32>
    %129 = vector.extract_strided_slice %122 {offsets = [0, 192], sizes = [8, 64], strides = [1, 1]} : vector<8x256xf32> to vector<8x64xf32>
    %130 = math.tanh %129 : vector<8x64xf32>
    %131 = vector.extract_strided_slice %128 {offsets = [0, 0], sizes = [8, 64], strides = [1, 1]} : vector<8x192xf32> to vector<8x64xf32>
    %132 = vector.extract_strided_slice %128 {offsets = [0, 64], sizes = [8, 64], strides = [1, 1]} : vector<8x192xf32> to vector<8x64xf32>
    %133 = vector.extract_strided_slice %128 {offsets = [0, 128], sizes = [8, 64], strides = [1, 1]} : vector<8x192xf32> to vector<8x64xf32>
    %134 = arith.mulf %132, %117 : vector<8x64xf32>
    %135 = arith.mulf %131, %130 : vector<8x64xf32>
    %136 = arith.addf %134, %135 : vector<8x64xf32>
    %137 = math.tanh %136 : vector<8x64xf32>
    %138 = arith.mulf %133, %137 : vector<8x64xf32>
    %c32_38 = arith.constant 32 : index
    %c0_39 = arith.constant 0 : index
    %139 = vector.load %arg11[%c32_38, %c0_39] : memref<64x256xf32, #tpu.memory_space<vmem>>, vector<8x256xf32>
    %cst_40 = arith.constant dense<0.000000e+00> : vector<8x256xf32>
    %140 = tpu.matmul %138, %60, %cst_40 {dimension_numbers = #tpu.dot_dimension_numbers<[1], [0], [0], [1], [0, 0, 1, 1], [], []>} : vector<8x64xf32>, vector<64x256xf32>, vector<8x256xf32> -> vector<8x256xf32>
    %141 = arith.addf %139, %140 : vector<8x256xf32>
    %142 = vector.extract_strided_slice %141 {offsets = [0, 0], sizes = [8, 192], strides = [1, 1]} : vector<8x256xf32> to vector<8x192xf32>
    %143 = arith.negf %142 : vector<8x192xf32>
    %144 = math.exp %143 : vector<8x192xf32>
    %cst_41 = arith.constant 1.000000e+00 : f32
    %145 = vector.broadcast %cst_41 : f32 to vector<8x192xf32>
    %146 = arith.addf %145, %144 : vector<8x192xf32>
    %147 = arith.divf %145, %146 : vector<8x192xf32>
    %148 = vector.extract_strided_slice %141 {offsets = [0, 192], sizes = [8, 64], strides = [1, 1]} : vector<8x256xf32> to vector<8x64xf32>
    %149 = math.tanh %148 : vector<8x64xf32>
    %150 = vector.extract_strided_slice %147 {offsets = [0, 0], sizes = [8, 64], strides = [1, 1]} : vector<8x192xf32> to vector<8x64xf32>
    %151 = vector.extract_strided_slice %147 {offsets = [0, 64], sizes = [8, 64], strides = [1, 1]} : vector<8x192xf32> to vector<8x64xf32>
    %152 = vector.extract_strided_slice %147 {offsets = [0, 128], sizes = [8, 64], strides = [1, 1]} : vector<8x192xf32> to vector<8x64xf32>
    %153 = arith.mulf %151, %136 : vector<8x64xf32>
    %154 = arith.mulf %150, %149 : vector<8x64xf32>
    %155 = arith.addf %153, %154 : vector<8x64xf32>
    %156 = math.tanh %155 : vector<8x64xf32>
    %157 = arith.mulf %152, %156 : vector<8x64xf32>
    %c40_42 = arith.constant 40 : index
    %c0_43 = arith.constant 0 : index
    %158 = vector.load %arg11[%c40_42, %c0_43] : memref<64x256xf32, #tpu.memory_space<vmem>>, vector<8x256xf32>
    %cst_44 = arith.constant dense<0.000000e+00> : vector<8x256xf32>
    %159 = tpu.matmul %157, %60, %cst_44 {dimension_numbers = #tpu.dot_dimension_numbers<[1], [0], [0], [1], [0, 0, 1, 1], [], []>} : vector<8x64xf32>, vector<64x256xf32>, vector<8x256xf32> -> vector<8x256xf32>
    %160 = arith.addf %158, %159 : vector<8x256xf32>
    %161 = vector.extract_strided_slice %160 {offsets = [0, 0], sizes = [8, 192], strides = [1, 1]} : vector<8x256xf32> to vector<8x192xf32>
    %162 = arith.negf %161 : vector<8x192xf32>
    %163 = math.exp %162 : vector<8x192xf32>
    %cst_45 = arith.constant 1.000000e+00 : f32
    %164 = vector.broadcast %cst_45 : f32 to vector<8x192xf32>
    %165 = arith.addf %164, %163 : vector<8x192xf32>
    %166 = arith.divf %164, %165 : vector<8x192xf32>
    %167 = vector.extract_strided_slice %160 {offsets = [0, 192], sizes = [8, 64], strides = [1, 1]} : vector<8x256xf32> to vector<8x64xf32>
    %168 = math.tanh %167 : vector<8x64xf32>
    %169 = vector.extract_strided_slice %166 {offsets = [0, 0], sizes = [8, 64], strides = [1, 1]} : vector<8x192xf32> to vector<8x64xf32>
    %170 = vector.extract_strided_slice %166 {offsets = [0, 64], sizes = [8, 64], strides = [1, 1]} : vector<8x192xf32> to vector<8x64xf32>
    %171 = vector.extract_strided_slice %166 {offsets = [0, 128], sizes = [8, 64], strides = [1, 1]} : vector<8x192xf32> to vector<8x64xf32>
    %172 = arith.mulf %170, %155 : vector<8x64xf32>
    %173 = arith.mulf %169, %168 : vector<8x64xf32>
    %174 = arith.addf %172, %173 : vector<8x64xf32>
    %175 = math.tanh %174 : vector<8x64xf32>
    %176 = arith.mulf %171, %175 : vector<8x64xf32>
    %c48_46 = arith.constant 48 : index
    %c0_47 = arith.constant 0 : index
    %177 = vector.load %arg11[%c48_46, %c0_47] : memref<64x256xf32, #tpu.memory_space<vmem>>, vector<8x256xf32>
    %cst_48 = arith.constant dense<0.000000e+00> : vector<8x256xf32>
    %178 = tpu.matmul %176, %60, %cst_48 {dimension_numbers = #tpu.dot_dimension_numbers<[1], [0], [0], [1], [0, 0, 1, 1], [], []>} : vector<8x64xf32>, vector<64x256xf32>, vector<8x256xf32> -> vector<8x256xf32>
    %179 = arith.addf %177, %178 : vector<8x256xf32>
    %180 = vector.extract_strided_slice %179 {offsets = [0, 0], sizes = [8, 192], strides = [1, 1]} : vector<8x256xf32> to vector<8x192xf32>
    %181 = arith.negf %180 : vector<8x192xf32>
    %182 = math.exp %181 : vector<8x192xf32>
    %cst_49 = arith.constant 1.000000e+00 : f32
    %183 = vector.broadcast %cst_49 : f32 to vector<8x192xf32>
    %184 = arith.addf %183, %182 : vector<8x192xf32>
    %185 = arith.divf %183, %184 : vector<8x192xf32>
    %186 = vector.extract_strided_slice %179 {offsets = [0, 192], sizes = [8, 64], strides = [1, 1]} : vector<8x256xf32> to vector<8x64xf32>
    %187 = math.tanh %186 : vector<8x64xf32>
    %188 = vector.extract_strided_slice %185 {offsets = [0, 0], sizes = [8, 64], strides = [1, 1]} : vector<8x192xf32> to vector<8x64xf32>
    %189 = vector.extract_strided_slice %185 {offsets = [0, 64], sizes = [8, 64], strides = [1, 1]} : vector<8x192xf32> to vector<8x64xf32>
    %190 = vector.extract_strided_slice %185 {offsets = [0, 128], sizes = [8, 64], strides = [1, 1]} : vector<8x192xf32> to vector<8x64xf32>
    %191 = arith.mulf %189, %174 : vector<8x64xf32>
    %192 = arith.mulf %188, %187 : vector<8x64xf32>
    %193 = arith.addf %191, %192 : vector<8x64xf32>
    %194 = math.tanh %193 : vector<8x64xf32>
    %195 = arith.mulf %190, %194 : vector<8x64xf32>
    %c56_50 = arith.constant 56 : index
    %c0_51 = arith.constant 0 : index
    %196 = vector.load %arg11[%c56_50, %c0_51] : memref<64x256xf32, #tpu.memory_space<vmem>>, vector<8x256xf32>
    %cst_52 = arith.constant dense<0.000000e+00> : vector<8x256xf32>
    %197 = tpu.matmul %195, %60, %cst_52 {dimension_numbers = #tpu.dot_dimension_numbers<[1], [0], [0], [1], [0, 0, 1, 1], [], []>} : vector<8x64xf32>, vector<64x256xf32>, vector<8x256xf32> -> vector<8x256xf32>
    %198 = arith.addf %196, %197 : vector<8x256xf32>
    %199 = vector.extract_strided_slice %198 {offsets = [0, 0], sizes = [8, 192], strides = [1, 1]} : vector<8x256xf32> to vector<8x192xf32>
    %200 = arith.negf %199 : vector<8x192xf32>
    %201 = math.exp %200 : vector<8x192xf32>
    %cst_53 = arith.constant 1.000000e+00 : f32
    %202 = vector.broadcast %cst_53 : f32 to vector<8x192xf32>
    %203 = arith.addf %202, %201 : vector<8x192xf32>
    %204 = arith.divf %202, %203 : vector<8x192xf32>
    %205 = vector.extract_strided_slice %198 {offsets = [0, 192], sizes = [8, 64], strides = [1, 1]} : vector<8x256xf32> to vector<8x64xf32>
    %206 = math.tanh %205 : vector<8x64xf32>
    %207 = vector.extract_strided_slice %204 {offsets = [0, 0], sizes = [8, 64], strides = [1, 1]} : vector<8x192xf32> to vector<8x64xf32>
    %208 = vector.extract_strided_slice %204 {offsets = [0, 64], sizes = [8, 64], strides = [1, 1]} : vector<8x192xf32> to vector<8x64xf32>
    %209 = vector.extract_strided_slice %204 {offsets = [0, 128], sizes = [8, 64], strides = [1, 1]} : vector<8x192xf32> to vector<8x64xf32>
    %210 = arith.mulf %208, %193 : vector<8x64xf32>
    %211 = arith.mulf %207, %206 : vector<8x64xf32>
    %212 = arith.addf %210, %211 : vector<8x64xf32>
    %213 = math.tanh %212 : vector<8x64xf32>
    %214 = arith.mulf %209, %213 : vector<8x64xf32>
    %215 = arith.select %21, %81, %214 : vector<8x64xi1>, vector<8x64xf32>
    %cst_54 = arith.constant 0.000000e+00 : f32
    %216 = vector.broadcast %cst_54 : f32 to vector<8x64xf32>
    %217 = arith.maximumf %215, %216 : vector<8x64xf32>
    %c0_55 = arith.constant 0 : index
    %c0_56 = arith.constant 0 : index
    %218 = vector.load %arg12[%c0_55, %c0_56] : memref<64x64xf32, #tpu.memory_space<vmem>>, vector<8x64xf32>
    tpu.vector_store %arg12[%c0_55, %c0_56], %217 {strides = array<i32>} : memref<64x64xf32, #tpu.memory_space<vmem>>, vector<8x64xf32>,
    %219 = arith.select %21, %100, %195 : vector<8x64xi1>, vector<8x64xf32>
    %cst_57 = arith.constant 0.000000e+00 : f32
    %220 = vector.broadcast %cst_57 : f32 to vector<8x64xf32>
    %221 = arith.maximumf %219, %220 : vector<8x64xf32>
    %c8_58 = arith.constant 8 : index
    %c0_59 = arith.constant 0 : index
    %222 = vector.load %arg12[%c8_58, %c0_59] : memref<64x64xf32, #tpu.memory_space<vmem>>, vector<8x64xf32>
    tpu.vector_store %arg12[%c8_58, %c0_59], %221 {strides = array<i32>} : memref<64x64xf32, #tpu.memory_space<vmem>>, vector<8x64xf32>,
    %223 = arith.select %21, %119, %176 : vector<8x64xi1>, vector<8x64xf32>
    %cst_60 = arith.constant 0.000000e+00 : f32
    %224 = vector.broadcast %cst_60 : f32 to vector<8x64xf32>
    %225 = arith.maximumf %223, %224 : vector<8x64xf32>
    %c16_61 = arith.constant 16 : index
    %c0_62 = arith.constant 0 : index
    %226 = vector.load %arg12[%c16_61, %c0_62] : memref<64x64xf32, #tpu.memory_space<vmem>>, vector<8x64xf32>
    tpu.vector_store %arg12[%c16_61, %c0_62], %225 {strides = array<i32>} : memref<64x64xf32, #tpu.memory_space<vmem>>, vector<8x64xf32>,
    %227 = arith.select %21, %138, %157 : vector<8x64xi1>, vector<8x64xf32>
    %cst_63 = arith.constant 0.000000e+00 : f32
    %228 = vector.broadcast %cst_63 : f32 to vector<8x64xf32>
    %229 = arith.maximumf %227, %228 : vector<8x64xf32>
    %c24_64 = arith.constant 24 : index
    %c0_65 = arith.constant 0 : index
    %230 = vector.load %arg12[%c24_64, %c0_65] : memref<64x64xf32, #tpu.memory_space<vmem>>, vector<8x64xf32>
    tpu.vector_store %arg12[%c24_64, %c0_65], %229 {strides = array<i32>} : memref<64x64xf32, #tpu.memory_space<vmem>>, vector<8x64xf32>,
    %231 = arith.select %21, %157, %138 : vector<8x64xi1>, vector<8x64xf32>
    %cst_66 = arith.constant 0.000000e+00 : f32
    %232 = vector.broadcast %cst_66 : f32 to vector<8x64xf32>
    %233 = arith.maximumf %231, %232 : vector<8x64xf32>
    %c32_67 = arith.constant 32 : index
    %c0_68 = arith.constant 0 : index
    %234 = vector.load %arg12[%c32_67, %c0_68] : memref<64x64xf32, #tpu.memory_space<vmem>>, vector<8x64xf32>
    tpu.vector_store %arg12[%c32_67, %c0_68], %233 {strides = array<i32>} : memref<64x64xf32, #tpu.memory_space<vmem>>, vector<8x64xf32>,
    %235 = arith.select %21, %176, %119 : vector<8x64xi1>, vector<8x64xf32>
    %cst_69 = arith.constant 0.000000e+00 : f32
    %236 = vector.broadcast %cst_69 : f32 to vector<8x64xf32>
    %237 = arith.maximumf %235, %236 : vector<8x64xf32>
    %c40_70 = arith.constant 40 : index
    %c0_71 = arith.constant 0 : index
    %238 = vector.load %arg12[%c40_70, %c0_71] : memref<64x64xf32, #tpu.memory_space<vmem>>, vector<8x64xf32>
    tpu.vector_store %arg12[%c40_70, %c0_71], %237 {strides = array<i32>} : memref<64x64xf32, #tpu.memory_space<vmem>>, vector<8x64xf32>,
    %239 = arith.select %21, %195, %100 : vector<8x64xi1>, vector<8x64xf32>
    %cst_72 = arith.constant 0.000000e+00 : f32
    %240 = vector.broadcast %cst_72 : f32 to vector<8x64xf32>
    %241 = arith.maximumf %239, %240 : vector<8x64xf32>
    %c48_73 = arith.constant 48 : index
    %c0_74 = arith.constant 0 : index
    %242 = vector.load %arg12[%c48_73, %c0_74] : memref<64x64xf32, #tpu.memory_space<vmem>>, vector<8x64xf32>
    tpu.vector_store %arg12[%c48_73, %c0_74], %241 {strides = array<i32>} : memref<64x64xf32, #tpu.memory_space<vmem>>, vector<8x64xf32>,
    %243 = arith.select %21, %214, %81 : vector<8x64xi1>, vector<8x64xf32>
    %cst_75 = arith.constant 0.000000e+00 : f32
    %244 = vector.broadcast %cst_75 : f32 to vector<8x64xf32>
    %245 = arith.maximumf %243, %244 : vector<8x64xf32>
    %c56_76 = arith.constant 56 : index
    %c0_77 = arith.constant 0 : index
    %246 = vector.load %arg12[%c56_76, %c0_77] : memref<64x64xf32, #tpu.memory_space<vmem>>, vector<8x64xf32>
    tpu.vector_store %arg12[%c56_76, %c0_77], %245 {strides = array<i32>} : memref<64x64xf32, #tpu.memory_space<vmem>>, vector<8x64xf32>,
    %c0_78 = arith.constant 0 : index
    %c0_79 = arith.constant 0 : index
    %247 = vector.load %arg12[%c0_78, %c0_79] : memref<64x64xf32, #tpu.memory_space<vmem>>, vector<64x64xf32>
    %c0_80 = arith.constant 0 : index
    %c0_81 = arith.constant 0 : index
    %248 = vector.load %arg5[%c0_80, %c0_81] : memref<64x256xf32, #tpu.memory_space<vmem>>, vector<64x256xf32>
    %cst_82 = arith.constant dense<0.000000e+00> : vector<64x256xf32>
    %249 = tpu.matmul %247, %248, %cst_82 {dimension_numbers = #tpu.dot_dimension_numbers<[1], [0], [0], [1], [0, 0, 1, 1], [], []>} : vector<64x64xf32>, vector<64x256xf32>, vector<64x256xf32> -> vector<64x256xf32>
    %c0_83 = arith.constant 0 : index
    %c0_84 = arith.constant 0 : index
    %250 = vector.load %arg7[%c0_83, %c0_84] : memref<1x256xf32, #tpu.memory_space<vmem>>, vector<1x256xf32>
    %251 = vector.broadcast %250 : vector<1x256xf32> to vector<64x256xf32>
    %252 = arith.addf %249, %251 : vector<64x256xf32>
    %253 = vector.extract_strided_slice %252 {offsets = [0, 0], sizes = [8, 256], strides = [1, 1]} : vector<64x256xf32> to vector<8x256xf32>
    %254 = vector.extract_strided_slice %252 {offsets = [56, 0], sizes = [8, 256], strides = [1, 1]} : vector<64x256xf32> to vector<8x256xf32>
    %255 = arith.select %18, %253, %254 : vector<8x256xi1>, vector<8x256xf32>
    %c0_85 = arith.constant 0 : index
    %c0_86 = arith.constant 0 : index
    %256 = vector.load %arg11[%c0_85, %c0_86] : memref<64x256xf32, #tpu.memory_space<vmem>>, vector<8x256xf32>
    tpu.vector_store %arg11[%c0_85, %c0_86], %255 {strides = array<i32>} : memref<64x256xf32, #tpu.memory_space<vmem>>, vector<8x256xf32>,
    %257 = vector.extract_strided_slice %252 {offsets = [8, 0], sizes = [8, 256], strides = [1, 1]} : vector<64x256xf32> to vector<8x256xf32>
    %258 = vector.extract_strided_slice %252 {offsets = [48, 0], sizes = [8, 256], strides = [1, 1]} : vector<64x256xf32> to vector<8x256xf32>
    %259 = arith.select %18, %257, %258 : vector<8x256xi1>, vector<8x256xf32>
    %c8_87 = arith.constant 8 : index
    %c0_88 = arith.constant 0 : index
    %260 = vector.load %arg11[%c8_87, %c0_88] : memref<64x256xf32, #tpu.memory_space<vmem>>, vector<8x256xf32>
    tpu.vector_store %arg11[%c8_87, %c0_88], %259 {strides = array<i32>} : memref<64x256xf32, #tpu.memory_space<vmem>>, vector<8x256xf32>,
    %261 = vector.extract_strided_slice %252 {offsets = [16, 0], sizes = [8, 256], strides = [1, 1]} : vector<64x256xf32> to vector<8x256xf32>
    %262 = vector.extract_strided_slice %252 {offsets = [40, 0], sizes = [8, 256], strides = [1, 1]} : vector<64x256xf32> to vector<8x256xf32>
    %263 = arith.select %18, %261, %262 : vector<8x256xi1>, vector<8x256xf32>
    %c16_89 = arith.constant 16 : index
    %c0_90 = arith.constant 0 : index
    %264 = vector.load %arg11[%c16_89, %c0_90] : memref<64x256xf32, #tpu.memory_space<vmem>>, vector<8x256xf32>
    tpu.vector_store %arg11[%c16_89, %c0_90], %263 {strides = array<i32>} : memref<64x256xf32, #tpu.memory_space<vmem>>, vector<8x256xf32>,
    %265 = vector.extract_strided_slice %252 {offsets = [24, 0], sizes = [8, 256], strides = [1, 1]} : vector<64x256xf32> to vector<8x256xf32>
    %266 = vector.extract_strided_slice %252 {offsets = [32, 0], sizes = [8, 256], strides = [1, 1]} : vector<64x256xf32> to vector<8x256xf32>
    %267 = arith.select %18, %265, %266 : vector<8x256xi1>, vector<8x256xf32>
    %c24_91 = arith.constant 24 : index
    %c0_92 = arith.constant 0 : index
    %268 = vector.load %arg11[%c24_91, %c0_92] : memref<64x256xf32, #tpu.memory_space<vmem>>, vector<8x256xf32>
    tpu.vector_store %arg11[%c24_91, %c0_92], %267 {strides = array<i32>} : memref<64x256xf32, #tpu.memory_space<vmem>>, vector<8x256xf32>,
    %269 = vector.extract_strided_slice %252 {offsets = [32, 0], sizes = [8, 256], strides = [1, 1]} : vector<64x256xf32> to vector<8x256xf32>
    %270 = vector.extract_strided_slice %252 {offsets = [24, 0], sizes = [8, 256], strides = [1, 1]} : vector<64x256xf32> to vector<8x256xf32>
    %271 = arith.select %18, %269, %270 : vector<8x256xi1>, vector<8x256xf32>
    %c32_93 = arith.constant 32 : index
    %c0_94 = arith.constant 0 : index
    %272 = vector.load %arg11[%c32_93, %c0_94] : memref<64x256xf32, #tpu.memory_space<vmem>>, vector<8x256xf32>
    tpu.vector_store %arg11[%c32_93, %c0_94], %271 {strides = array<i32>} : memref<64x256xf32, #tpu.memory_space<vmem>>, vector<8x256xf32>,
    %273 = vector.extract_strided_slice %252 {offsets = [40, 0], sizes = [8, 256], strides = [1, 1]} : vector<64x256xf32> to vector<8x256xf32>
    %274 = vector.extract_strided_slice %252 {offsets = [16, 0], sizes = [8, 256], strides = [1, 1]} : vector<64x256xf32> to vector<8x256xf32>
    %275 = arith.select %18, %273, %274 : vector<8x256xi1>, vector<8x256xf32>
    %c40_95 = arith.constant 40 : index
    %c0_96 = arith.constant 0 : index
    %276 = vector.load %arg11[%c40_95, %c0_96] : memref<64x256xf32, #tpu.memory_space<vmem>>, vector<8x256xf32>
    tpu.vector_store %arg11[%c40_95, %c0_96], %275 {strides = array<i32>} : memref<64x256xf32, #tpu.memory_space<vmem>>, vector<8x256xf32>,
    %277 = vector.extract_strided_slice %252 {offsets = [48, 0], sizes = [8, 256], strides = [1, 1]} : vector<64x256xf32> to vector<8x256xf32>
    %278 = vector.extract_strided_slice %252 {offsets = [8, 0], sizes = [8, 256], strides = [1, 1]} : vector<64x256xf32> to vector<8x256xf32>
    %279 = arith.select %18, %277, %278 : vector<8x256xi1>, vector<8x256xf32>
    %c48_97 = arith.constant 48 : index
    %c0_98 = arith.constant 0 : index
    %280 = vector.load %arg11[%c48_97, %c0_98] : memref<64x256xf32, #tpu.memory_space<vmem>>, vector<8x256xf32>
    tpu.vector_store %arg11[%c48_97, %c0_98], %279 {strides = array<i32>} : memref<64x256xf32, #tpu.memory_space<vmem>>, vector<8x256xf32>,
    %281 = vector.extract_strided_slice %252 {offsets = [56, 0], sizes = [8, 256], strides = [1, 1]} : vector<64x256xf32> to vector<8x256xf32>
    %282 = vector.extract_strided_slice %252 {offsets = [0, 0], sizes = [8, 256], strides = [1, 1]} : vector<64x256xf32> to vector<8x256xf32>
    %283 = arith.select %18, %281, %282 : vector<8x256xi1>, vector<8x256xf32>
    %c56_99 = arith.constant 56 : index
    %c0_100 = arith.constant 0 : index
    %284 = vector.load %arg11[%c56_99, %c0_100] : memref<64x256xf32, #tpu.memory_space<vmem>>, vector<8x256xf32>
    tpu.vector_store %arg11[%c56_99, %c0_100], %283 {strides = array<i32>} : memref<64x256xf32, #tpu.memory_space<vmem>>, vector<8x256xf32>,
    %c0_101 = arith.constant 0 : index
    %c0_102 = arith.constant 0 : index
    %285 = vector.load %arg6[%c0_101, %c0_102] : memref<64x256xf32, #tpu.memory_space<vmem>>, vector<64x256xf32>
    %cst_103 = arith.constant 0.000000e+00 : f32
    %286 = vector.broadcast %cst_103 : f32 to vector<8x64xf32>
    %cst_104 = arith.constant 0.000000e+00 : f32
    %287 = vector.broadcast %cst_104 : f32 to vector<8x64xf32>
    %c0_105 = arith.constant 0 : index
    %c0_106 = arith.constant 0 : index
    %288 = vector.load %arg11[%c0_105, %c0_106] : memref<64x256xf32, #tpu.memory_space<vmem>>, vector<8x256xf32>
    %cst_107 = arith.constant dense<0.000000e+00> : vector<8x256xf32>
    %289 = tpu.matmul %286, %285, %cst_107 {dimension_numbers = #tpu.dot_dimension_numbers<[1], [0], [0], [1], [0, 0, 1, 1], [], []>} : vector<8x64xf32>, vector<64x256xf32>, vector<8x256xf32> -> vector<8x256xf32>
    %290 = arith.addf %288, %289 : vector<8x256xf32>
    %291 = vector.extract_strided_slice %290 {offsets = [0, 0], sizes = [8, 192], strides = [1, 1]} : vector<8x256xf32> to vector<8x192xf32>
    %292 = arith.negf %291 : vector<8x192xf32>
    %293 = math.exp %292 : vector<8x192xf32>
    %cst_108 = arith.constant 1.000000e+00 : f32
    %294 = vector.broadcast %cst_108 : f32 to vector<8x192xf32>
    %295 = arith.addf %294, %293 : vector<8x192xf32>
    %296 = arith.divf %294, %295 : vector<8x192xf32>
    %297 = vector.extract_strided_slice %290 {offsets = [0, 192], sizes = [8, 64], strides = [1, 1]} : vector<8x256xf32> to vector<8x64xf32>
    %298 = math.tanh %297 : vector<8x64xf32>
    %299 = vector.extract_strided_slice %296 {offsets = [0, 0], sizes = [8, 64], strides = [1, 1]} : vector<8x192xf32> to vector<8x64xf32>
    %300 = vector.extract_strided_slice %296 {offsets = [0, 64], sizes = [8, 64], strides = [1, 1]} : vector<8x192xf32> to vector<8x64xf32>
    %301 = vector.extract_strided_slice %296 {offsets = [0, 128], sizes = [8, 64], strides = [1, 1]} : vector<8x192xf32> to vector<8x64xf32>
    %302 = arith.mulf %300, %287 : vector<8x64xf32>
    %303 = arith.mulf %299, %298 : vector<8x64xf32>
    %304 = arith.addf %302, %303 : vector<8x64xf32>
    %305 = math.tanh %304 : vector<8x64xf32>
    %306 = arith.mulf %301, %305 : vector<8x64xf32>
    %c8_109 = arith.constant 8 : index
    %c0_110 = arith.constant 0 : index
    %307 = vector.load %arg11[%c8_109, %c0_110] : memref<64x256xf32, #tpu.memory_space<vmem>>, vector<8x256xf32>
    %cst_111 = arith.constant dense<0.000000e+00> : vector<8x256xf32>
    %308 = tpu.matmul %306, %285, %cst_111 {dimension_numbers = #tpu.dot_dimension_numbers<[1], [0], [0], [1], [0, 0, 1, 1], [], []>} : vector<8x64xf32>, vector<64x256xf32>, vector<8x256xf32> -> vector<8x256xf32>
    %309 = arith.addf %307, %308 : vector<8x256xf32>
    %310 = vector.extract_strided_slice %309 {offsets = [0, 0], sizes = [8, 192], strides = [1, 1]} : vector<8x256xf32> to vector<8x192xf32>
    %311 = arith.negf %310 : vector<8x192xf32>
    %312 = math.exp %311 : vector<8x192xf32>
    %cst_112 = arith.constant 1.000000e+00 : f32
    %313 = vector.broadcast %cst_112 : f32 to vector<8x192xf32>
    %314 = arith.addf %313, %312 : vector<8x192xf32>
    %315 = arith.divf %313, %314 : vector<8x192xf32>
    %316 = vector.extract_strided_slice %309 {offsets = [0, 192], sizes = [8, 64], strides = [1, 1]} : vector<8x256xf32> to vector<8x64xf32>
    %317 = math.tanh %316 : vector<8x64xf32>
    %318 = vector.extract_strided_slice %315 {offsets = [0, 0], sizes = [8, 64], strides = [1, 1]} : vector<8x192xf32> to vector<8x64xf32>
    %319 = vector.extract_strided_slice %315 {offsets = [0, 64], sizes = [8, 64], strides = [1, 1]} : vector<8x192xf32> to vector<8x64xf32>
    %320 = vector.extract_strided_slice %315 {offsets = [0, 128], sizes = [8, 64], strides = [1, 1]} : vector<8x192xf32> to vector<8x64xf32>
    %321 = arith.mulf %319, %304 : vector<8x64xf32>
    %322 = arith.mulf %318, %317 : vector<8x64xf32>
    %323 = arith.addf %321, %322 : vector<8x64xf32>
    %324 = math.tanh %323 : vector<8x64xf32>
    %325 = arith.mulf %320, %324 : vector<8x64xf32>
    %c16_113 = arith.constant 16 : index
    %c0_114 = arith.constant 0 : index
    %326 = vector.load %arg11[%c16_113, %c0_114] : memref<64x256xf32, #tpu.memory_space<vmem>>, vector<8x256xf32>
    %cst_115 = arith.constant dense<0.000000e+00> : vector<8x256xf32>
    %327 = tpu.matmul %325, %285, %cst_115 {dimension_numbers = #tpu.dot_dimension_numbers<[1], [0], [0], [1], [0, 0, 1, 1], [], []>} : vector<8x64xf32>, vector<64x256xf32>, vector<8x256xf32> -> vector<8x256xf32>
    %328 = arith.addf %326, %327 : vector<8x256xf32>
    %329 = vector.extract_strided_slice %328 {offsets = [0, 0], sizes = [8, 192], strides = [1, 1]} : vector<8x256xf32> to vector<8x192xf32>
    %330 = arith.negf %329 : vector<8x192xf32>
    %331 = math.exp %330 : vector<8x192xf32>
    %cst_116 = arith.constant 1.000000e+00 : f32
    %332 = vector.broadcast %cst_116 : f32 to vector<8x192xf32>
    %333 = arith.addf %332, %331 : vector<8x192xf32>
    %334 = arith.divf %332, %333 : vector<8x192xf32>
    %335 = vector.extract_strided_slice %328 {offsets = [0, 192], sizes = [8, 64], strides = [1, 1]} : vector<8x256xf32> to vector<8x64xf32>
    %336 = math.tanh %335 : vector<8x64xf32>
    %337 = vector.extract_strided_slice %334 {offsets = [0, 0], sizes = [8, 64], strides = [1, 1]} : vector<8x192xf32> to vector<8x64xf32>
    %338 = vector.extract_strided_slice %334 {offsets = [0, 64], sizes = [8, 64], strides = [1, 1]} : vector<8x192xf32> to vector<8x64xf32>
    %339 = vector.extract_strided_slice %334 {offsets = [0, 128], sizes = [8, 64], strides = [1, 1]} : vector<8x192xf32> to vector<8x64xf32>
    %340 = arith.mulf %338, %323 : vector<8x64xf32>
    %341 = arith.mulf %337, %336 : vector<8x64xf32>
    %342 = arith.addf %340, %341 : vector<8x64xf32>
    %343 = math.tanh %342 : vector<8x64xf32>
    %344 = arith.mulf %339, %343 : vector<8x64xf32>
    %c24_117 = arith.constant 24 : index
    %c0_118 = arith.constant 0 : index
    %345 = vector.load %arg11[%c24_117, %c0_118] : memref<64x256xf32, #tpu.memory_space<vmem>>, vector<8x256xf32>
    %cst_119 = arith.constant dense<0.000000e+00> : vector<8x256xf32>
    %346 = tpu.matmul %344, %285, %cst_119 {dimension_numbers = #tpu.dot_dimension_numbers<[1], [0], [0], [1], [0, 0, 1, 1], [], []>} : vector<8x64xf32>, vector<64x256xf32>, vector<8x256xf32> -> vector<8x256xf32>
    %347 = arith.addf %345, %346 : vector<8x256xf32>
    %348 = vector.extract_strided_slice %347 {offsets = [0, 0], sizes = [8, 192], strides = [1, 1]} : vector<8x256xf32> to vector<8x192xf32>
    %349 = arith.negf %348 : vector<8x192xf32>
    %350 = math.exp %349 : vector<8x192xf32>
    %cst_120 = arith.constant 1.000000e+00 : f32
    %351 = vector.broadcast %cst_120 : f32 to vector<8x192xf32>
    %352 = arith.addf %351, %350 : vector<8x192xf32>
    %353 = arith.divf %351, %352 : vector<8x192xf32>
    %354 = vector.extract_strided_slice %347 {offsets = [0, 192], sizes = [8, 64], strides = [1, 1]} : vector<8x256xf32> to vector<8x64xf32>
    %355 = math.tanh %354 : vector<8x64xf32>
    %356 = vector.extract_strided_slice %353 {offsets = [0, 0], sizes = [8, 64], strides = [1, 1]} : vector<8x192xf32> to vector<8x64xf32>
    %357 = vector.extract_strided_slice %353 {offsets = [0, 64], sizes = [8, 64], strides = [1, 1]} : vector<8x192xf32> to vector<8x64xf32>
    %358 = vector.extract_strided_slice %353 {offsets = [0, 128], sizes = [8, 64], strides = [1, 1]} : vector<8x192xf32> to vector<8x64xf32>
    %359 = arith.mulf %357, %342 : vector<8x64xf32>
    %360 = arith.mulf %356, %355 : vector<8x64xf32>
    %361 = arith.addf %359, %360 : vector<8x64xf32>
    %362 = math.tanh %361 : vector<8x64xf32>
    %363 = arith.mulf %358, %362 : vector<8x64xf32>
    %c32_121 = arith.constant 32 : index
    %c0_122 = arith.constant 0 : index
    %364 = vector.load %arg11[%c32_121, %c0_122] : memref<64x256xf32, #tpu.memory_space<vmem>>, vector<8x256xf32>
    %cst_123 = arith.constant dense<0.000000e+00> : vector<8x256xf32>
    %365 = tpu.matmul %363, %285, %cst_123 {dimension_numbers = #tpu.dot_dimension_numbers<[1], [0], [0], [1], [0, 0, 1, 1], [], []>} : vector<8x64xf32>, vector<64x256xf32>, vector<8x256xf32> -> vector<8x256xf32>
    %366 = arith.addf %364, %365 : vector<8x256xf32>
    %367 = vector.extract_strided_slice %366 {offsets = [0, 0], sizes = [8, 192], strides = [1, 1]} : vector<8x256xf32> to vector<8x192xf32>
    %368 = arith.negf %367 : vector<8x192xf32>
    %369 = math.exp %368 : vector<8x192xf32>
    %cst_124 = arith.constant 1.000000e+00 : f32
    %370 = vector.broadcast %cst_124 : f32 to vector<8x192xf32>
    %371 = arith.addf %370, %369 : vector<8x192xf32>
    %372 = arith.divf %370, %371 : vector<8x192xf32>
    %373 = vector.extract_strided_slice %366 {offsets = [0, 192], sizes = [8, 64], strides = [1, 1]} : vector<8x256xf32> to vector<8x64xf32>
    %374 = math.tanh %373 : vector<8x64xf32>
    %375 = vector.extract_strided_slice %372 {offsets = [0, 0], sizes = [8, 64], strides = [1, 1]} : vector<8x192xf32> to vector<8x64xf32>
    %376 = vector.extract_strided_slice %372 {offsets = [0, 64], sizes = [8, 64], strides = [1, 1]} : vector<8x192xf32> to vector<8x64xf32>
    %377 = vector.extract_strided_slice %372 {offsets = [0, 128], sizes = [8, 64], strides = [1, 1]} : vector<8x192xf32> to vector<8x64xf32>
    %378 = arith.mulf %376, %361 : vector<8x64xf32>
    %379 = arith.mulf %375, %374 : vector<8x64xf32>
    %380 = arith.addf %378, %379 : vector<8x64xf32>
    %381 = math.tanh %380 : vector<8x64xf32>
    %382 = arith.mulf %377, %381 : vector<8x64xf32>
    %c40_125 = arith.constant 40 : index
    %c0_126 = arith.constant 0 : index
    %383 = vector.load %arg11[%c40_125, %c0_126] : memref<64x256xf32, #tpu.memory_space<vmem>>, vector<8x256xf32>
    %cst_127 = arith.constant dense<0.000000e+00> : vector<8x256xf32>
    %384 = tpu.matmul %382, %285, %cst_127 {dimension_numbers = #tpu.dot_dimension_numbers<[1], [0], [0], [1], [0, 0, 1, 1], [], []>} : vector<8x64xf32>, vector<64x256xf32>, vector<8x256xf32> -> vector<8x256xf32>
    %385 = arith.addf %383, %384 : vector<8x256xf32>
    %386 = vector.extract_strided_slice %385 {offsets = [0, 0], sizes = [8, 192], strides = [1, 1]} : vector<8x256xf32> to vector<8x192xf32>
    %387 = arith.negf %386 : vector<8x192xf32>
    %388 = math.exp %387 : vector<8x192xf32>
    %cst_128 = arith.constant 1.000000e+00 : f32
    %389 = vector.broadcast %cst_128 : f32 to vector<8x192xf32>
    %390 = arith.addf %389, %388 : vector<8x192xf32>
    %391 = arith.divf %389, %390 : vector<8x192xf32>
    %392 = vector.extract_strided_slice %385 {offsets = [0, 192], sizes = [8, 64], strides = [1, 1]} : vector<8x256xf32> to vector<8x64xf32>
    %393 = math.tanh %392 : vector<8x64xf32>
    %394 = vector.extract_strided_slice %391 {offsets = [0, 0], sizes = [8, 64], strides = [1, 1]} : vector<8x192xf32> to vector<8x64xf32>
    %395 = vector.extract_strided_slice %391 {offsets = [0, 64], sizes = [8, 64], strides = [1, 1]} : vector<8x192xf32> to vector<8x64xf32>
    %396 = vector.extract_strided_slice %391 {offsets = [0, 128], sizes = [8, 64], strides = [1, 1]} : vector<8x192xf32> to vector<8x64xf32>
    %397 = arith.mulf %395, %380 : vector<8x64xf32>
    %398 = arith.mulf %394, %393 : vector<8x64xf32>
    %399 = arith.addf %397, %398 : vector<8x64xf32>
    %400 = math.tanh %399 : vector<8x64xf32>
    %401 = arith.mulf %396, %400 : vector<8x64xf32>
    %c48_129 = arith.constant 48 : index
    %c0_130 = arith.constant 0 : index
    %402 = vector.load %arg11[%c48_129, %c0_130] : memref<64x256xf32, #tpu.memory_space<vmem>>, vector<8x256xf32>
    %cst_131 = arith.constant dense<0.000000e+00> : vector<8x256xf32>
    %403 = tpu.matmul %401, %285, %cst_131 {dimension_numbers = #tpu.dot_dimension_numbers<[1], [0], [0], [1], [0, 0, 1, 1], [], []>} : vector<8x64xf32>, vector<64x256xf32>, vector<8x256xf32> -> vector<8x256xf32>
    %404 = arith.addf %402, %403 : vector<8x256xf32>
    %405 = vector.extract_strided_slice %404 {offsets = [0, 0], sizes = [8, 192], strides = [1, 1]} : vector<8x256xf32> to vector<8x192xf32>
    %406 = arith.negf %405 : vector<8x192xf32>
    %407 = math.exp %406 : vector<8x192xf32>
    %cst_132 = arith.constant 1.000000e+00 : f32
    %408 = vector.broadcast %cst_132 : f32 to vector<8x192xf32>
    %409 = arith.addf %408, %407 : vector<8x192xf32>
    %410 = arith.divf %408, %409 : vector<8x192xf32>
    %411 = vector.extract_strided_slice %404 {offsets = [0, 192], sizes = [8, 64], strides = [1, 1]} : vector<8x256xf32> to vector<8x64xf32>
    %412 = math.tanh %411 : vector<8x64xf32>
    %413 = vector.extract_strided_slice %410 {offsets = [0, 0], sizes = [8, 64], strides = [1, 1]} : vector<8x192xf32> to vector<8x64xf32>
    %414 = vector.extract_strided_slice %410 {offsets = [0, 64], sizes = [8, 64], strides = [1, 1]} : vector<8x192xf32> to vector<8x64xf32>
    %415 = vector.extract_strided_slice %410 {offsets = [0, 128], sizes = [8, 64], strides = [1, 1]} : vector<8x192xf32> to vector<8x64xf32>
    %416 = arith.mulf %414, %399 : vector<8x64xf32>
    %417 = arith.mulf %413, %412 : vector<8x64xf32>
    %418 = arith.addf %416, %417 : vector<8x64xf32>
    %419 = math.tanh %418 : vector<8x64xf32>
    %420 = arith.mulf %415, %419 : vector<8x64xf32>
    %c56_133 = arith.constant 56 : index
    %c0_134 = arith.constant 0 : index
    %421 = vector.load %arg11[%c56_133, %c0_134] : memref<64x256xf32, #tpu.memory_space<vmem>>, vector<8x256xf32>
    %cst_135 = arith.constant dense<0.000000e+00> : vector<8x256xf32>
    %422 = tpu.matmul %420, %285, %cst_135 {dimension_numbers = #tpu.dot_dimension_numbers<[1], [0], [0], [1], [0, 0, 1, 1], [], []>} : vector<8x64xf32>, vector<64x256xf32>, vector<8x256xf32> -> vector<8x256xf32>
    %423 = arith.addf %421, %422 : vector<8x256xf32>
    %424 = vector.extract_strided_slice %423 {offsets = [0, 0], sizes = [8, 192], strides = [1, 1]} : vector<8x256xf32> to vector<8x192xf32>
    %425 = arith.negf %424 : vector<8x192xf32>
    %426 = math.exp %425 : vector<8x192xf32>
    %cst_136 = arith.constant 1.000000e+00 : f32
    %427 = vector.broadcast %cst_136 : f32 to vector<8x192xf32>
    %428 = arith.addf %427, %426 : vector<8x192xf32>
    %429 = arith.divf %427, %428 : vector<8x192xf32>
    %430 = vector.extract_strided_slice %423 {offsets = [0, 192], sizes = [8, 64], strides = [1, 1]} : vector<8x256xf32> to vector<8x64xf32>
    %431 = math.tanh %430 : vector<8x64xf32>
    %432 = vector.extract_strided_slice %429 {offsets = [0, 0], sizes = [8, 64], strides = [1, 1]} : vector<8x192xf32> to vector<8x64xf32>
    %433 = vector.extract_strided_slice %429 {offsets = [0, 64], sizes = [8, 64], strides = [1, 1]} : vector<8x192xf32> to vector<8x64xf32>
    %434 = vector.extract_strided_slice %429 {offsets = [0, 128], sizes = [8, 64], strides = [1, 1]} : vector<8x192xf32> to vector<8x64xf32>
    %435 = arith.mulf %433, %418 : vector<8x64xf32>
    %436 = arith.mulf %432, %431 : vector<8x64xf32>
    %437 = arith.addf %435, %436 : vector<8x64xf32>
    %438 = math.tanh %437 : vector<8x64xf32>
    %439 = arith.mulf %434, %438 : vector<8x64xf32>
    %440 = arith.select %21, %439, %306 : vector<8x64xi1>, vector<8x64xf32>
    %cst_137 = arith.constant 0.000000e+00 : f32
    %441 = vector.broadcast %cst_137 : f32 to vector<8x64xf32>
    %442 = arith.maximumf %440, %441 : vector<8x64xf32>
    %c0_138 = arith.constant 0 : index
    %c0_139 = arith.constant 0 : index
    %443 = vector.load %arg8[%c0_138, %c0_139] : memref<1x64xf32, #tpu.memory_space<vmem>>, vector<1x64xf32>
    %444 = vector.broadcast %443 : vector<1x64xf32> to vector<8x64xf32>
    %445 = arith.mulf %442, %444 : vector<8x64xf32>
    %cst_140 = arith.constant dense<0.000000e+00> : vector<8xf32>
    %446 = vector.multi_reduction <add>, %445, %cst_140 [1] : vector<8x64xf32> to vector<8xf32>
    %447 = vector.shape_cast %446 : vector<8xf32> to vector<8x1xf32>
    %c0_141 = arith.constant 0 : index
    %c0_142 = arith.constant 0 : index
    %448 = vector.load %arg9[%c0_141, %c0_142] : memref<1x1xf32, #tpu.memory_space<vmem>>, vector<1x1xf32>
    %449 = vector.broadcast %448 : vector<1x1xf32> to vector<8x1xf32>
    %450 = arith.addf %447, %449 : vector<8x1xf32>
    %451 = arith.negf %450 : vector<8x1xf32>
    %452 = math.exp %451 : vector<8x1xf32>
    %cst_143 = arith.constant 1.000000e+00 : f32
    %453 = vector.broadcast %cst_143 : f32 to vector<8x1xf32>
    %454 = arith.addf %453, %452 : vector<8x1xf32>
    %455 = arith.divf %453, %454 : vector<8x1xf32>
    %c0_144 = arith.constant 0 : index
    %c0_145 = arith.constant 0 : index
    %456 = vector.load %arg10[%c0_144, %c0_145] : memref<8x1xf32, #tpu.memory_space<vmem>>, vector<8x1xf32>
    tpu.vector_store %arg10[%c0_144, %c0_145], %455 {strides = array<i32>} : memref<8x1xf32, #tpu.memory_space<vmem>>, vector<8x1xf32>,
    return
  }
  func.func @transform_0(%arg0: i32) -> (i32, i32) {
    %c0_i32 = arith.constant 0 : i32
    %c0_i32_0 = arith.constant 0 : i32
    return %arg0, %c0_i32 : i32, i32
  }
  func.func @transform_1(%arg0: i32) -> (i32, i32) {
    %c0_i32 = arith.constant 0 : i32
    %c0_i32_0 = arith.constant 0 : i32
    %c0_i32_1 = arith.constant 0 : i32
    return %c0_i32, %c0_i32_0 : i32, i32
  }
  func.func @transform_2(%arg0: i32) -> (i32, i32) {
    %c0_i32 = arith.constant 0 : i32
    %c0_i32_0 = arith.constant 0 : i32
    %c0_i32_1 = arith.constant 0 : i32
    return %c0_i32, %c0_i32_0 : i32, i32
  }
  func.func @transform_3(%arg0: i32) -> (i32, i32) {
    %c0_i32 = arith.constant 0 : i32
    %c0_i32_0 = arith.constant 0 : i32
    %c0_i32_1 = arith.constant 0 : i32
    return %c0_i32, %c0_i32_0 : i32, i32
  }
  func.func @transform_4(%arg0: i32) -> (i32, i32) {
    %c0_i32 = arith.constant 0 : i32
    %c0_i32_0 = arith.constant 0 : i32
    %c0_i32_1 = arith.constant 0 : i32
    return %c0_i32, %c0_i32_0 : i32, i32
  }
  func.func @transform_5(%arg0: i32) -> (i32, i32) {
    %c0_i32 = arith.constant 0 : i32
    %c0_i32_0 = arith.constant 0 : i32
    %c0_i32_1 = arith.constant 0 : i32
    return %c0_i32, %c0_i32_0 : i32, i32
  }
  func.func @transform_6(%arg0: i32) -> (i32, i32) {
    %c0_i32 = arith.constant 0 : i32
    %c0_i32_0 = arith.constant 0 : i32
    %c0_i32_1 = arith.constant 0 : i32
    return %c0_i32, %c0_i32_0 : i32, i32
  }
  func.func @transform_7(%arg0: i32) -> (i32, i32) {
    %c0_i32 = arith.constant 0 : i32
    %c0_i32_0 = arith.constant 0 : i32
    %c0_i32_1 = arith.constant 0 : i32
    return %c0_i32, %c0_i32_0 : i32, i32
  }
  func.func @transform_8(%arg0: i32) -> (i32, i32) {
    %c0_i32 = arith.constant 0 : i32
    %c0_i32_0 = arith.constant 0 : i32
    %c0_i32_1 = arith.constant 0 : i32
    return %c0_i32, %c0_i32_0 : i32, i32
  }
  func.func @transform_9(%arg0: i32) -> (i32, i32) {
    %c0_i32 = arith.constant 0 : i32
    %c0_i32_0 = arith.constant 0 : i32
    return %arg0, %c0_i32 : i32, i32
  }
}

</mosaic_0001>

<bundles_post_ra>
// kernel: single_input_lstm_classifier.1
= control target key start
LH: loop header
LB: loop body
LE: loop exit
PB: predicated region body
PF: predicated region fallthrough
CT: control target
= control target key end

     0   :  { %s3530_s0 = inlined_call_operand.vmem [shape: f32[64,16], index: 0, kind: input, shape index: {}]   ;;  %s3531_s1 = inlined_call_operand.vmem [shape: f32[16,256], index: 1, kind: input, shape index: {}]   ;;  %s3532_s2 = inlined_call_operand.hbm [shape: f32[64,256], index: 2, kind: input, shape index: {}]   ;;  %s3533_s3 = inlined_call_operand.vmem [shape: f32[1,256], index: 3, kind: input, shape index: {}]   ;;  %s3534_s4 = inlined_call_operand.hbm [shape: f32[64,256], index: 4, kind: input, shape index: {}]   ;;  %s3535_s5 = inlined_call_operand.hbm [shape: f32[64,256], index: 5, kind: input, shape index: {}]   ;;  %s3536_s6 = inlined_call_operand.vmem [shape: f32[1,256], index: 6, kind: input, shape index: {}]   ;;  %s3537_s7 = inlined_call_operand.vmem [shape: f32[1,64], index: 7, kind: input, shape index: {}]   ;;  %s3538_s8 = inlined_call_operand.<no memory space> [shape: f32[1,1], index: 8, kind: input, shape index: {}]   ;;  %s3539_s9 = inlined_call_operand.vmem [shape: f32[8,1], index: 9, kind: output, shape index: {}]  }
   0x1   :  { %v14_v0 = vstv %s3538_s8 }
   0x2   :  { %15 = vst [vmem:[#allocation4] sm:$0x1] %v14_v0 }
   0x3   :  { %16 = vsyncpa [#allocation6], 0 }
   0x4   :  { %17 = vsyncpa [#allocation8], 0  ;;  %s41_s13 = sshll.u32 %s3534_s4, 4  ;;  %s2554_s14 = smov [#allocation7]   ;;  %s42_s13 = int_to_ptr.hbm [resolvable:$true] %s41_s13 }
   0x5   :  { %s43_s15 = sshll.u32 %s2554_s14, 4  ;;  %s26_s18 = sshll.u32 %s3532_s2, 4  ;;  %s44_s15 = int_to_ptr.vmem [resolvable:$true] %s43_s15  ;;  %s27_s18 = int_to_ptr.hbm [resolvable:$true] %s26_s18 }
   0x6   :  { %s2555_s19 = smov 256   ;;  %s2556_s20 = smov 16  }
   0x7   :  { %49 = dma.hbm_to_vmem [thread:$0]  %s42_s13, 2048, %s44_s15, [#allocation8], %s2555_s19, %s2555_s19, %s2556_s20  }
   0x8   :  { %s2557_s8 = smov [#allocation5]   ;;  %s54_s24 = sshll.u32 %s3535_s5, 4  ;;  %s55_s24 = int_to_ptr.hbm [resolvable:$true] %s54_s24 }
   0x9   :  { %s28_s21 = sshll.u32 %s2557_s8, 4  ;;  %s2558_s4 = smov [#allocation9]   ;;  %s29_s21 = int_to_ptr.vmem [resolvable:$true] %s28_s21 }
   0xa   :  { %34 = dma.hbm_to_vmem [thread:$0]  %s27_s18, 2048, %s29_s21, [#allocation6], %s2555_s19, %s2555_s19, %s2556_s20  }
   0xb   :  { %s56_s25 = sshll.u32 %s2558_s4, 4  ;;  %s57_s25 = int_to_ptr.vmem [resolvable:$true] %s56_s25 }
   0xc   :  { %62 = dma.hbm_to_vmem [thread:$0]  %s55_s24, 2048, %s57_s25, [#allocation8], %s2555_s19, %s2555_s19, %s2556_s20  }
   0xd   :  { %2550 = dma.done.wait [#allocation6], 2048  }
   0xe   :  { %2551 = vsyncadd [#allocation6], 4294965248 }
   0xf   :  { %2552 = dma.done.wait [#allocation8], 4096  }
  0x10   :  { %2553 = vsyncadd [#allocation8], 4294963200  ;;  %v122_v1 = vld [vmem:[%s3531_s1 + $0x18] sm:$0xff]  ;;  %v120_v2 = vld [vmem:[%s3531_s1 + $0x8] sm:$0xff]  ;;  %vm129_vm0 = vcmask 130048   ;;  %v3540_v17 = vmov 0.0   ;;  %v81_v40 = vlaneseq }
  0x11   :  { %209 = vmatpush.msra.mxu1 %v122_v1  ;;  %v111_v3 = vld [vmem:[%s3530_s0] sm:$0xff]  ;;  %v121_v4 = vld [vmem:[%s3531_s1 + $0x10] sm:$0xff]  ;;  %v112_v7 = vld [vmem:[%s3530_s0 + $0x8] sm:$0xff]  ;;  %vm286_vm11 = vcmask 523264  }
  0x12   :  { %168 = vmatpush.msra.mxu0 %v121_v4  ;;  %v119_v5 = vld [vmem:[%s3531_s1] sm:$0xff]  ;;  %v2647_v8 = vld [vmem:[#allocation5 + $0x68] sm:$0xff]  ;;  %v114_v16 = vld [vmem:[%s3530_s0 + $0x18] sm:$0xff]  ;;  %v2800_v44 = vand.u32 127, %v81_v40 }
  0x13   :  { %210 = vmatpush.msra.mxu1 %v120_v2  ;;  %v2639_v6 = vld [vmem:[#allocation5 + $0x78] sm:$0xff]  ;;  %v2654_v10 = vld [vmem:[#allocation5 + $0x48] sm:$0xff]  ;;  %v2689_v18 = vld [vmem:[#allocation5 + $0x70] sm:$0xff] }
  0x14   :  { %2188 = vmatmul.msk.f32.vlgmr.msra.gmra.mxu1 %vm129_vm0, %v111_v3  ;;  %169 = vmatpush.msra.mxu0 %v119_v5  ;;  %v2651_v9 = vld [vmem:[#allocation5 + $0x58] sm:$0xff]  ;;  %v113_v12 = vld [vmem:[%s3530_s0 + $0x10] sm:$0xff]  ;;  %v2691_v19 = vld [vmem:[#allocation5 + $0x60] sm:$0xff]  ;;  %v83_v46 = vadd.s32 128, %v2800_v44 }
  0x15   :  { %2180 = vmatmul.msk.f32.vlgmr.msra.gmra.mxu0 %vm129_vm0, %v111_v3  ;;  %318 = vmatpush.msra.mxu3 %v2639_v6  ;;  %v2658_v11 = vld [vmem:[#allocation5 + $0x38] sm:$0xff]  ;;  %v2667_v13 = vld [vmem:[#allocation5 + $0x28] sm:$0xff]  ;;  %v2696_v20 = vld [vmem:[#allocation5 + $0x50] sm:$0xff] }
  0x16   :  { %730 = vmatpush.msrb.mxu1 %v2639_v6  ;;  %v2672_v14 = vld [vmem:[#allocation5 + $0x18] sm:$0xff]  ;;  %v2675_v15 = vld [vmem:[#allocation5 + $0x8] sm:$0xff]  ;;  %298 = vmatpush.msra.mxu2 %v2689_v18  ;;  %v2702_v21 = vld [vmem:[#allocation5 + $0x40] sm:$0xff]  ;;  %v95_v50 = vand.u32 63, %v83_v46 }
  0x17   :  { %319 = vmatpush.msra.mxu3 %v2647_v8  ;;  %710 = vmatpush.msrb.mxu0 %v2689_v18  ;;  %v115_v22 = vld [vmem:[%s3530_s0 + $0x20] sm:$0xff]  ;;  %v2711_v23 = vld [vmem:[#allocation5 + $0x30] sm:$0xff]  ;;  %v116_v27 = vld [vmem:[%s3530_s0 + $0x28] sm:$0xff] }
  0x18   :  { %731 = vmatpush.msrb.mxu1 %v2647_v8  ;;  %299 = vmatpush.msra.mxu2 %v2691_v19  ;;  %v2718_v24 = vld [vmem:[#allocation5 + $0x20] sm:$0xff]  ;;  %v2723_v25 = vld [vmem:[#allocation5 + $0x10] sm:$0xff]  ;;  %vm2807_vm1 = vcmp.lt.s32.totalorder %v95_v50, 32 }
  0x19   :  { %320 = vmatpush.msra.mxu3 %v2651_v9  ;;  %711 = vmatpush.msrb.mxu0 %v2691_v19  ;;  %v2729_v26 = vld [vmem:[#allocation5] sm:$0xff]  ;;  %v117_v28 = vld [vmem:[%s3530_s0 + $0x30] sm:$0xff]  ;;  %v118_v29 = vld [vmem:[%s3530_s0 + $0x38] sm:$0xff] }
  0x1a   :  { %732 = vmatpush.msrb.mxu1 %v2651_v9  ;;  %300 = vmatpush.msra.mxu2 %v2696_v20  ;;  %v123_v32 = vld [vmem:[%s3533_s3] sm:$0x3]  ;;  %s2560_s3 = smov 64  }
  0x1b   :  { %321 = vmatpush.msra.mxu3 %v2654_v10  ;;  %712 = vmatpush.msrb.mxu0 %v2696_v20  ;;  %v126_v33 = vperm.slane %v123_v32, 1  ;;  %v125_v35 = vperm.slane %v123_v32, 0  ;;  %v88_v32 = vand.u32 63, %v2800_v44 }
  0x1c   :  { %2189 = vmatmul.msk.f32.gmra.mxu1 %vm129_vm0, %v112_v7  ;;  %301 = vmatpush.msra.mxu2 %v2702_v21 }
  0x1d   :  { %2181 = vmatmul.msk.f32.gmra.mxu0 %vm129_vm0, %v112_v7  ;;  %733 = vmatpush.msrb.mxu1 %v2654_v10  ;;  %vm2864_vm2 = vcmp.lt.s32.totalorder %v88_v32, 32 }
  0x1e   :  { %322 = vmatpush.msra.mxu3 %v2658_v11  ;;  %302 = vmatpush.msra.mxu2 %v2711_v23 }
  0x1f   :  { %734 = vmatpush.msrb.mxu1 %v2658_v11  ;;  %713 = vmatpush.msrb.mxu0 %v2702_v21 }
  0x20   :  { %323 = vmatpush.msra.mxu3 %v2667_v13  ;;  %303 = vmatpush.msra.mxu2 %v2718_v24 }
  0x21   :  { %735 = vmatpush.msrb.mxu1 %v2667_v13  ;;  %714 = vmatpush.msrb.mxu0 %v2711_v23 }
  0x22   :  { %324 = vmatpush.msra.mxu3 %v2672_v14  ;;  %304 = vmatpush.msra.mxu2 %v2723_v25 }
  0x23   :  { %736 = vmatpush.msrb.mxu1 %v2672_v14  ;;  %715 = vmatpush.msrb.mxu0 %v2718_v24 }
  0x24   :  { %2190 = vmatmul.msk.f32.gmra.mxu1 %vm129_vm0, %v113_v12  ;;  %325 = vmatpush.msra.mxu3 %v2675_v15 }
  0x25   :  { %2182 = vmatmul.msk.f32.gmra.mxu0 %vm129_vm0, %v113_v12  ;;  %326 = vmatmul.f32.vlgmr.msra.gmra.mxu3 %v3540_v17 }
  0x26   :  { %737 = vmatpush.msrb.mxu1 %v2675_v15  ;;  %421 = vmatpush.msrb.mxu3 %v2639_v6 }
  0x27   :  { %305 = vmatpush.msra.mxu2 %v2729_v26  ;;  %716 = vmatpush.msrb.mxu0 %v2723_v25 }
  0x28   :  { %936 = vmatpush.msra.mxu1 %v2639_v6  ;;  %422 = vmatpush.msrb.mxu3 %v2647_v8 }
  0x29   :  { %306 = vmatmul.f32.vlgmr.msra.gmra.mxu2 %v3540_v17  ;;  %717 = vmatpush.msrb.mxu0 %v2729_v26 }
  0x2a   :  { %423 = vmatpush.msrb.mxu3 %v2651_v9  ;;  %937 = vmatpush.msra.mxu1 %v2647_v8 }
  0x2b   :  { %401 = vmatpush.msrb.mxu2 %v2689_v18  ;;  %916 = vmatpush.msra.mxu0 %v2689_v18 }
  0x2c   :  { %2191 = vmatmul.msk.f32.gmra.mxu1 %vm129_vm0, %v114_v16  ;;  %424 = vmatpush.msrb.mxu3 %v2654_v10 }
  0x2d   :  { %2183 = vmatmul.msk.f32.gmra.mxu0 %vm129_vm0, %v114_v16  ;;  %938 = vmatpush.msra.mxu1 %v2651_v9 }
  0x2e   :  { %425 = vmatpush.msrb.mxu3 %v2658_v11  ;;  %402 = vmatpush.msrb.mxu2 %v2691_v19 }
  0x2f   :  { %939 = vmatpush.msra.mxu1 %v2654_v10  ;;  %917 = vmatpush.msra.mxu0 %v2691_v19 }
  0x30   :  { %426 = vmatpush.msrb.mxu3 %v2667_v13  ;;  %403 = vmatpush.msrb.mxu2 %v2696_v20 }
  0x31   :  { %940 = vmatpush.msra.mxu1 %v2658_v11  ;;  %918 = vmatpush.msra.mxu0 %v2696_v20 }
  0x32   :  { %427 = vmatpush.msrb.mxu3 %v2672_v14  ;;  %404 = vmatpush.msrb.mxu2 %v2702_v21 }
  0x33   :  { %941 = vmatpush.msra.mxu1 %v2667_v13  ;;  %919 = vmatpush.msra.mxu0 %v2702_v21 }
  0x34   :  { %2192 = vmatmul.msk.f32.gmra.mxu1 %vm129_vm0, %v115_v22  ;;  %428 = vmatpush.msrb.mxu3 %v2675_v15 }
  0x35   :  { %2184 = vmatmul.msk.f32.gmra.mxu0 %vm129_vm0, %v115_v22  ;;  %942 = vmatpush.msra.mxu1 %v2672_v14 }
  0x36   :  { %524 = vmatpush.msra.mxu3 %v2639_v6  ;;  %405 = vmatpush.msrb.mxu2 %v2711_v23 }
  0x37   :  { %943 = vmatpush.msra.mxu1 %v2675_v15  ;;  %920 = vmatpush.msra.mxu0 %v2711_v23 }
  0x38   :  { %525 = vmatpush.msra.mxu3 %v2647_v8  ;;  %406 = vmatpush.msrb.mxu2 %v2718_v24 }
  0x39   :  { %921 = vmatpush.msra.mxu0 %v2718_v24 }
  0x3a   :  { %526 = vmatpush.msra.mxu3 %v2651_v9  ;;  %407 = vmatpush.msrb.mxu2 %v2723_v25 }
  0x3b   :  { %922 = vmatpush.msra.mxu0 %v2723_v25 }
  0x3c   :  { %2193 = vmatmul.msk.f32.gmra.mxu1 %vm129_vm0, %v116_v27  ;;  %527 = vmatpush.msra.mxu3 %v2654_v10 }
  0x3d   :  { %2185 = vmatmul.msk.f32.gmra.mxu0 %vm129_vm0, %v116_v27  ;;  %408 = vmatpush.msrb.mxu2 %v2729_v26 }
  0x3e   :  { %528 = vmatpush.msra.mxu3 %v2658_v11  ;;  %923 = vmatpush.msra.mxu0 %v2729_v26 }
  0x3f   :  { %504 = vmatpush.msra.mxu2 %v2689_v18 }
  0x40   :  { %529 = vmatpush.msra.mxu3 %v2667_v13 }
  0x41   :  { %505 = vmatpush.msra.mxu2 %v2691_v19 }
  0x42   :  { %530 = vmatpush.msra.mxu3 %v2672_v14 }
  0x43   :  { %506 = vmatpush.msra.mxu2 %v2696_v20 }
  0x44   :  { %2194 = vmatmul.msk.f32.gmra.mxu1 %vm129_vm0, %v117_v28  ;;  %531 = vmatpush.msra.mxu3 %v2675_v15 }
  0x45   :  { %2186 = vmatmul.msk.f32.gmra.mxu0 %vm129_vm0, %v117_v28  ;;  %507 = vmatpush.msra.mxu2 %v2702_v21 }
  0x47   :  { %508 = vmatpush.msra.mxu2 %v2711_v23 }
  0x49   :  { %509 = vmatpush.msra.mxu2 %v2718_v24 }
  0x4b   :  { %510 = vmatpush.msra.mxu2 %v2723_v25 }
  0x4c   :  { %2195 = vmatmul.msk.f32.gmra.mxu1 %vm129_vm0, %v118_v29 }
  0x4d   :  { %2187 = vmatmul.msk.f32.gmra.mxu0 %vm129_vm0, %v118_v29  ;;  %511 = vmatpush.msra.mxu2 %v2729_v26 }
  0x91   :  { %v212_v30 = vpop.f32.mrf.mxu1 }
  0x92   :  { %v171_v31 = vpop.f32.mrf.mxu0  ;;  %v2847_v12 = vadd.f32 %v212_v30, %v126_v33 }
  0x93   :  { %v2860_v30 = vadd.f32 %v171_v31, %v125_v35 }
  0x99   :  { %v215_v34 = vpop.f32.mrf.mxu1 }
  0x9a   :  { %v2792_v36 = vadd.f32 %v215_v34, %v126_v33  ;;  %v174_v37 = vpop.f32.mrf.mxu0 }
  0x9b   :  { %v2794_v38 = vadd.f32 %v174_v37, %v125_v35 }
  0xa1   :  { %v218_v39 = vpop.f32.mrf.mxu1 }
  0xa2   :  { %v2796_v41 = vadd.f32 %v218_v39, %v126_v33  ;;  %v177_v42 = vpop.f32.mrf.mxu0 }
  0xa3   :  { %v2798_v43 = vadd.f32 %v177_v42, %v125_v35 }
  0xa8   :  { %v327_v22 = vpop.f32.mrf.mxu3 }
  0xa9   :  { %v221_v45 = vpop.f32.mrf.mxu1 }
  0xaa   :  { %v2803_v47 = vadd.f32 %v221_v45, %v126_v33  ;;  %v180_v48 = vpop.f32.mrf.mxu0 }
  0xab   :  { %v2805_v49 = vadd.f32 %v180_v48, %v125_v35 }
  0xb1   :  { %v224_v51 = vpop.f32.mrf.mxu1 }
  0xb2   :  { %v2811_v53 = vadd.f32 %v224_v51, %v126_v33  ;;  %v183_v54 = vpop.f32.mrf.mxu0  ;;  %v307_v51 = vpop.f32.mrf.mxu2 }
  0xb3   :  { %v2813_v55 = vadd.f32 %v183_v54, %v125_v35 }
  0xb4   :  { %v249_v56 = vsel %vm2807_vm1, %v2803_v47, %v2811_v53  ;;  %v253_v57 = vsel %vm2807_vm1, %v2811_v53, %v2803_v47 }
  0xb5   :  { %v248_v46 = vsel %vm2864_vm2, %v2805_v49, %v2813_v55  ;;  %v252_v48 = vsel %vm2864_vm2, %v2813_v55, %v2805_v49 }
  0xb9   :  { %v227_v58 = vpop.f32.mrf.mxu1 }
  0xba   :  { %v2823_v59 = vadd.f32 %v227_v58, %v126_v33  ;;  %v186_v60 = vpop.f32.mrf.mxu0 }
  0xbb   :  { %v2825_v61 = vadd.f32 %v186_v60, %v125_v35 }
  0xbc   :  { %v245_v62 = vsel %vm2807_vm1, %v2796_v41, %v2823_v59  ;;  %v257_v63 = vsel %vm2807_vm1, %v2823_v59, %v2796_v41 }
  0xbd   :  { %v244_v42 = vsel %vm2864_vm2, %v2798_v43, %v2825_v61  ;;  %v256_v45 = vsel %vm2864_vm2, %v2825_v61, %v2798_v43 }
  0xc1   :  { %v230_v0 = vpop.f32.mrf.mxu1 }
  0xc2   :  { %v2835_v1 = vadd.f32 %v230_v0, %v126_v33  ;;  %v189_v2 = vpop.f32.mrf.mxu0 }
  0xc3   :  { %v2837_v3 = vadd.f32 %v189_v2, %v125_v35 }
  0xc4   :  { %v241_v4 = vsel %vm2807_vm1, %v2792_v36, %v2835_v1  ;;  %v261_v5 = vsel %vm2807_vm1, %v2835_v1, %v2792_v36 }
  0xc5   :  { %v240_v31 = vsel %vm2864_vm2, %v2794_v38, %v2837_v3 }
  0xc9   :  { %v233_v7 = vpop.f32.mrf.mxu1 }
  0xca   :  { %v2849_v16 = vadd.f32 %v233_v7, %v126_v33  ;;  %v192_v34 = vpop.f32.mrf.mxu0 }
  0xcb   :  { %v2862_v33 = vadd.f32 %v192_v34, %v125_v35  ;;  %v260_v35 = vsel %vm2864_vm2, %v2837_v3, %v2794_v38 }
  0xcc   :  { %v237_v27 = vsel %vm2807_vm1, %v2847_v12, %v2849_v16 }
  0xcd   :  { %v331_v29 = vadd.f32 %v327_v22, %v237_v27  ;;  %v236_v50 = vsel %vm2864_vm2, %v2860_v30, %v2862_v33 }
  0xce   :  { %v330_v54 = vadd.f32 %v307_v51, %v236_v50 }
  0xcf   :  { %2282 = vtanh.f32 %v331_v29 }
  0xd0   :  { %v2196_v58 = vmul.f32 -1.442695, %v330_v54 }
  0xd2   :  { %2284 = vpow2.f32 %v2196_v58 }
  0xd5   :  { %v2283_v40 = vpop.eup %2282 }
  0xd6   :  { %373 = vrot.lane.b32.xlu0 %v2283_v40, %s2560_s3 }
  0xd8   :  { %v2285_v60 = vpop.eup %2284 }
  0xd9   :  { %v338_v0 = vadd.f32 1.0, %v2285_v60 }
  0xdb   :  { %2286 = vrcp.f32 %v338_v0  ;;  %vm345_vm3 = vweird.f32 %v338_v0  ;;  %v351_v32 = vand.u32 2147483648, %v338_v0  ;;  %v349_v40 = vand.u32 2147483647, %v338_v0 }
  0xdd   :  { %v352_v17 = vor.u32 1.1754944e-38, %v351_v32  ;;  %vm350_vm6 = vcmp.eq.f32.partialorder %v349_v40, 8.507059e+37 }
  0xe1   :  { %v2287_v2 = vpop.eup %2286 }
  0xe2   :  { %v341_v7 = vmul.f32 %v2287_v2, %v338_v0  ;;  %vm346_vm4 = vweird.f32 %v2287_v2 }
  0xe3   :  { %vm347_vm5 = vmor %vm345_vm3, %vm346_vm4 }
  0xe4   :  { %v342_v22 = vsub.f32 1.0, %v341_v7 }
  0xe6   :  { %v343_v27 = vmul.f32 %v2287_v2, %v342_v22  ;;  %v2197_v22 = vmul.f32 -1.442695, %v331_v29 }
  0xe8   :  { %v344_v34 = vadd.f32 %v2287_v2, %v343_v27 }
  0xea   :  { %v348_v39 = vsel %vm347_vm5, %v2287_v2, %v344_v34 }
  0xeb   :  { %v353_v50 = vsel %vm350_vm6, %v352_v17, %v348_v39 }
  0xec   :  { %v371_v54 = vmul.f32 0.0, %v353_v50 }
 0x148   :  { %v374_v28 = vpop.permute.xlu0 %373 }
 0x149   :  { %v376_v51 = vmul.f32 %v374_v28, %v353_v50 }
 0x14b   :  { %378 = vrot.lane.b32.xlu0 %v376_v51, %s2560_s3 }
 0x1bd   :  { %v379_v58 = vpop.permute.xlu0 %378 }
 0x1be   :  { %v2902_v60 = vadd.f32 %v379_v58, %v371_v54 }
 0x1c0   :  { %2288 = vtanh.f32 %v2902_v60 }
 0x1c1   :  { %2290 = vpow2.f32 %v2197_v22 }
 0x1c6   :  { %v2289_v7 = vpop.eup %2288 }
 0x1c7   :  { %384 = vrot.lane.b32.xlu1 %v2289_v7, %s2560_s3  ;;  %v2291_v0 = vpop.eup %2290 }
 0x1c8   :  { %v339_v27 = vadd.f32 1.0, %v2291_v0 }
 0x1ca   :  { %2292 = vrcp.f32 %v339_v27  ;;  %v366_v34 = vand.u32 2147483648, %v339_v27  ;;  %vm360_vm8 = vweird.f32 %v339_v27  ;;  %v364_v40 = vand.u32 2147483647, %v339_v27 }
 0x1cc   :  { %v367_v51 = vor.u32 1.1754944e-38, %v366_v34  ;;  %vm365_vm10 = vcmp.eq.f32.partialorder %v364_v40, 8.507059e+37 }
 0x1d0   :  { %v2293_v2 = vpop.eup %2292 }
 0x1d1   :  { %v356_v32 = vmul.f32 %v2293_v2, %v339_v27  ;;  %vm361_vm7 = vweird.f32 %v2293_v2 }
 0x1d2   :  { %vm362_vm9 = vmor %vm360_vm8, %vm361_vm7 }
 0x1d3   :  { %v357_v17 = vsub.f32 1.0, %v356_v32 }
 0x1d5   :  { %v358_v28 = vmul.f32 %v2293_v2, %v357_v17 }
 0x1d7   :  { %v359_v39 = vadd.f32 %v2293_v2, %v358_v28 }
 0x1d9   :  { %v363_v50 = vsel %vm362_vm9, %v2293_v2, %v359_v39 }
 0x1da   :  { %v368_v54 = vsel %vm365_vm10, %v367_v51, %v363_v50 }
 0x239   :  { %v385_v58 = vpop.permute.xlu1 %384 }
 0x23a   :  { %v2906_v29 = vmul.f32 %v385_v58, %v368_v54 }
 0x23c   :  { %2198 = vmatmul.msk.f32.vlgmr.msrb.gmra.mxu2 %vm286_vm11, %v2906_v29  ;;  %2199 = vmatmul.msk.f32.vlgmr.msrb.gmra.mxu3 %vm286_vm11, %v2906_v29 }
 0x23d   :  { %607 = vmatpush.msrb.mxu2 %v2689_v18  ;;  %627 = vmatpush.msrb.mxu3 %v2639_v6 }
 0x23f   :  { %608 = vmatpush.msrb.mxu2 %v2691_v19  ;;  %628 = vmatpush.msrb.mxu3 %v2647_v8 }
 0x241   :  { %609 = vmatpush.msrb.mxu2 %v2696_v20  ;;  %629 = vmatpush.msrb.mxu3 %v2651_v9 }
 0x243   :  { %610 = vmatpush.msrb.mxu2 %v2702_v21  ;;  %630 = vmatpush.msrb.mxu3 %v2654_v10 }
 0x245   :  { %611 = vmatpush.msrb.mxu2 %v2711_v23  ;;  %631 = vmatpush.msrb.mxu3 %v2658_v11 }
 0x247   :  { %612 = vmatpush.msrb.mxu2 %v2718_v24  ;;  %632 = vmatpush.msrb.mxu3 %v2667_v13 }
 0x249   :  { %613 = vmatpush.msrb.mxu2 %v2723_v25  ;;  %633 = vmatpush.msrb.mxu3 %v2672_v14 }
 0x24b   :  { %614 = vmatpush.msrb.mxu2 %v2729_v26  ;;  %634 = vmatpush.msrb.mxu3 %v2675_v15 }
 0x2bf   :  { %v430_v7 = vpop.f32.mrf.mxu3  ;;  %v410_v27 = vpop.f32.mrf.mxu2 }
 0x2c0   :  { %v434_v22 = vadd.f32 %v430_v7, %v241_v4  ;;  %v433_v2 = vadd.f32 %v410_v27, %v240_v31 }
 0x2c2   :  { %2294 = vtanh.f32 %v434_v22  ;;  %v2200_v32 = vmul.f32 -1.442695, %v433_v2 }
 0x2c4   :  { %2296 = vpow2.f32 %v2200_v32 }
 0x2c8   :  { %v2295_v0 = vpop.eup %2294 }
 0x2c9   :  { %476 = vrot.lane.b32.xlu1 %v2295_v0, %s2560_s3 }
 0x2ca   :  { %v2297_v17 = vpop.eup %2296 }
 0x2cb   :  { %v441_v28 = vadd.f32 1.0, %v2297_v17 }
 0x2cd   :  { %2298 = vrcp.f32 %v441_v28  ;;  %v454_v51 = vand.u32 2147483648, %v441_v28  ;;  %vm448_vm13 = vweird.f32 %v441_v28  ;;  %v452_v54 = vand.u32 2147483647, %v441_v28 }
 0x2cf   :  { %v455_v7 = vor.u32 1.1754944e-38, %v454_v51  ;;  %vm453_vm15 = vcmp.eq.f32.partialorder %v452_v54, 8.507059e+37 }
 0x2d3   :  { %v2299_v39 = vpop.eup %2298 }
 0x2d4   :  { %v444_v34 = vmul.f32 %v2299_v39, %v441_v28  ;;  %vm449_vm12 = vweird.f32 %v2299_v39  ;;  %v2201_v28 = vmul.f32 -1.442695, %v434_v22 }
 0x2d5   :  { %vm450_vm14 = vmor %vm448_vm13, %vm449_vm12 }
 0x2d6   :  { %v445_v40 = vsub.f32 1.0, %v444_v34 }
 0x2d8   :  { %v446_v4 = vmul.f32 %v2299_v39, %v445_v40 }
 0x2da   :  { %v447_v50 = vadd.f32 %v2299_v39, %v446_v4 }
 0x2dc   :  { %v451_v58 = vsel %vm450_vm14, %v2299_v39, %v447_v50 }
 0x2dd   :  { %v456_v31 = vsel %vm453_vm15, %v455_v7, %v451_v58 }
 0x2de   :  { %v474_v2 = vmul.f32 %v456_v31, %v2902_v60 }
 0x33b   :  { %v477_v0 = vpop.permute.xlu1 %476 }
 0x33c   :  { %v479_v27 = vmul.f32 %v477_v0, %v456_v31 }
 0x33e   :  { %481 = vrot.lane.b32.xlu2 %v479_v27, %s2560_s3 }
 0x398   :  { %v482_v32 = vpop.permute.xlu2 %481 }
 0x399   :  { %v2941_v17 = vadd.f32 %v482_v32, %v474_v2 }
 0x39b   :  { %2300 = vtanh.f32 %v2941_v17 }
 0x39c   :  { %2302 = vpow2.f32 %v2201_v28 }
 0x3a1   :  { %v2301_v34 = vpop.eup %2300 }
 0x3a2   :  { %487 = vrot.lane.b32.xlu2 %v2301_v34, %s2560_s3  ;;  %v2303_v39 = vpop.eup %2302 }
 0x3a3   :  { %v442_v40 = vadd.f32 1.0, %v2303_v39 }
 0x3a5   :  { %2304 = vrcp.f32 %v442_v40  ;;  %v469_v60 = vand.u32 2147483648, %v442_v40  ;;  %vm463_vm3 = vweird.f32 %v442_v40  ;;  %v467_v7 = vand.u32 2147483647, %v442_v40 }
 0x3a7   :  { %v470_v31 = vor.u32 1.1754944e-38, %v469_v60  ;;  %vm468_vm5 = vcmp.eq.f32.partialorder %v467_v7, 8.507059e+37 }
 0x3ab   :  { %v2305_v4 = vpop.eup %2304 }
 0x3ac   :  { %v459_v50 = vmul.f32 %v2305_v4, %v442_v40  ;;  %vm464_vm0 = vweird.f32 %v2305_v4 }
 0x3ad   :  { %vm465_vm4 = vmor %vm463_vm3, %vm464_vm0 }
 0x3ae   :  { %v460_v51 = vsub.f32 1.0, %v459_v50 }
 0x3b0   :  { %v461_v54 = vmul.f32 %v2305_v4, %v460_v51 }
 0x3b2   :  { %v462_v58 = vadd.f32 %v2305_v4, %v461_v54 }
 0x3b4   :  { %v466_v0 = vsel %vm465_vm4, %v2305_v4, %v462_v58 }
 0x3b5   :  { %v471_v27 = vsel %vm468_vm5, %v470_v31, %v466_v0 }
 0x3fc   :  { %v488_v2 = vpop.permute.xlu2 %487 }
 0x3fd   :  { %v2945_v22 = vmul.f32 %v488_v2, %v471_v27 }
 0x3ff   :  { %2202 = vmatmul.msk.f32.vlgmr.msra.gmra.mxu2 %vm286_vm11, %v2945_v22  ;;  %2203 = vmatmul.msk.f32.vlgmr.msra.gmra.mxu3 %vm286_vm11, %v2945_v22 }
 0x400   :  { %813 = vmatpush.msra.mxu2 %v2689_v18  ;;  %833 = vmatpush.msra.mxu3 %v2639_v6 }
 0x402   :  { %814 = vmatpush.msra.mxu2 %v2691_v19  ;;  %834 = vmatpush.msra.mxu3 %v2647_v8 }
 0x404   :  { %815 = vmatpush.msra.mxu2 %v2696_v20  ;;  %835 = vmatpush.msra.mxu3 %v2651_v9 }
 0x406   :  { %816 = vmatpush.msra.mxu2 %v2702_v21  ;;  %836 = vmatpush.msra.mxu3 %v2654_v10 }
 0x408   :  { %817 = vmatpush.msra.mxu2 %v2711_v23  ;;  %837 = vmatpush.msra.mxu3 %v2658_v11 }
 0x40a   :  { %818 = vmatpush.msra.mxu2 %v2718_v24  ;;  %838 = vmatpush.msra.mxu3 %v2667_v13 }
 0x40c   :  { %819 = vmatpush.msra.mxu2 %v2723_v25  ;;  %839 = vmatpush.msra.mxu3 %v2672_v14 }
 0x40e   :  { %820 = vmatpush.msra.mxu2 %v2729_v26  ;;  %840 = vmatpush.msra.mxu3 %v2675_v15 }
 0x482   :  { %v533_v32 = vpop.f32.mrf.mxu3  ;;  %v513_v39 = vpop.f32.mrf.mxu2 }
 0x483   :  { %v537_v34 = vadd.f32 %v533_v32, %v245_v62  ;;  %v536_v40 = vadd.f32 %v513_v39, %v244_v42 }
 0x485   :  { %2306 = vtanh.f32 %v537_v34  ;;  %v2204_v4 = vmul.f32 -1.442695, %v536_v40 }
 0x487   :  { %2308 = vpow2.f32 %v2204_v4 }
 0x48b   :  { %v2307_v28 = vpop.eup %2306 }
 0x48c   :  { %579 = vrot.lane.b32.xlu0 %v2307_v28, %s2560_s3 }
 0x48d   :  { %v2309_v50 = vpop.eup %2308 }
 0x48e   :  { %v544_v51 = vadd.f32 1.0, %v2309_v50 }
 0x490   :  { %2310 = vrcp.f32 %v544_v51  ;;  %v557_v0 = vand.u32 2147483648, %v544_v51  ;;  %vm551_vm7 = vweird.f32 %v544_v51  ;;  %v555_v31 = vand.u32 2147483647, %v544_v51 }
 0x492   :  { %v558_v2 = vor.u32 1.1754944e-38, %v557_v0  ;;  %vm556_vm9 = vcmp.eq.f32.partialorder %v555_v31, 8.507059e+37 }
 0x496   :  { %v2311_v54 = vpop.eup %2310 }
 0x497   :  { %v547_v58 = vmul.f32 %v2311_v54, %v544_v51  ;;  %vm552_vm6 = vweird.f32 %v2311_v54  ;;  %v2205_v51 = vmul.f32 -1.442695, %v537_v34 }
 0x498   :  { %vm553_vm8 = vmor %vm551_vm7, %vm552_vm6 }
 0x499   :  { %v548_v60 = vsub.f32 1.0, %v547_v58 }
 0x49b   :  { %v549_v62 = vmul.f32 %v2311_v54, %v548_v60 }
 0x49d   :  { %v550_v7 = vadd.f32 %v2311_v54, %v549_v62 }
 0x49f   :  { %v554_v27 = vsel %vm553_vm8, %v2311_v54, %v550_v7 }
 0x4a0   :  { %v559_v42 = vsel %vm556_vm9, %v558_v2, %v554_v27 }
 0x4a1   :  { %v577_v39 = vmul.f32 %v559_v42, %v2941_v17 }
 0x4fe   :  { %v580_v32 = vpop.permute.xlu0 %579 }
 0x4ff   :  { %v582_v28 = vmul.f32 %v580_v32, %v559_v42 }
 0x501   :  { %584 = vrot.lane.b32.xlu1 %v582_v28, %s2560_s3 }
 0x573   :  { %v585_v40 = vpop.permute.xlu1 %584 }
 0x574   :  { %v2980_v4 = vadd.f32 %v585_v40, %v577_v39 }
 0x576   :  { %2312 = vtanh.f32 %v2980_v4 }
 0x577   :  { %2314 = vpow2.f32 %v2205_v51 }
 0x57c   :  { %v2313_v50 = vpop.eup %2312 }
 0x57d   :  { %590 = vrot.lane.b32.xlu2 %v2313_v50, %s2560_s3  ;;  %v2315_v54 = vpop.eup %2314 }
 0x57e   :  { %v545_v58 = vadd.f32 1.0, %v2315_v54 }
 0x580   :  { %2316 = vrcp.f32 %v545_v58  ;;  %v572_v17 = vand.u32 2147483648, %v545_v58  ;;  %vm566_vm12 = vweird.f32 %v545_v58  ;;  %v570_v27 = vand.u32 2147483647, %v545_v58 }
 0x582   :  { %v573_v32 = vor.u32 1.1754944e-38, %v572_v17  ;;  %vm571_vm14 = vcmp.eq.f32.partialorder %v570_v27, 8.507059e+37 }
 0x586   :  { %v2317_v60 = vpop.eup %2316 }
 0x587   :  { %v562_v62 = vmul.f32 %v2317_v60, %v545_v58  ;;  %vm567_vm10 = vweird.f32 %v2317_v60 }
 0x588   :  { %vm568_vm13 = vmor %vm566_vm12, %vm567_vm10 }
 0x589   :  { %v563_v7 = vsub.f32 1.0, %v562_v62 }
 0x58b   :  { %v564_v0 = vmul.f32 %v2317_v60, %v563_v7 }
 0x58d   :  { %v565_v31 = vadd.f32 %v2317_v60, %v564_v0 }
 0x58f   :  { %v569_v2 = vsel %vm568_vm13, %v2317_v60, %v565_v31 }
 0x590   :  { %v574_v42 = vsel %vm571_vm14, %v573_v32, %v569_v2 }
 0x5d7   :  { %v591_v28 = vpop.permute.xlu2 %590 }
 0x5d8   :  { %v2984_v34 = vmul.f32 %v591_v28, %v574_v42 }
 0x5da   :  { %2206 = vmatmul.msk.f32.vlgmr.msrb.gmra.mxu2 %vm286_vm11, %v2984_v34  ;;  %2207 = vmatmul.msk.f32.vlgmr.msrb.gmra.mxu3 %vm286_vm11, %v2984_v34 }
 0x5db   :  { %1019 = vmatpush.msrb.mxu2 %v2689_v18  ;;  %1039 = vmatpush.msrb.mxu3 %v2639_v6 }
 0x5dd   :  { %1020 = vmatpush.msrb.mxu2 %v2691_v19  ;;  %1040 = vmatpush.msrb.mxu3 %v2647_v8 }
 0x5df   :  { %1021 = vmatpush.msrb.mxu2 %v2696_v20  ;;  %1041 = vmatpush.msrb.mxu3 %v2651_v9 }
 0x5e1   :  { %1022 = vmatpush.msrb.mxu2 %v2702_v21  ;;  %1042 = vmatpush.msrb.mxu3 %v2654_v10 }
 0x5e3   :  { %1023 = vmatpush.msrb.mxu2 %v2711_v23  ;;  %1043 = vmatpush.msrb.mxu3 %v2658_v11 }
 0x5e5   :  { %1024 = vmatpush.msrb.mxu2 %v2718_v24  ;;  %1044 = vmatpush.msrb.mxu3 %v2667_v13 }
 0x5e7   :  { %1025 = vmatpush.msrb.mxu2 %v2723_v25  ;;  %1045 = vmatpush.msrb.mxu3 %v2672_v14 }
 0x5e9   :  { %1026 = vmatpush.msrb.mxu2 %v2729_v26  ;;  %1046 = vmatpush.msrb.mxu3 %v2675_v15 }
 0x65d   :  { %v636_v6 = vpop.f32.mrf.mxu3  ;;  %v616_v10 = vpop.f32.mrf.mxu2 }
 0x65e   :  { %v640_v8 = vadd.f32 %v636_v6, %v249_v56  ;;  %v639_v11 = vadd.f32 %v616_v10, %v248_v46 }
 0x660   :  { %2318 = vtanh.f32 %v640_v8  ;;  %v2208_v13 = vmul.f32 -1.442695, %v639_v11  ;;  %v2209_v60 = vmul.f32 -1.442695, %v640_v8 }
 0x662   :  { %2320 = vpow2.f32 %v2208_v13 }
 0x666   :  { %v2319_v9 = vpop.eup %2318 }
 0x667   :  { %682 = vrot.lane.b32.xlu0 %v2319_v9, %s2560_s3 }
 0x668   :  { %v2321_v14 = vpop.eup %2320 }
 0x669   :  { %v647_v15 = vadd.f32 1.0, %v2321_v14 }
 0x66b   :  { %2322 = vrcp.f32 %v647_v15  ;;  %v660_v24 = vand.u32 2147483648, %v647_v15  ;;  %vm654_vm0 = vweird.f32 %v647_v15  ;;  %v658_v25 = vand.u32 2147483647, %v647_v15 }
 0x66d   :  { %v661_v56 = vor.u32 1.1754944e-38, %v660_v24  ;;  %vm659_vm4 = vcmp.eq.f32.partialorder %v658_v25, 8.507059e+37 }
 0x671   :  { %v2323_v18 = vpop.eup %2322 }
 0x672   :  { %v650_v19 = vmul.f32 %v2323_v18, %v647_v15  ;;  %vm655_vm15 = vweird.f32 %v2323_v18 }
 0x673   :  { %vm656_vm3 = vmor %vm654_vm0, %vm655_vm15 }
 0x674   :  { %v651_v20 = vsub.f32 1.0, %v650_v19 }
 0x676   :  { %v652_v21 = vmul.f32 %v2323_v18, %v651_v20 }
 0x678   :  { %v653_v23 = vadd.f32 %v2323_v18, %v652_v21 }
 0x67a   :  { %v657_v26 = vsel %vm656_vm3, %v2323_v18, %v653_v23 }
 0x67b   :  { %v662_v46 = vsel %vm659_vm4, %v661_v56, %v657_v26  ;;  %vm110_vm4 = vcmp.lt.s32.totalorder %v2800_v44, 32 }
 0x67c   :  { %v680_v50 = vmul.f32 %v662_v46, %v2980_v4 }
 0x6d9   :  { %v683_v39 = vpop.permute.xlu0 %682 }
 0x6da   :  { %v685_v40 = vmul.f32 %v683_v39, %v662_v46 }
 0x6dc   :  { %687 = vrot.lane.b32.xlu1 %v685_v40, %s2560_s3 }
 0x74e   :  { %v688_v51 = vpop.permute.xlu1 %687 }
 0x74f   :  { %v690_v54 = vadd.f32 %v688_v51, %v680_v50 }
 0x751   :  { %2324 = vtanh.f32 %v690_v54 }
 0x752   :  { %2326 = vpow2.f32 %v2209_v60 }
 0x757   :  { %v2325_v58 = vpop.eup %2324 }
 0x758   :  { %693 = vrot.lane.b32.xlu2 %v2325_v58, %s2560_s3  ;;  %v2327_v62 = vpop.eup %2326 }
 0x759   :  { %v648_v7 = vadd.f32 1.0, %v2327_v62 }
 0x75b   :  { %2328 = vrcp.f32 %v648_v7  ;;  %v675_v32 = vand.u32 2147483648, %v648_v7  ;;  %vm669_vm6 = vweird.f32 %v648_v7  ;;  %v673_v4 = vand.u32 2147483647, %v648_v7 }
 0x75d   :  { %v676_v28 = vor.u32 1.1754944e-38, %v675_v32  ;;  %vm674_vm8 = vcmp.eq.f32.partialorder %v673_v4, 8.507059e+37 }
 0x761   :  { %v2329_v0 = vpop.eup %2328 }
 0x762   :  { %v665_v31 = vmul.f32 %v2329_v0, %v648_v7  ;;  %vm670_vm5 = vweird.f32 %v2329_v0 }
 0x763   :  { %vm671_vm7 = vmor %vm669_vm6, %vm670_vm5 }
 0x764   :  { %v666_v17 = vsub.f32 1.0, %v665_v31 }
 0x766   :  { %v667_v27 = vmul.f32 %v2329_v0, %v666_v17 }
 0x768   :  { %v668_v2 = vadd.f32 %v2329_v0, %v667_v27 }
 0x76a   :  { %v672_v42 = vsel %vm671_vm7, %v2329_v0, %v668_v2 }
 0x76b   :  { %v677_v6 = vsel %vm674_vm8, %v676_v28, %v672_v42 }
 0x7b2   :  { %v694_v9 = vpop.permute.xlu2 %693 }
 0x7b3   :  { %v696_v8 = vmul.f32 %v694_v9, %v677_v6 }
 0x7b5   :  { %2210 = vmatmul.msk.f32.vlgmr.msrb.gmra.mxu0 %vm286_vm11, %v696_v8  ;;  %2211 = vmatmul.msk.f32.vlgmr.msrb.gmra.mxu1 %vm286_vm11, %v696_v8 }
 0x832   :  { %v739_v10 = vpop.f32.mrf.mxu1  ;;  %v719_v14 = vpop.f32.mrf.mxu0 }
 0x833   :  { %v743_v11 = vadd.f32 %v739_v10, %v253_v57  ;;  %v742_v15 = vadd.f32 %v719_v14, %v252_v48 }
 0x835   :  { %2330 = vtanh.f32 %v743_v11  ;;  %v2212_v18 = vmul.f32 -1.442695, %v742_v15  ;;  %v2213_v51 = vmul.f32 -1.442695, %v743_v11 }
 0x837   :  { %2332 = vpow2.f32 %v2212_v18 }
 0x83b   :  { %v2331_v13 = vpop.eup %2330 }
 0x83c   :  { %785 = vrot.lane.b32.xlu0 %v2331_v13, %s2560_s3 }
 0x83d   :  { %v2333_v19 = vpop.eup %2332 }
 0x83e   :  { %v750_v20 = vadd.f32 1.0, %v2333_v19 }
 0x840   :  { %2334 = vrcp.f32 %v750_v20  ;;  %v763_v24 = vand.u32 2147483648, %v750_v20  ;;  %vm757_vm10 = vweird.f32 %v750_v20  ;;  %v761_v25 = vand.u32 2147483647, %v750_v20 }
 0x842   :  { %v764_v56 = vor.u32 1.1754944e-38, %v763_v24  ;;  %vm762_vm13 = vcmp.eq.f32.partialorder %v761_v25, 8.507059e+37 }
 0x846   :  { %v2335_v21 = vpop.eup %2334 }
 0x847   :  { %v753_v23 = vmul.f32 %v2335_v21, %v750_v20  ;;  %vm758_vm9 = vweird.f32 %v2335_v21 }
 0x848   :  { %vm759_vm12 = vmor %vm757_vm10, %vm758_vm9 }
 0x849   :  { %v754_v47 = vsub.f32 1.0, %v753_v23 }
 0x84b   :  { %v755_v53 = vmul.f32 %v2335_v21, %v754_v47 }
 0x84d   :  { %v756_v57 = vadd.f32 %v2335_v21, %v755_v53 }
 0x84f   :  { %v760_v26 = vsel %vm759_vm12, %v2335_v21, %v756_v57 }
 0x850   :  { %v765_v55 = vsel %vm762_vm13, %v764_v56, %v760_v26 }
 0x851   :  { %v783_v39 = vmul.f32 %v765_v55, %v690_v54 }
 0x8ae   :  { %v786_v49 = vpop.permute.xlu0 %785 }
 0x8af   :  { %v788_v48 = vmul.f32 %v786_v49, %v765_v55 }
 0x8b1   :  { %790 = vrot.lane.b32.xlu1 %v788_v48, %s2560_s3 }
 0x923   :  { %v791_v46 = vpop.permute.xlu1 %790 }
 0x924   :  { %v3034_v40 = vadd.f32 %v791_v46, %v783_v39 }
 0x926   :  { %2336 = vtanh.f32 %v3034_v40 }
 0x927   :  { %2338 = vpow2.f32 %v2213_v51 }
 0x92c   :  { %v2337_v50 = vpop.eup %2336 }
 0x92d   :  { %796 = vrot.lane.b32.xlu2 %v2337_v50, %s2560_s3  ;;  %v2339_v58 = vpop.eup %2338 }
 0x92e   :  { %v751_v60 = vadd.f32 1.0, %v2339_v58 }
 0x930   :  { %2340 = vrcp.f32 %v751_v60  ;;  %v778_v54 = vand.u32 2147483648, %v751_v60  ;;  %vm772_vm15 = vweird.f32 %v751_v60  ;;  %v776_v27 = vand.u32 2147483647, %v751_v60 }
 0x932   :  { %v779_v32 = vor.u32 1.1754944e-38, %v778_v54  ;;  %vm777_vm3 = vcmp.eq.f32.partialorder %v776_v27, 8.507059e+37 }
 0x936   :  { %v2341_v62 = vpop.eup %2340 }
 0x937   :  { %v768_v7 = vmul.f32 %v2341_v62, %v751_v60  ;;  %vm773_vm14 = vweird.f32 %v2341_v62 }
 0x938   :  { %vm774_vm0 = vmor %vm772_vm15, %vm773_vm14 }
 0x939   :  { %v769_v0 = vsub.f32 1.0, %v768_v7 }
 0x93b   :  { %v770_v31 = vmul.f32 %v2341_v62, %v769_v0 }
 0x93d   :  { %v771_v17 = vadd.f32 %v2341_v62, %v770_v31 }
 0x93f   :  { %v775_v2 = vsel %vm774_vm0, %v2341_v62, %v771_v17 }
 0x940   :  { %v780_v4 = vsel %vm777_vm3, %v779_v32, %v775_v2 }
 0x987   :  { %v797_v42 = vpop.permute.xlu2 %796 }
 0x988   :  { %v799_v28 = vmul.f32 %v797_v42, %v780_v4 }
 0x98a   :  { %v1118_v6 = vsel %vm110_vm4, %v696_v8, %v799_v28  ;;  %v1121_v9 = vsel %vm110_vm4, %v799_v28, %v696_v8  ;;  %2214 = vmatmul.msk.f32.vlgmr.msra.gmra.mxu2 %vm286_vm11, %v799_v28  ;;  %2215 = vmatmul.msk.f32.vlgmr.msra.gmra.mxu3 %vm286_vm11, %v799_v28 }
 0x98b   :  { %v1119_v10 = vmax.f32 %v1118_v6, 0.0  ;;  %v1122_v11 = vmax.f32 %v1121_v9, 0.0 }
 0x98d   :  { %1120 = vst.msk [vmem:[#allocation3 + $0x18] sm:$0xff] %vm286_vm11, %v1119_v10 }
 0x98e   :  { %1123 = vst.msk [vmem:[#allocation3 + $0x20] sm:$0xff] %vm286_vm11, %v1122_v11 }
 0xa0d   :  { %v842_v13 = vpop.f32.mrf.mxu3  ;;  %v822_v8 = vpop.f32.mrf.mxu2 }
 0xa0e   :  { %v846_v14 = vadd.f32 %v842_v13, %v257_v63  ;;  %v845_v18 = vadd.f32 %v822_v8, %v256_v45 }
 0xa10   :  { %2342 = vtanh.f32 %v846_v14  ;;  %v2216_v19 = vmul.f32 -1.442695, %v845_v18  ;;  %v2217_v48 = vmul.f32 -1.442695, %v846_v14 }
 0xa12   :  { %2344 = vpow2.f32 %v2216_v19 }
 0xa16   :  { %v2343_v15 = vpop.eup %2342 }
 0xa17   :  { %888 = vrot.lane.b32.xlu0 %v2343_v15, %s2560_s3 }
 0xa18   :  { %v2345_v20 = vpop.eup %2344 }
 0xa19   :  { %v853_v21 = vadd.f32 1.0, %v2345_v20 }
 0xa1b   :  { %2346 = vrcp.f32 %v853_v21  ;;  %v866_v53 = vand.u32 2147483648, %v853_v21  ;;  %vm860_vm6 = vweird.f32 %v853_v21  ;;  %v864_v57 = vand.u32 2147483647, %v853_v21 }
 0xa1d   :  { %v867_v25 = vor.u32 1.1754944e-38, %v866_v53  ;;  %vm865_vm8 = vcmp.eq.f32.partialorder %v864_v57, 8.507059e+37 }
 0xa21   :  { %v2347_v23 = vpop.eup %2346 }
 0xa22   :  { %v856_v47 = vmul.f32 %v2347_v23, %v853_v21  ;;  %vm861_vm5 = vweird.f32 %v2347_v23 }
 0xa23   :  { %vm862_vm7 = vmor %vm860_vm6, %vm861_vm5 }
 0xa24   :  { %v857_v41 = vsub.f32 1.0, %v856_v47 }
 0xa26   :  { %v858_v59 = vmul.f32 %v2347_v23, %v857_v41 }
 0xa28   :  { %v859_v63 = vadd.f32 %v2347_v23, %v858_v59 }
 0xa2a   :  { %v863_v24 = vsel %vm862_vm7, %v2347_v23, %v859_v63 }
 0xa2b   :  { %v868_v61 = vsel %vm865_vm8, %v867_v25, %v863_v24 }
 0xa2c   :  { %v886_v26 = vmul.f32 %v868_v61, %v3034_v40 }
 0xa89   :  { %v889_v43 = vpop.permute.xlu0 %888 }
 0xa8a   :  { %v891_v45 = vmul.f32 %v889_v43, %v868_v61 }
 0xa8c   :  { %893 = vrot.lane.b32.xlu1 %v891_v45, %s2560_s3 }
 0xafe   :  { %v894_v56 = vpop.permute.xlu1 %893 }
 0xaff   :  { %v896_v49 = vadd.f32 %v894_v56, %v886_v26 }
 0xb01   :  { %2348 = vtanh.f32 %v896_v49 }
 0xb02   :  { %2350 = vpow2.f32 %v2217_v48 }
 0xb07   :  { %v2349_v55 = vpop.eup %2348 }
 0xb08   :  { %899 = vrot.lane.b32.xlu2 %v2349_v55, %s2560_s3  ;;  %v2351_v39 = vpop.eup %2350 }
 0xb09   :  { %v854_v46 = vadd.f32 1.0, %v2351_v39 }
 0xb0b   :  { %2352 = vrcp.f32 %v854_v46  ;;  %v881_v7 = vand.u32 2147483648, %v854_v46  ;;  %vm875_vm10 = vweird.f32 %v854_v46  ;;  %v879_v40 = vand.u32 2147483647, %v854_v46 }
 0xb0d   :  { %v882_v31 = vor.u32 1.1754944e-38, %v881_v7  ;;  %vm880_vm13 = vcmp.eq.f32.partialorder %v879_v40, 8.507059e+37  ;;  %v3546_v7 = vsel %vm2807_vm1, %v2849_v16, %v2847_v12 }
 0xb11   :  { %v2353_v50 = vpop.eup %2352 }
 0xb12   :  { %v871_v51 = vmul.f32 %v2353_v50, %v854_v46  ;;  %vm876_vm9 = vweird.f32 %v2353_v50 }
 0xb13   :  { %vm877_vm12 = vmor %vm875_vm10, %vm876_vm9 }
 0xb14   :  { %v872_v58 = vsub.f32 1.0, %v871_v51 }
 0xb16   :  { %v873_v60 = vmul.f32 %v2353_v50, %v872_v58 }
 0xb18   :  { %v874_v62 = vadd.f32 %v2353_v50, %v873_v60 }
 0xb1a   :  { %v878_v0 = vsel %vm877_vm12, %v2353_v50, %v874_v62 }
 0xb1b   :  { %v883_v17 = vsel %vm880_vm13, %v882_v31, %v878_v0  ;;  %v3547_v31 = vsel %vm2864_vm2, %v2862_v33, %v2860_v30 }
 0xb62   :  { %v900_v54 = vpop.permute.xlu2 %899 }
 0xb63   :  { %v902_v27 = vmul.f32 %v900_v54, %v883_v17 }
 0xb65   :  { %v1115_v2 = vsel %vm110_vm4, %v2984_v34, %v902_v27  ;;  %v1124_v32 = vsel %vm110_vm4, %v902_v27, %v2984_v34  ;;  %2218 = vmatmul.msk.f32.vlgmr.msra.gmra.mxu0 %vm286_vm11, %v902_v27  ;;  %2219 = vmatmul.msk.f32.vlgmr.msra.gmra.mxu1 %vm286_vm11, %v902_v27 }
 0xb66   :  { %v1116_v4 = vmax.f32 %v1115_v2, 0.0  ;;  %v1125_v42 = vmax.f32 %v1124_v32, 0.0 }
 0xb68   :  { %1117 = vst.msk [vmem:[#allocation3 + $0x10] sm:$0xff] %vm286_vm11, %v1116_v4 }
 0xb69   :  { %1126 = vst.msk [vmem:[#allocation3 + $0x28] sm:$0xff] %vm286_vm11, %v1125_v42 }
 0xbe2   :  { %v945_v28 = vpop.f32.mrf.mxu1  ;;  %v925_v34 = vpop.f32.mrf.mxu0 }
 0xbe3   :  { %v949_v6 = vadd.f32 %v945_v28, %v261_v5  ;;  %v948_v10 = vadd.f32 %v925_v34, %v260_v35 }
 0xbe5   :  { %2354 = vtanh.f32 %v949_v6  ;;  %v2220_v11 = vmul.f32 -1.442695, %v948_v10  ;;  %v2221_v63 = vmul.f32 -1.442695, %v949_v6 }
 0xbe7   :  { %2356 = vpow2.f32 %v2220_v11  ;;  %v1155_v11 = vld [vmem:[#allocation7 + $0x70] sm:$0xff] }
 0xbe8   :  { %1195 = vmatpush.msrb.mxu0 %v1155_v11  ;;  %v1138_v11 = vld [vmem:[#allocation3 + $0x28] sm:$0xff] }
 0xbeb   :  { %v2355_v9 = vpop.eup %2354 }
 0xbec   :  { %991 = vrot.lane.b32.xlu0 %v2355_v9, %s2560_s3 }
 0xbed   :  { %v2357_v13 = vpop.eup %2356 }
 0xbee   :  { %v956_v14 = vadd.f32 1.0, %v2357_v13  ;;  %v1156_v13 = vld [vmem:[#allocation7 + $0x78] sm:$0xff] }
 0xbef   :  { %1236 = vmatpush.msrb.mxu1 %v1156_v13 }
 0xbf0   :  { %2358 = vrcp.f32 %v956_v14  ;;  %v969_v18 = vand.u32 2147483648, %v956_v14  ;;  %vm963_vm15 = vweird.f32 %v956_v14  ;;  %v967_v19 = vand.u32 2147483647, %v956_v14 }
 0xbf2   :  { %v970_v21 = vor.u32 1.1754944e-38, %v969_v18  ;;  %vm968_vm3 = vcmp.eq.f32.partialorder %v967_v19, 8.507059e+37  ;;  %v1153_v19 = vld [vmem:[#allocation7 + $0x60] sm:$0xff] }
 0xbf3   :  { %1196 = vmatpush.msrb.mxu0 %v1153_v19 }
 0xbf6   :  { %v2359_v15 = vpop.eup %2358 }
 0xbf7   :  { %v959_v8 = vmul.f32 %v2359_v15, %v956_v14  ;;  %vm964_vm14 = vweird.f32 %v2359_v15 }
 0xbf8   :  { %vm965_vm0 = vmor %vm963_vm15, %vm964_vm14 }
 0xbf9   :  { %v960_v36 = vsub.f32 1.0, %v959_v8 }
 0xbfb   :  { %v961_v1 = vmul.f32 %v2359_v15, %v960_v36 }
 0xbfd   :  { %v962_v5 = vadd.f32 %v2359_v15, %v961_v1 }
 0xbff   :  { %v966_v20 = vsel %vm965_vm0, %v2359_v15, %v962_v5 }
 0xc00   :  { %v971_v3 = vsel %vm968_vm3, %v970_v21, %v966_v20  ;;  %v1154_v20 = vld [vmem:[#allocation7 + $0x68] sm:$0xff]  ;;  %v1151_v21 = vld [vmem:[#allocation7 + $0x50] sm:$0xff] }
 0xc01   :  { %v989_v23 = vmul.f32 %v971_v3, %v896_v49  ;;  %1237 = vmatpush.msrb.mxu1 %v1154_v20  ;;  %1197 = vmatpush.msrb.mxu0 %v1151_v21 }
 0xc5e   :  { %v992_v38 = vpop.permute.xlu0 %991 }
 0xc5f   :  { %v994_v35 = vmul.f32 %v992_v38, %v971_v3  ;;  %v1152_v38 = vld [vmem:[#allocation7 + $0x58] sm:$0xff]  ;;  %v1149_v3 = vld [vmem:[#allocation7 + $0x40] sm:$0xff] }
 0xc60   :  { %1238 = vmatpush.msrb.mxu1 %v1152_v38  ;;  %1198 = vmatpush.msrb.mxu0 %v1149_v3 }
 0xc61   :  { %996 = vrot.lane.b32.xlu1 %v994_v35, %s2560_s3  ;;  %v1150_v35 = vld [vmem:[#allocation7 + $0x48] sm:$0xff] }
 0xc62   :  { %1239 = vmatpush.msrb.mxu1 %v1150_v35 }
 0xcd3   :  { %v997_v47 = vpop.permute.xlu1 %996 }
 0xcd4   :  { %v3083_v41 = vadd.f32 %v997_v47, %v989_v23  ;;  %v1147_v23 = vld [vmem:[#allocation7 + $0x30] sm:$0xff]  ;;  %v1148_v47 = vld [vmem:[#allocation7 + $0x38] sm:$0xff] }
 0xcd5   :  { %1199 = vmatpush.msrb.mxu0 %v1147_v23  ;;  %1240 = vmatpush.msrb.mxu1 %v1148_v47 }
 0xcd6   :  { %2360 = vtanh.f32 %v3083_v41 }
 0xcd7   :  { %2362 = vpow2.f32 %v2221_v63  ;;  %v1143_v63 = vld [vmem:[#allocation7 + $0x10] sm:$0xff] }
 0xcdc   :  { %v2361_v59 = vpop.eup %2360 }
 0xcdd   :  { %1002 = vrot.lane.b32.xlu2 %v2361_v59, %s2560_s3  ;;  %v2363_v53 = vpop.eup %2362  ;;  %v1146_v59 = vld [vmem:[#allocation7 + $0x28] sm:$0xff] }
 0xcde   :  { %v957_v57 = vadd.f32 1.0, %v2363_v53  ;;  %v1144_v53 = vld [vmem:[#allocation7 + $0x18] sm:$0xff]  ;;  %1241 = vmatpush.msrb.mxu1 %v1146_v59 }
 0xce0   :  { %2364 = vrcp.f32 %v957_v57  ;;  %v984_v26 = vand.u32 2147483648, %v957_v57  ;;  %vm978_vm6 = vweird.f32 %v957_v57  ;;  %v982_v56 = vand.u32 2147483647, %v957_v57  ;;  %1242 = vmatpush.msrb.mxu1 %v1144_v53 }
 0xce2   :  { %v985_v55 = vor.u32 1.1754944e-38, %v984_v26  ;;  %vm983_vm8 = vcmp.eq.f32.partialorder %v982_v56, 8.507059e+37 }
 0xce6   :  { %v2365_v24 = vpop.eup %2364 }
 0xce7   :  { %v974_v25 = vmul.f32 %v2365_v24, %v957_v57  ;;  %vm979_vm5 = vweird.f32 %v2365_v24 }
 0xce8   :  { %vm980_vm7 = vmor %vm978_vm6, %vm979_vm5 }
 0xce9   :  { %v975_v43 = vsub.f32 1.0, %v974_v25  ;;  %v1142_v25 = vld [vmem:[#allocation7 + $0x8] sm:$0xff] }
 0xcea   :  { %1243 = vmatpush.msrb.mxu1 %v1142_v25 }
 0xceb   :  { %v976_v61 = vmul.f32 %v2365_v24, %v975_v43 }
 0xced   :  { %v977_v45 = vadd.f32 %v2365_v24, %v976_v61 }
 0xcef   :  { %v981_v49 = vsel %vm980_vm7, %v2365_v24, %v977_v45  ;;  %v1141_v24 = vld [vmem:[#allocation7] sm:$0xff] }
 0xcf0   :  { %v986_v48 = vsel %vm983_vm8, %v985_v55, %v981_v49 }
 0xd37   :  { %v1003_v39 = vpop.permute.xlu2 %1002 }
 0xd38   :  { %v1005_v46 = vmul.f32 %v1003_v39, %v986_v48 }
 0xd3a   :  { %v1112_v50 = vsel %vm110_vm4, %v2945_v22, %v1005_v46  ;;  %v1127_v51 = vsel %vm110_vm4, %v1005_v46, %v2945_v22  ;;  %2222 = vmatmul.msk.f32.vlgmr.msrb.gmra.mxu2 %vm286_vm11, %v1005_v46  ;;  %2223 = vmatmul.msk.f32.vlgmr.msrb.gmra.mxu3 %vm286_vm11, %v1005_v46 }
 0xd3b   :  { %v1113_v58 = vmax.f32 %v1112_v50, 0.0  ;;  %v1128_v60 = vmax.f32 %v1127_v51, 0.0 }
 0xd3d   :  { %1114 = vst.msk [vmem:[#allocation3 + $0x8] sm:$0xff] %vm286_vm11, %v1113_v58 }
 0xd3e   :  { %1129 = vst.msk [vmem:[#allocation3 + $0x30] sm:$0xff] %vm286_vm11, %v1128_v60 }
 0xd45   :  { %v1139_v13 = vld [vmem:[#allocation3 + $0x30] sm:$0xff] }
 0xdbd   :  { %v1048_v62 = vpop.f32.mrf.mxu3  ;;  %v1028_v22 = vpop.f32.mrf.mxu2 }
 0xdbe   :  { %v1052_v40 = vadd.f32 %v1048_v62, %v3546_v7  ;;  %v1051_v17 = vadd.f32 %v1028_v22, %v3547_v31  ;;  %v3131_v22 = vld [vmem:[#allocation9 + $0x60] sm:$0xff]  ;;  %v3133_v31 = vld [vmem:[#allocation9 + $0x68] sm:$0xff] }
 0xdc0   :  { %2366 = vtanh.f32 %v1052_v40  ;;  %v2224_v54 = vmul.f32 -1.442695, %v1051_v17  ;;  %v2225_v1 = vmul.f32 -1.442695, %v1052_v40  ;;  %v3121_v40 = vld [vmem:[#allocation9 + $0x70] sm:$0xff] }
 0xdc1   :  { %1327 = vmatpush.msra.mxu2 %v3121_v40  ;;  %v3135_v17 = vld [vmem:[#allocation9 + $0x50] sm:$0xff] }
 0xdc2   :  { %2368 = vpow2.f32 %v2224_v54  ;;  %v3139_v54 = vld [vmem:[#allocation9 + $0x58] sm:$0xff] }
 0xdc3   :  { %1328 = vmatpush.msra.mxu2 %v3131_v22 }
 0xdc5   :  { %1329 = vmatpush.msra.mxu2 %v3135_v17 }
 0xdc6   :  { %v2367_v0 = vpop.eup %2366 }
 0xdc7   :  { %1094 = vrot.lane.b32.xlu0 %v2367_v0, %s2560_s3  ;;  %v3123_v0 = vld [vmem:[#allocation9 + $0x78] sm:$0xff] }
 0xdc8   :  { %v2369_v27 = vpop.eup %2368  ;;  %1347 = vmatpush.msra.mxu3 %v3123_v0  ;;  %1759 = vmatpush.msra.mxu1 %v3123_v0 }
 0xdc9   :  { %v1059_v2 = vadd.f32 1.0, %v2369_v27  ;;  %v3141_v27 = vld [vmem:[#allocation9 + $0x40] sm:$0xff] }
 0xdca   :  { %1348 = vmatpush.msra.mxu3 %v3133_v31  ;;  %1760 = vmatpush.msra.mxu1 %v3133_v31 }
 0xdcb   :  { %2370 = vrcp.f32 %v1059_v2  ;;  %v1072_v28 = vand.u32 2147483648, %v1059_v2  ;;  %vm1066_vm10 = vweird.f32 %v1059_v2  ;;  %v1070_v6 = vand.u32 2147483647, %v1059_v2  ;;  %1330 = vmatpush.msra.mxu2 %v3141_v27 }
 0xdcc   :  { %1349 = vmatpush.msra.mxu3 %v3139_v54  ;;  %1761 = vmatpush.msra.mxu1 %v3139_v54 }
 0xdcd   :  { %v1073_v34 = vor.u32 1.1754944e-38, %v1072_v28  ;;  %vm1071_vm13 = vcmp.eq.f32.partialorder %v1070_v6, 8.507059e+37  ;;  %v3167_v28 = vld [vmem:[#allocation9 + $0x10] sm:$0xff]  ;;  %v3171_v6 = vld [vmem:[#allocation9 + $0x18] sm:$0xff] }
 0xdd1   :  { %v2371_v32 = vpop.eup %2370 }
 0xdd2   :  { %v1062_v4 = vmul.f32 %v2371_v32, %v1059_v2  ;;  %vm1067_vm9 = vweird.f32 %v2371_v32  ;;  %v3143_v2 = vld [vmem:[#allocation9 + $0x48] sm:$0xff] }
 0xdd3   :  { %vm1068_vm12 = vmor %vm1066_vm10, %vm1067_vm9  ;;  %1350 = vmatpush.msra.mxu3 %v3143_v2  ;;  %1762 = vmatpush.msra.mxu1 %v3143_v2 }
 0xdd4   :  { %v1063_v12 = vsub.f32 1.0, %v1062_v4  ;;  %v3151_v4 = vld [vmem:[#allocation9 + $0x38] sm:$0xff] }
 0xdd5   :  { %1351 = vmatpush.msra.mxu3 %v3151_v4  ;;  %1763 = vmatpush.msra.mxu1 %v3151_v4 }
 0xdd6   :  { %v1064_v16 = vmul.f32 %v2371_v32, %v1063_v12  ;;  %v1135_v12 = vld [vmem:[#allocation3 + $0x10] sm:$0xff] }
 0xdd8   :  { %v1065_v42 = vadd.f32 %v2371_v32, %v1064_v16  ;;  %v3163_v16 = vld [vmem:[#allocation9 + $0x20] sm:$0xff] }
 0xdda   :  { %v1069_v9 = vsel %vm1068_vm12, %v2371_v32, %v1065_v42  ;;  %v3149_v32 = vld [vmem:[#allocation9 + $0x30] sm:$0xff]  ;;  %v3165_v42 = vld [vmem:[#allocation9 + $0x28] sm:$0xff] }
 0xddb   :  { %v1074_v33 = vsel %vm1071_vm13, %v1073_v34, %v1069_v9  ;;  %1331 = vmatpush.msra.mxu2 %v3149_v32  ;;  %1352 = vmatpush.msra.mxu3 %v3165_v42  ;;  %v3173_v9 = vld [vmem:[#allocation9] sm:$0xff]  ;;  %v3175_v34 = vld [vmem:[#allocation9 + $0x8] sm:$0xff] }
 0xddc   :  { %v1092_v14 = vmul.f32 %v1074_v33, %v3083_v41  ;;  %v1145_v41 = vld [vmem:[#allocation7 + $0x20] sm:$0xff]  ;;  %1764 = vmatpush.msra.mxu1 %v3165_v42 }
 0xddd   :  { %1200 = vmatpush.msrb.mxu0 %v1145_v41  ;;  %1332 = vmatpush.msra.mxu2 %v3163_v16 }
 0xdde   :  { %1353 = vmatpush.msra.mxu3 %v3171_v6  ;;  %1765 = vmatpush.msra.mxu1 %v3171_v6 }
 0xddf   :  { %1201 = vmatpush.msrb.mxu0 %v1143_v63  ;;  %1333 = vmatpush.msra.mxu2 %v3167_v28 }
 0xde0   :  { %1354 = vmatpush.msra.mxu3 %v3175_v34  ;;  %1766 = vmatpush.msra.mxu1 %v3175_v34 }
 0xde1   :  { %1202 = vmatpush.msrb.mxu0 %v1141_v24  ;;  %1334 = vmatpush.msra.mxu2 %v3173_v9 }
 0xde2   :  { %1450 = vmatpush.msrb.mxu3 %v3123_v0 }
 0xde3   :  { %1739 = vmatpush.msra.mxu0 %v3121_v40  ;;  %1430 = vmatpush.msrb.mxu2 %v3121_v40 }
 0xde4   :  { %1451 = vmatpush.msrb.mxu3 %v3133_v31 }
 0xde5   :  { %1740 = vmatpush.msra.mxu0 %v3131_v22  ;;  %1431 = vmatpush.msrb.mxu2 %v3131_v22 }
 0xde6   :  { %1452 = vmatpush.msrb.mxu3 %v3139_v54 }
 0xde7   :  { %1741 = vmatpush.msra.mxu0 %v3135_v17  ;;  %1432 = vmatpush.msrb.mxu2 %v3135_v17 }
 0xde8   :  { %1453 = vmatpush.msrb.mxu3 %v3143_v2 }
 0xde9   :  { %1742 = vmatpush.msra.mxu0 %v3141_v27  ;;  %1433 = vmatpush.msrb.mxu2 %v3141_v27 }
 0xdea   :  { %1454 = vmatpush.msrb.mxu3 %v3151_v4 }
 0xdeb   :  { %1743 = vmatpush.msra.mxu0 %v3149_v32  ;;  %1434 = vmatpush.msrb.mxu2 %v3149_v32 }
 0xdec   :  { %1455 = vmatpush.msrb.mxu3 %v3165_v42 }
 0xded   :  { %1744 = vmatpush.msra.mxu0 %v3163_v16  ;;  %1435 = vmatpush.msrb.mxu2 %v3163_v16 }
 0xdee   :  { %1456 = vmatpush.msrb.mxu3 %v3171_v6 }
 0xdef   :  { %1745 = vmatpush.msra.mxu0 %v3167_v28  ;;  %1436 = vmatpush.msrb.mxu2 %v3167_v28 }
 0xdf0   :  { %1457 = vmatpush.msrb.mxu3 %v3175_v34 }
 0xdf1   :  { %1746 = vmatpush.msra.mxu0 %v3173_v9  ;;  %1437 = vmatpush.msrb.mxu2 %v3173_v9 }
 0xe39   :  { %v1095_v30 = vpop.permute.xlu0 %1094 }
 0xe3a   :  { %v1097_v10 = vmul.f32 %v1095_v30, %v1074_v33  ;;  %v3548_v30 = vmov 0.0   ;;  %v1136_v33 = vld [vmem:[#allocation3 + $0x18] sm:$0xff] }
 0xe3b   :  { %1335 = vmatmul.f32.vlgmr.msra.gmra.mxu2 %v3548_v30  ;;  %1355 = vmatmul.f32.vlgmr.msra.gmra.mxu3 %v3548_v30 }
 0xe3c   :  { %1099 = vrot.lane.b32.xlu1 %v1097_v10, %s2560_s3  ;;  %v1137_v10 = vld [vmem:[#allocation3 + $0x20] sm:$0xff]  ;;  %1533 = vmatpush.msra.mxu2 %v3121_v40 }
 0xe3d   :  { %1553 = vmatpush.msra.mxu3 %v3123_v0 }
 0xe3e   :  { %1534 = vmatpush.msra.mxu2 %v3131_v22 }
 0xe3f   :  { %1554 = vmatpush.msra.mxu3 %v3133_v31 }
 0xe40   :  { %1535 = vmatpush.msra.mxu2 %v3135_v17 }
 0xe41   :  { %1555 = vmatpush.msra.mxu3 %v3139_v54 }
 0xe42   :  { %1536 = vmatpush.msra.mxu2 %v3141_v27 }
 0xe43   :  { %1556 = vmatpush.msra.mxu3 %v3143_v2 }
 0xe44   :  { %1537 = vmatpush.msra.mxu2 %v3149_v32 }
 0xe45   :  { %1557 = vmatpush.msra.mxu3 %v3151_v4 }
 0xe46   :  { %1538 = vmatpush.msra.mxu2 %v3163_v16 }
 0xe47   :  { %1558 = vmatpush.msra.mxu3 %v3165_v42 }
 0xe48   :  { %1539 = vmatpush.msra.mxu2 %v3167_v28 }
 0xe49   :  { %1559 = vmatpush.msra.mxu3 %v3171_v6 }
 0xe4a   :  { %1540 = vmatpush.msra.mxu2 %v3173_v9 }
 0xe4b   :  { %1560 = vmatpush.msra.mxu3 %v3175_v34 }
 0xeae   :  { %v1100_v15 = vpop.permute.xlu1 %1099 }
 0xeaf   :  { %v1102_v8 = vadd.f32 %v1100_v15, %v1092_v14 }
 0xeb1   :  { %2372 = vtanh.f32 %v1102_v8 }
 0xeb2   :  { %2374 = vpow2.f32 %v2225_v1 }
 0xeb7   :  { %v2373_v36 = vpop.eup %2372 }
 0xeb8   :  { %1105 = vrot.lane.b32.xlu2 %v2373_v36, %s2560_s3  ;;  %v2375_v5 = vpop.eup %2374  ;;  %v1157_v36 = vld [vmem:[%s3536_s6] sm:$0x3] }
 0xeb9   :  { %v1060_v18 = vadd.f32 1.0, %v2375_v5  ;;  %v1159_v1 = vperm.slane %v1157_v36, 0  ;;  %v1160_v5 = vperm.slane %v1157_v36, 1 }
 0xebb   :  { %2376 = vrcp.f32 %v1060_v18  ;;  %v1087_v56 = vand.u32 2147483648, %v1060_v18  ;;  %vm1081_vm15 = vweird.f32 %v1060_v18  ;;  %v1085_v49 = vand.u32 2147483647, %v1060_v18 }
 0xebd   :  { %v1088_v48 = vor.u32 1.1754944e-38, %v1087_v56  ;;  %vm1086_vm3 = vcmp.eq.f32.partialorder %v1085_v49, 8.507059e+37 }
 0xec1   :  { %v2377_v57 = vpop.eup %2376 }
 0xec2   :  { %v1077_v43 = vmul.f32 %v2377_v57, %v1060_v18  ;;  %vm1082_vm14 = vweird.f32 %v2377_v57 }
 0xec3   :  { %vm1083_vm0 = vmor %vm1081_vm15, %vm1082_vm14 }
 0xec4   :  { %v1078_v61 = vsub.f32 1.0, %v1077_v43 }
 0xec6   :  { %v1079_v45 = vmul.f32 %v2377_v57, %v1078_v61 }
 0xec8   :  { %v1080_v26 = vadd.f32 %v2377_v57, %v1079_v45 }
 0xeca   :  { %v1084_v55 = vsel %vm1083_vm0, %v2377_v57, %v1080_v26 }
 0xecb   :  { %v1089_v39 = vsel %vm1086_vm3, %v1088_v48, %v1084_v55 }
 0xf12   :  { %v1106_v46 = vpop.permute.xlu2 %1105 }
 0xf13   :  { %v1108_v50 = vmul.f32 %v1106_v46, %v1089_v39 }
 0xf15   :  { %v1109_v51 = vsel %vm110_vm4, %v2906_v29, %v1108_v50  ;;  %v1130_v58 = vsel %vm110_vm4, %v1108_v50, %v2906_v29  ;;  %v1134_v29 = vld [vmem:[#allocation3 + $0x8] sm:$0xff] }
 0xf16   :  { %v1110_v60 = vmax.f32 %v1109_v51, 0.0  ;;  %v1131_v62 = vmax.f32 %v1130_v58, 0.0 }
 0xf18   :  { %1111 = vst.msk [vmem:[#allocation3] sm:$0xff] %vm286_vm11, %v1110_v60 }
 0xf19   :  { %1132 = vst.msk [vmem:[#allocation3 + $0x38] sm:$0xff] %vm286_vm11, %v1131_v62 }
 0xf1f   :  { %v1133_v7 = vld [vmem:[#allocation3] sm:$0xff] }
 0xf20   :  { %2226 = vmatmul.msk.f32.vlgmr.msrb.gmra.mxu0 %vm286_vm11, %v1133_v7  ;;  %2234 = vmatmul.msk.f32.vlgmr.msrb.gmra.mxu1 %vm286_vm11, %v1133_v7  ;;  %v1140_v14 = vld [vmem:[#allocation3 + $0x38] sm:$0xff] }
 0xf21   :  { %1945 = vmatpush.msrb.mxu0 %v3121_v40  ;;  %1965 = vmatpush.msrb.mxu1 %v3123_v0 }
 0xf23   :  { %1946 = vmatpush.msrb.mxu0 %v3131_v22  ;;  %1966 = vmatpush.msrb.mxu1 %v3133_v31 }
 0xf25   :  { %1947 = vmatpush.msrb.mxu0 %v3135_v17  ;;  %1967 = vmatpush.msrb.mxu1 %v3139_v54 }
 0xf27   :  { %1948 = vmatpush.msrb.mxu0 %v3141_v27  ;;  %1968 = vmatpush.msrb.mxu1 %v3143_v2 }
 0xf28   :  { %2227 = vmatmul.msk.f32.gmra.mxu0 %vm286_vm11, %v1134_v29  ;;  %2235 = vmatmul.msk.f32.gmra.mxu1 %vm286_vm11, %v1134_v29 }
 0xf29   :  { %1949 = vmatpush.msrb.mxu0 %v3149_v32  ;;  %1969 = vmatpush.msrb.mxu1 %v3151_v4 }
 0xf2b   :  { %1950 = vmatpush.msrb.mxu0 %v3163_v16  ;;  %1970 = vmatpush.msrb.mxu1 %v3165_v42 }
 0xf2d   :  { %1951 = vmatpush.msrb.mxu0 %v3167_v28  ;;  %1971 = vmatpush.msrb.mxu1 %v3171_v6 }
 0xf2f   :  { %1952 = vmatpush.msrb.mxu0 %v3173_v9  ;;  %1972 = vmatpush.msrb.mxu1 %v3175_v34 }
 0xf30   :  { %2228 = vmatmul.msk.f32.gmra.mxu0 %vm286_vm11, %v1135_v12  ;;  %2236 = vmatmul.msk.f32.gmra.mxu1 %vm286_vm11, %v1135_v12 }
 0xf38   :  { %2229 = vmatmul.msk.f32.gmra.mxu0 %vm286_vm11, %v1136_v33  ;;  %2237 = vmatmul.msk.f32.gmra.mxu1 %vm286_vm11, %v1136_v33 }
 0xf40   :  { %2230 = vmatmul.msk.f32.gmra.mxu0 %vm286_vm11, %v1137_v10  ;;  %2238 = vmatmul.msk.f32.gmra.mxu1 %vm286_vm11, %v1137_v10 }
 0xf48   :  { %2231 = vmatmul.msk.f32.gmra.mxu0 %vm286_vm11, %v1138_v11  ;;  %2239 = vmatmul.msk.f32.gmra.mxu1 %vm286_vm11, %v1138_v11 }
 0xf50   :  { %2232 = vmatmul.msk.f32.gmra.mxu0 %vm286_vm11, %v1139_v13  ;;  %2240 = vmatmul.msk.f32.gmra.mxu1 %vm286_vm11, %v1139_v13 }
 0xf58   :  { %2233 = vmatmul.msk.f32.gmra.mxu0 %vm286_vm11, %v1140_v14  ;;  %2241 = vmatmul.msk.f32.gmra.mxu1 %vm286_vm11, %v1140_v14 }
 0xf9d   :  { %v1204_v15 = vpop.f32.mrf.mxu0  ;;  %v1245_v8 = vpop.f32.mrf.mxu1 }
 0xf9e   :  { %v3324_v13 = vadd.f32 %v1204_v15, %v1159_v1  ;;  %v3326_v14 = vadd.f32 %v1245_v8, %v1160_v5 }
 0xfa5   :  { %v1207_v18 = vpop.f32.mrf.mxu0  ;;  %v1248_v19 = vpop.f32.mrf.mxu1 }
 0xfa6   :  { %v3252_v20 = vadd.f32 %v1207_v18, %v1159_v1  ;;  %v3254_v21 = vadd.f32 %v1248_v19, %v1160_v5  ;;  %v1356_v19 = vpop.f32.mrf.mxu3 }
 0xfad   :  { %v1210_v38 = vpop.f32.mrf.mxu0  ;;  %v1251_v3 = vpop.f32.mrf.mxu1 }
 0xfae   :  { %v3256_v35 = vadd.f32 %v1210_v38, %v1159_v1  ;;  %v3258_v23 = vadd.f32 %v1251_v3, %v1160_v5 }
 0xfb5   :  { %v1213_v47 = vpop.f32.mrf.mxu0  ;;  %v1254_v41 = vpop.f32.mrf.mxu1 }
 0xfb6   :  { %v3260_v59 = vadd.f32 %v1213_v47, %v1159_v1  ;;  %v3262_v63 = vadd.f32 %v1254_v41, %v1160_v5  ;;  %v1336_v47 = vpop.f32.mrf.mxu2 }
 0xfbd   :  { %v1216_v53 = vpop.f32.mrf.mxu0  ;;  %v1257_v57 = vpop.f32.mrf.mxu1 }
 0xfbe   :  { %v3264_v24 = vadd.f32 %v1216_v53, %v1159_v1  ;;  %v3266_v25 = vadd.f32 %v1257_v57, %v1160_v5 }
 0xfc0   :  { %v1281_v43 = vsel %vm2864_vm2, %v3260_v59, %v3264_v24  ;;  %v1282_v61 = vsel %vm2807_vm1, %v3262_v63, %v3266_v25  ;;  %v1285_v45 = vsel %vm2864_vm2, %v3264_v24, %v3260_v59  ;;  %v1286_v26 = vsel %vm2807_vm1, %v3266_v25, %v3262_v63 }
 0xfc5   :  { %v1219_v56 = vpop.f32.mrf.mxu0  ;;  %v1260_v49 = vpop.f32.mrf.mxu1 }
 0xfc6   :  { %v3284_v55 = vadd.f32 %v1219_v56, %v1159_v1  ;;  %v3286_v48 = vadd.f32 %v1260_v49, %v1160_v5 }
 0xfc8   :  { %v1277_v39 = vsel %vm2864_vm2, %v3256_v35, %v3284_v55  ;;  %v1278_v46 = vsel %vm2807_vm1, %v3258_v23, %v3286_v48  ;;  %v1289_v50 = vsel %vm2864_vm2, %v3284_v55, %v3256_v35  ;;  %v1290_v51 = vsel %vm2807_vm1, %v3286_v48, %v3258_v23 }
 0xfcd   :  { %v1222_v58 = vpop.f32.mrf.mxu0  ;;  %v1263_v60 = vpop.f32.mrf.mxu1 }
 0xfce   :  { %v3304_v62 = vadd.f32 %v1222_v58, %v1159_v1  ;;  %v3306_v7 = vadd.f32 %v1263_v60, %v1160_v5 }
 0xfd0   :  { %v1273_v29 = vsel %vm2864_vm2, %v3252_v20, %v3304_v62  ;;  %v1274_v12 = vsel %vm2807_vm1, %v3254_v21, %v3306_v7  ;;  %v1293_v30 = vsel %vm2864_vm2, %v3304_v62, %v3252_v20  ;;  %v1294_v33 = vsel %vm2807_vm1, %v3306_v7, %v3254_v21 }
 0xfd5   :  { %v1225_v10 = vpop.f32.mrf.mxu0  ;;  %v1266_v11 = vpop.f32.mrf.mxu1 }
 0xfd6   :  { %v3328_v36 = vadd.f32 %v1225_v10, %v1159_v1  ;;  %v3330_v18 = vadd.f32 %v1266_v11, %v1160_v5 }
 0xfd8   :  { %v1270_v38 = vsel %vm2807_vm1, %v3326_v14, %v3330_v18  ;;  %v1269_v5 = vsel %vm2864_vm2, %v3324_v13, %v3328_v36 }
 0xfd9   :  { %v1360_v8 = vadd.f32 %v1356_v19, %v1270_v38  ;;  %v1359_v41 = vadd.f32 %v1336_v47, %v1269_v5 }
 0xfdb   :  { %2378 = vtanh.f32 %v1360_v8  ;;  %v2242_v53 = vmul.f32 -1.442695, %v1359_v41 }
 0xfdd   :  { %2380 = vpow2.f32 %v2242_v53 }
 0xfe1   :  { %v2379_v1 = vpop.eup %2378 }
 0xfe2   :  { %1402 = vrot.lane.b32.xlu0 %v2379_v1, %s2560_s3 }
 0xfe3   :  { %v2381_v57 = vpop.eup %2380 }
 0xfe4   :  { %v1367_v56 = vadd.f32 1.0, %v2381_v57 }
 0xfe6   :  { %2382 = vrcp.f32 %v1367_v56  ;;  %v1380_v19 = vand.u32 2147483648, %v1367_v56  ;;  %vm1374_vm6 = vweird.f32 %v1367_v56  ;;  %v1378_v38 = vand.u32 2147483647, %v1367_v56 }
 0xfe8   :  { %v1381_v3 = vor.u32 1.1754944e-38, %v1380_v19  ;;  %vm1379_vm8 = vcmp.eq.f32.partialorder %v1378_v38, 8.507059e+37 }
 0xfec   :  { %v2383_v49 = vpop.eup %2382 }
 0xfed   :  { %v1370_v58 = vmul.f32 %v2383_v49, %v1367_v56  ;;  %vm1375_vm5 = vweird.f32 %v2383_v49 }
 0xfee   :  { %vm1376_vm7 = vmor %vm1374_vm6, %vm1375_vm5 }
 0xfef   :  { %v1371_v60 = vsub.f32 1.0, %v1370_v58 }
 0xff1   :  { %v1372_v10 = vmul.f32 %v2383_v49, %v1371_v60  ;;  %v2243_v60 = vmul.f32 -1.442695, %v1360_v8 }
 0xff3   :  { %v1373_v11 = vadd.f32 %v2383_v49, %v1372_v10 }
 0xff5   :  { %v1377_v1 = vsel %vm1376_vm7, %v2383_v49, %v1373_v11 }
 0xff6   :  { %v1382_v5 = vsel %vm1379_vm8, %v1381_v3, %v1377_v1 }
 0xff7   :  { %v1400_v41 = vmul.f32 0.0, %v1382_v5 }
0x1054   :  { %v1403_v15 = vpop.permute.xlu0 %1402 }
0x1055   :  { %v1405_v47 = vmul.f32 %v1403_v15, %v1382_v5 }
0x1057   :  { %1407 = vrot.lane.b32.xlu1 %v1405_v47, %s2560_s3 }
0x10c9   :  { %v1408_v53 = vpop.permute.xlu1 %1407 }
0x10ca   :  { %v3350_v57 = vadd.f32 %v1408_v53, %v1400_v41 }
0x10cc   :  { %2384 = vtanh.f32 %v3350_v57 }
0x10cd   :  { %2386 = vpow2.f32 %v2243_v60 }
0x10d2   :  { %v2385_v58 = vpop.eup %2384 }
0x10d3   :  { %1413 = vrot.lane.b32.xlu2 %v2385_v58, %s2560_s3  ;;  %v2387_v56 = vpop.eup %2386 }
0x10d4   :  { %v1368_v49 = vadd.f32 1.0, %v2387_v56 }
0x10d6   :  { %2388 = vrcp.f32 %v1368_v49  ;;  %v1395_v38 = vand.u32 2147483648, %v1368_v49  ;;  %vm1389_vm10 = vweird.f32 %v1368_v49  ;;  %v1393_v1 = vand.u32 2147483647, %v1368_v49 }
0x10d8   :  { %v1396_v47 = vor.u32 1.1754944e-38, %v1395_v38  ;;  %vm1394_vm13 = vcmp.eq.f32.partialorder %v1393_v1, 8.507059e+37 }
0x10dc   :  { %v2389_v10 = vpop.eup %2388 }
0x10dd   :  { %v1385_v11 = vmul.f32 %v2389_v10, %v1368_v49  ;;  %vm1390_vm9 = vweird.f32 %v2389_v10 }
0x10de   :  { %vm1391_vm12 = vmor %vm1389_vm10, %vm1390_vm9 }
0x10df   :  { %v1386_v3 = vsub.f32 1.0, %v1385_v11 }
0x10e1   :  { %v1387_v15 = vmul.f32 %v2389_v10, %v1386_v3 }
0x10e3   :  { %v1388_v19 = vadd.f32 %v2389_v10, %v1387_v15 }
0x10e5   :  { %v1392_v5 = vsel %vm1391_vm12, %v2389_v10, %v1388_v19 }
0x10e6   :  { %v1397_v41 = vsel %vm1394_vm13, %v1396_v47, %v1392_v5 }
0x112d   :  { %v1414_v53 = vpop.permute.xlu2 %1413 }
0x112e   :  { %v3354_v8 = vmul.f32 %v1414_v53, %v1397_v41 }
0x1130   :  { %2244 = vmatmul.msk.f32.vlgmr.msrb.gmra.mxu2 %vm286_vm11, %v3354_v8  ;;  %2245 = vmatmul.msk.f32.vlgmr.msrb.gmra.mxu3 %vm286_vm11, %v3354_v8 }
0x1131   :  { %1636 = vmatpush.msrb.mxu2 %v3121_v40  ;;  %1656 = vmatpush.msrb.mxu3 %v3123_v0 }
0x1133   :  { %1637 = vmatpush.msrb.mxu2 %v3131_v22  ;;  %1657 = vmatpush.msrb.mxu3 %v3133_v31 }
0x1135   :  { %1638 = vmatpush.msrb.mxu2 %v3135_v17  ;;  %1658 = vmatpush.msrb.mxu3 %v3139_v54 }
0x1137   :  { %1639 = vmatpush.msrb.mxu2 %v3141_v27  ;;  %1659 = vmatpush.msrb.mxu3 %v3143_v2 }
0x1139   :  { %1640 = vmatpush.msrb.mxu2 %v3149_v32  ;;  %1660 = vmatpush.msrb.mxu3 %v3151_v4 }
0x113b   :  { %1641 = vmatpush.msrb.mxu2 %v3163_v16  ;;  %1661 = vmatpush.msrb.mxu3 %v3165_v42 }
0x113d   :  { %1642 = vmatpush.msrb.mxu2 %v3167_v28  ;;  %1662 = vmatpush.msrb.mxu3 %v3171_v6 }
0x113f   :  { %1643 = vmatpush.msrb.mxu2 %v3173_v9  ;;  %1663 = vmatpush.msrb.mxu3 %v3175_v34 }
0x11b3   :  { %v1459_v58 = vpop.f32.mrf.mxu3  ;;  %v1439_v49 = vpop.f32.mrf.mxu2 }
0x11b4   :  { %v1463_v60 = vadd.f32 %v1459_v58, %v1274_v12  ;;  %v1462_v10 = vadd.f32 %v1439_v49, %v1273_v29 }
0x11b6   :  { %2390 = vtanh.f32 %v1463_v60  ;;  %v2246_v11 = vmul.f32 -1.442695, %v1462_v10 }
0x11b8   :  { %2392 = vpow2.f32 %v2246_v11 }
0x11bc   :  { %v2391_v56 = vpop.eup %2390 }
0x11bd   :  { %1505 = vrot.lane.b32.xlu0 %v2391_v56, %s2560_s3 }
0x11be   :  { %v2393_v3 = vpop.eup %2392 }
0x11bf   :  { %v1470_v15 = vadd.f32 1.0, %v2393_v3 }
0x11c1   :  { %2394 = vrcp.f32 %v1470_v15  ;;  %v1483_v47 = vand.u32 2147483648, %v1470_v15  ;;  %vm1477_vm15 = vweird.f32 %v1470_v15  ;;  %v1481_v41 = vand.u32 2147483647, %v1470_v15 }
0x11c3   :  { %v1484_v58 = vor.u32 1.1754944e-38, %v1483_v47  ;;  %vm1482_vm3 = vcmp.eq.f32.partialorder %v1481_v41, 8.507059e+37 }
0x11c7   :  { %v2395_v19 = vpop.eup %2394 }
0x11c8   :  { %v1473_v38 = vmul.f32 %v2395_v19, %v1470_v15  ;;  %vm1478_vm14 = vweird.f32 %v2395_v19  ;;  %v2247_v15 = vmul.f32 -1.442695, %v1463_v60 }
0x11c9   :  { %vm1479_vm0 = vmor %vm1477_vm15, %vm1478_vm14 }
0x11ca   :  { %v1474_v1 = vsub.f32 1.0, %v1473_v38 }
0x11cc   :  { %v1475_v12 = vmul.f32 %v2395_v19, %v1474_v1 }
0x11ce   :  { %v1476_v5 = vadd.f32 %v2395_v19, %v1475_v12 }
0x11d0   :  { %v1480_v53 = vsel %vm1479_vm0, %v2395_v19, %v1476_v5 }
0x11d1   :  { %v1485_v29 = vsel %vm1482_vm3, %v1484_v58, %v1480_v53 }
0x11d2   :  { %v1503_v10 = vmul.f32 %v1485_v29, %v3350_v57 }
0x122f   :  { %v1506_v56 = vpop.permute.xlu0 %1505 }
0x1230   :  { %v1508_v49 = vmul.f32 %v1506_v56, %v1485_v29 }
0x1232   :  { %1510 = vrot.lane.b32.xlu1 %v1508_v49, %s2560_s3 }
0x12a4   :  { %v1511_v11 = vpop.permute.xlu1 %1510 }
0x12a5   :  { %v3389_v3 = vadd.f32 %v1511_v11, %v1503_v10 }
0x12a7   :  { %2396 = vtanh.f32 %v3389_v3 }
0x12a8   :  { %2398 = vpow2.f32 %v2247_v15 }
0x12ad   :  { %v2397_v38 = vpop.eup %2396 }
0x12ae   :  { %1516 = vrot.lane.b32.xlu2 %v2397_v38, %s2560_s3  ;;  %v2399_v19 = vpop.eup %2398 }
0x12af   :  { %v1471_v1 = vadd.f32 1.0, %v2399_v19 }
0x12b1   :  { %2400 = vrcp.f32 %v1471_v1  ;;  %v1498_v57 = vand.u32 2147483648, %v1471_v1  ;;  %vm1492_vm6 = vweird.f32 %v1471_v1  ;;  %v1496_v58 = vand.u32 2147483647, %v1471_v1 }
0x12b3   :  { %v1499_v29 = vor.u32 1.1754944e-38, %v1498_v57  ;;  %vm1497_vm8 = vcmp.eq.f32.partialorder %v1496_v58, 8.507059e+37 }
0x12b7   :  { %v2401_v12 = vpop.eup %2400 }
0x12b8   :  { %v1488_v5 = vmul.f32 %v2401_v12, %v1471_v1  ;;  %vm1493_vm5 = vweird.f32 %v2401_v12 }
0x12b9   :  { %vm1494_vm7 = vmor %vm1492_vm6, %vm1493_vm5 }
0x12ba   :  { %v1489_v47 = vsub.f32 1.0, %v1488_v5 }
0x12bc   :  { %v1490_v41 = vmul.f32 %v2401_v12, %v1489_v47 }
0x12be   :  { %v1491_v53 = vadd.f32 %v2401_v12, %v1490_v41 }
0x12c0   :  { %v1495_v56 = vsel %vm1494_vm7, %v2401_v12, %v1491_v53 }
0x12c1   :  { %v1500_v49 = vsel %vm1497_vm8, %v1499_v29, %v1495_v56 }
0x1308   :  { %v1517_v10 = vpop.permute.xlu2 %1516 }
0x1309   :  { %v1519_v60 = vmul.f32 %v1517_v10, %v1500_v49 }
0x130b   :  { %2248 = vmatmul.msk.f32.vlgmr.msra.gmra.mxu2 %vm286_vm11, %v1519_v60  ;;  %2249 = vmatmul.msk.f32.vlgmr.msra.gmra.mxu3 %vm286_vm11, %v1519_v60 }
0x130c   :  { %1842 = vmatpush.msra.mxu2 %v3121_v40  ;;  %1862 = vmatpush.msra.mxu3 %v3123_v0 }
0x130e   :  { %1843 = vmatpush.msra.mxu2 %v3131_v22  ;;  %1863 = vmatpush.msra.mxu3 %v3133_v31 }
0x1310   :  { %1844 = vmatpush.msra.mxu2 %v3135_v17  ;;  %1864 = vmatpush.msra.mxu3 %v3139_v54 }
0x1312   :  { %1845 = vmatpush.msra.mxu2 %v3141_v27  ;;  %1865 = vmatpush.msra.mxu3 %v3143_v2 }
0x1314   :  { %1846 = vmatpush.msra.mxu2 %v3149_v32  ;;  %1866 = vmatpush.msra.mxu3 %v3151_v4 }
0x1316   :  { %1847 = vmatpush.msra.mxu2 %v3163_v16  ;;  %1867 = vmatpush.msra.mxu3 %v3165_v42 }
0x1318   :  { %1848 = vmatpush.msra.mxu2 %v3167_v28  ;;  %1868 = vmatpush.msra.mxu3 %v3171_v6 }
0x131a   :  { %1849 = vmatpush.msra.mxu2 %v3173_v9  ;;  %1869 = vmatpush.msra.mxu3 %v3175_v34 }
0x138e   :  { %v1562_v11 = vpop.f32.mrf.mxu3  ;;  %v1542_v19 = vpop.f32.mrf.mxu2 }
0x138f   :  { %v1566_v38 = vadd.f32 %v1562_v11, %v1278_v46  ;;  %v1565_v1 = vadd.f32 %v1542_v19, %v1277_v39 }
0x1391   :  { %2402 = vtanh.f32 %v1566_v38  ;;  %v2250_v12 = vmul.f32 -1.442695, %v1565_v1 }
0x1393   :  { %2404 = vpow2.f32 %v2250_v12 }
0x1397   :  { %v2403_v15 = vpop.eup %2402 }
0x1398   :  { %1608 = vrot.lane.b32.xlu0 %v2403_v15, %s2560_s3 }
0x1399   :  { %v2405_v5 = vpop.eup %2404 }
0x139a   :  { %v1573_v47 = vadd.f32 1.0, %v2405_v5  ;;  %v2251_v5 = vmul.f32 -1.442695, %v1566_v38 }
0x139c   :  { %2406 = vrcp.f32 %v1573_v47  ;;  %v1586_v56 = vand.u32 2147483648, %v1573_v47  ;;  %vm1580_vm10 = vweird.f32 %v1573_v47  ;;  %v1584_v29 = vand.u32 2147483647, %v1573_v47 }
0x139e   :  { %v1587_v10 = vor.u32 1.1754944e-38, %v1586_v56  ;;  %vm1585_vm13 = vcmp.eq.f32.partialorder %v1584_v29, 8.507059e+37 }
0x13a2   :  { %v2407_v41 = vpop.eup %2406 }
0x13a3   :  { %v1576_v53 = vmul.f32 %v2407_v41, %v1573_v47  ;;  %vm1581_vm9 = vweird.f32 %v2407_v41 }
0x13a4   :  { %vm1582_vm12 = vmor %vm1580_vm10, %vm1581_vm9 }
0x13a5   :  { %v1577_v57 = vsub.f32 1.0, %v1576_v53 }
0x13a7   :  { %v1578_v46 = vmul.f32 %v2407_v41, %v1577_v57 }
0x13a9   :  { %v1579_v58 = vadd.f32 %v2407_v41, %v1578_v46 }
0x13ab   :  { %v1583_v49 = vsel %vm1582_vm12, %v2407_v41, %v1579_v58 }
0x13ac   :  { %v1588_v39 = vsel %vm1585_vm13, %v1587_v10, %v1583_v49 }
0x13ad   :  { %v1606_v15 = vmul.f32 %v1588_v39, %v3389_v3 }
0x140a   :  { %v1609_v60 = vpop.permute.xlu0 %1608 }
0x140b   :  { %v1611_v11 = vmul.f32 %v1609_v60, %v1588_v39 }
0x140d   :  { %1613 = vrot.lane.b32.xlu1 %v1611_v11, %s2560_s3 }
0x147f   :  { %v1614_v19 = vpop.permute.xlu1 %1613 }
0x1480   :  { %v3424_v1 = vadd.f32 %v1614_v19, %v1606_v15 }
0x1482   :  { %2408 = vtanh.f32 %v3424_v1 }
0x1483   :  { %2410 = vpow2.f32 %v2251_v5 }
0x1488   :  { %v2409_v12 = vpop.eup %2408 }
0x1489   :  { %1619 = vrot.lane.b32.xlu2 %v2409_v12, %s2560_s3  ;;  %v2411_v47 = vpop.eup %2410 }
0x148a   :  { %v1574_v41 = vadd.f32 1.0, %v2411_v47 }
0x148c   :  { %2412 = vrcp.f32 %v1574_v41  ;;  %v1601_v3 = vand.u32 2147483648, %v1574_v41  ;;  %vm1595_vm15 = vweird.f32 %v1574_v41  ;;  %v1599_v29 = vand.u32 2147483647, %v1574_v41 }
0x148e   :  { %v1602_v10 = vor.u32 1.1754944e-38, %v1601_v3  ;;  %vm1600_vm3 = vcmp.eq.f32.partialorder %v1599_v29, 8.507059e+37 }
0x1492   :  { %v2413_v53 = vpop.eup %2412 }
0x1493   :  { %v1591_v57 = vmul.f32 %v2413_v53, %v1574_v41  ;;  %vm1596_vm14 = vweird.f32 %v2413_v53 }
0x1494   :  { %vm1597_vm0 = vmor %vm1595_vm15, %vm1596_vm14 }
0x1495   :  { %v1592_v46 = vsub.f32 1.0, %v1591_v57 }
0x1497   :  { %v1593_v58 = vmul.f32 %v2413_v53, %v1592_v46 }
0x1499   :  { %v1594_v56 = vadd.f32 %v2413_v53, %v1593_v58 }
0x149b   :  { %v1598_v49 = vsel %vm1597_vm0, %v2413_v53, %v1594_v56 }
0x149c   :  { %v1603_v60 = vsel %vm1600_vm3, %v1602_v10, %v1598_v49 }
0x14e3   :  { %v1620_v39 = vpop.permute.xlu2 %1619 }
0x14e4   :  { %v1622_v38 = vmul.f32 %v1620_v39, %v1603_v60 }
0x14e6   :  { %2252 = vmatmul.msk.f32.vlgmr.msrb.gmra.mxu2 %vm286_vm11, %v1622_v38  ;;  %2253 = vmatmul.msk.f32.vlgmr.msrb.gmra.mxu3 %vm286_vm11, %v1622_v38 }
0x14e7   :  { %2048 = vmatpush.msrb.mxu2 %v3121_v40  ;;  %2068 = vmatpush.msrb.mxu3 %v3123_v0 }
0x14e9   :  { %2049 = vmatpush.msrb.mxu2 %v3131_v22  ;;  %2069 = vmatpush.msrb.mxu3 %v3133_v31 }
0x14eb   :  { %2050 = vmatpush.msrb.mxu2 %v3135_v17  ;;  %2070 = vmatpush.msrb.mxu3 %v3139_v54 }
0x14ed   :  { %2051 = vmatpush.msrb.mxu2 %v3141_v27  ;;  %2071 = vmatpush.msrb.mxu3 %v3143_v2 }
0x14ef   :  { %2052 = vmatpush.msrb.mxu2 %v3149_v32  ;;  %2072 = vmatpush.msrb.mxu3 %v3151_v4 }
0x14f1   :  { %2053 = vmatpush.msrb.mxu2 %v3163_v16  ;;  %2073 = vmatpush.msrb.mxu3 %v3165_v42 }
0x14f3   :  { %2054 = vmatpush.msrb.mxu2 %v3167_v28  ;;  %2074 = vmatpush.msrb.mxu3 %v3171_v6 }
0x14f5   :  { %2055 = vmatpush.msrb.mxu2 %v3173_v9  ;;  %2075 = vmatpush.msrb.mxu3 %v3175_v34 }
0x1569   :  { %v1665_v40 = vpop.f32.mrf.mxu3  ;;  %v1645_v31 = vpop.f32.mrf.mxu2 }
0x156a   :  { %v1669_v0 = vadd.f32 %v1665_v40, %v1282_v61  ;;  %v1668_v17 = vadd.f32 %v1645_v31, %v1281_v43 }
0x156c   :  { %2414 = vtanh.f32 %v1669_v0  ;;  %v2254_v54 = vmul.f32 -1.442695, %v1668_v17  ;;  %v2255_v41 = vmul.f32 -1.442695, %v1669_v0 }
0x156e   :  { %2416 = vpow2.f32 %v2254_v54 }
0x1572   :  { %v2415_v22 = vpop.eup %2414 }
0x1573   :  { %1711 = vrot.lane.b32.xlu0 %v2415_v22, %s2560_s3 }
0x1574   :  { %v2417_v27 = vpop.eup %2416 }
0x1575   :  { %v1676_v2 = vadd.f32 1.0, %v2417_v27 }
0x1577   :  { %2418 = vrcp.f32 %v1676_v2  ;;  %v1689_v6 = vand.u32 2147483648, %v1676_v2  ;;  %vm1683_vm6 = vweird.f32 %v1676_v2  ;;  %v1687_v9 = vand.u32 2147483647, %v1676_v2 }
0x1579   :  { %v1690_v61 = vor.u32 1.1754944e-38, %v1689_v6  ;;  %vm1688_vm8 = vcmp.eq.f32.partialorder %v1687_v9, 8.507059e+37 }
0x157d   :  { %v2419_v32 = vpop.eup %2418 }
0x157e   :  { %v1679_v4 = vmul.f32 %v2419_v32, %v1676_v2  ;;  %vm1684_vm5 = vweird.f32 %v2419_v32 }
0x157f   :  { %vm1685_vm7 = vmor %vm1683_vm6, %vm1684_vm5 }
0x1580   :  { %v1680_v16 = vsub.f32 1.0, %v1679_v4 }
0x1582   :  { %v1681_v42 = vmul.f32 %v2419_v32, %v1680_v16 }
0x1584   :  { %v1682_v28 = vadd.f32 %v2419_v32, %v1681_v42 }
0x1586   :  { %v1686_v34 = vsel %vm1685_vm7, %v2419_v32, %v1682_v28 }
0x1587   :  { %v1691_v43 = vsel %vm1688_vm8, %v1690_v61, %v1686_v34 }
0x1588   :  { %v1709_v19 = vmul.f32 %v1691_v43, %v3424_v1 }
0x15e5   :  { %v1712_v11 = vpop.permute.xlu0 %1711 }
0x15e6   :  { %v1714_v15 = vmul.f32 %v1712_v11, %v1691_v43 }
0x15e8   :  { %1716 = vrot.lane.b32.xlu1 %v1714_v15, %s2560_s3 }
0x165a   :  { %v1717_v12 = vpop.permute.xlu1 %1716 }
0x165b   :  { %v1719_v5 = vadd.f32 %v1717_v12, %v1709_v19 }
0x165d   :  { %2420 = vtanh.f32 %v1719_v5 }
0x165e   :  { %2422 = vpow2.f32 %v2255_v41 }
0x1663   :  { %v2421_v47 = vpop.eup %2420 }
0x1664   :  { %1722 = vrot.lane.b32.xlu2 %v2421_v47, %s2560_s3  ;;  %v2423_v53 = vpop.eup %2422 }
0x1665   :  { %v1677_v57 = vadd.f32 1.0, %v2423_v53 }
0x1667   :  { %2424 = vrcp.f32 %v1677_v57  ;;  %v1704_v49 = vand.u32 2147483648, %v1677_v57  ;;  %vm1698_vm10 = vweird.f32 %v1677_v57  ;;  %v1702_v1 = vand.u32 2147483647, %v1677_v57 }
0x1669   :  { %v1705_v60 = vor.u32 1.1754944e-38, %v1704_v49  ;;  %vm1703_vm13 = vcmp.eq.f32.partialorder %v1702_v1, 8.507059e+37 }
0x166d   :  { %v2425_v46 = vpop.eup %2424 }
0x166e   :  { %v1694_v58 = vmul.f32 %v2425_v46, %v1677_v57  ;;  %vm1699_vm9 = vweird.f32 %v2425_v46 }
0x166f   :  { %vm1700_vm12 = vmor %vm1698_vm10, %vm1699_vm9 }
0x1670   :  { %v1695_v56 = vsub.f32 1.0, %v1694_v58 }
0x1672   :  { %v1696_v3 = vmul.f32 %v2425_v46, %v1695_v56 }
0x1674   :  { %v1697_v29 = vadd.f32 %v2425_v46, %v1696_v3 }
0x1676   :  { %v1701_v10 = vsel %vm1700_vm12, %v2425_v46, %v1697_v29 }
0x1677   :  { %v1706_v39 = vsel %vm1703_vm13, %v1705_v60, %v1701_v10 }
0x16be   :  { %v1723_v38 = vpop.permute.xlu2 %1722 }
0x16bf   :  { %v1725_v40 = vmul.f32 %v1723_v38, %v1706_v39 }
0x16c1   :  { %2256 = vmatmul.msk.f32.vlgmr.msra.gmra.mxu0 %vm286_vm11, %v1725_v40  ;;  %2257 = vmatmul.msk.f32.vlgmr.msra.gmra.mxu1 %vm286_vm11, %v1725_v40 }
0x173e   :  { %v1768_v0 = vpop.f32.mrf.mxu1  ;;  %v1748_v17 = vpop.f32.mrf.mxu0 }
0x173f   :  { %v1772_v22 = vadd.f32 %v1768_v0, %v1286_v26  ;;  %v1771_v54 = vadd.f32 %v1748_v17, %v1285_v45 }
0x1741   :  { %2426 = vtanh.f32 %v1772_v22  ;;  %v2258_v27 = vmul.f32 -1.442695, %v1771_v54  ;;  %v2259_v15 = vmul.f32 -1.442695, %v1772_v22 }
0x1743   :  { %2428 = vpow2.f32 %v2258_v27 }
0x1747   :  { %v2427_v31 = vpop.eup %2426 }
0x1748   :  { %1814 = vrot.lane.b32.xlu0 %v2427_v31, %s2560_s3 }
0x1749   :  { %v2429_v2 = vpop.eup %2428 }
0x174a   :  { %v1779_v32 = vadd.f32 1.0, %v2429_v2 }
0x174c   :  { %2430 = vrcp.f32 %v1779_v32  ;;  %v1792_v42 = vand.u32 2147483648, %v1779_v32  ;;  %vm1786_vm15 = vweird.f32 %v1779_v32  ;;  %v1790_v28 = vand.u32 2147483647, %v1779_v32 }
0x174e   :  { %v1793_v9 = vor.u32 1.1754944e-38, %v1792_v42  ;;  %vm1791_vm3 = vcmp.eq.f32.partialorder %v1790_v28, 8.507059e+37 }
0x1752   :  { %v2431_v4 = vpop.eup %2430 }
0x1753   :  { %v1782_v16 = vmul.f32 %v2431_v4, %v1779_v32  ;;  %vm1787_vm14 = vweird.f32 %v2431_v4 }
0x1754   :  { %vm1788_vm0 = vmor %vm1786_vm15, %vm1787_vm14 }
0x1755   :  { %v1783_v63 = vsub.f32 1.0, %v1782_v16 }
0x1757   :  { %v1784_v25 = vmul.f32 %v2431_v4, %v1783_v63 }
0x1759   :  { %v1785_v26 = vadd.f32 %v2431_v4, %v1784_v25 }
0x175b   :  { %v1789_v6 = vsel %vm1788_vm0, %v2431_v4, %v1785_v26 }
0x175c   :  { %v1794_v24 = vsel %vm1791_vm3, %v1793_v9, %v1789_v6 }
0x175d   :  { %v1812_v34 = vmul.f32 %v1794_v24, %v1719_v5 }
0x17ba   :  { %v1815_v59 = vpop.permute.xlu0 %1814 }
0x17bb   :  { %v1817_v45 = vmul.f32 %v1815_v59, %v1794_v24 }
0x17bd   :  { %1819 = vrot.lane.b32.xlu1 %v1817_v45, %s2560_s3 }
0x182f   :  { %v1820_v61 = vpop.permute.xlu1 %1819 }
0x1830   :  { %v1822_v11 = vadd.f32 %v1820_v61, %v1812_v34 }
0x1832   :  { %2432 = vtanh.f32 %v1822_v11 }
0x1833   :  { %2434 = vpow2.f32 %v2259_v15 }
0x1838   :  { %v2433_v43 = vpop.eup %2432 }
0x1839   :  { %1825 = vrot.lane.b32.xlu2 %v2433_v43, %s2560_s3  ;;  %v2435_v19 = vpop.eup %2434 }
0x183a   :  { %v1780_v12 = vadd.f32 1.0, %v2435_v19 }
0x183c   :  { %2436 = vrcp.f32 %v1780_v12  ;;  %v1807_v58 = vand.u32 2147483648, %v1780_v12  ;;  %vm1801_vm6 = vweird.f32 %v1780_v12  ;;  %v1805_v5 = vand.u32 2147483647, %v1780_v12 }
0x183e   :  { %v1808_v3 = vor.u32 1.1754944e-38, %v1807_v58  ;;  %vm1806_vm8 = vcmp.eq.f32.partialorder %v1805_v5, 8.507059e+37 }
0x1842   :  { %v2437_v47 = vpop.eup %2436 }
0x1843   :  { %v1797_v41 = vmul.f32 %v2437_v47, %v1780_v12  ;;  %vm1802_vm5 = vweird.f32 %v2437_v47 }
0x1844   :  { %vm1803_vm7 = vmor %vm1801_vm6, %vm1802_vm5 }
0x1845   :  { %v1798_v53 = vsub.f32 1.0, %v1797_v41 }
0x1847   :  { %v1799_v57 = vmul.f32 %v2437_v47, %v1798_v53 }
0x1849   :  { %v1800_v46 = vadd.f32 %v2437_v47, %v1799_v57 }
0x184b   :  { %v1804_v56 = vsel %vm1803_vm7, %v2437_v47, %v1800_v46 }
0x184c   :  { %v1809_v29 = vsel %vm1806_vm8, %v1808_v3, %v1804_v56 }
0x1893   :  { %v1826_v49 = vpop.permute.xlu2 %1825 }
0x1894   :  { %v1828_v1 = vmul.f32 %v1826_v49, %v1809_v29 }
0x1896   :  { %2260 = vmatmul.msk.f32.vlgmr.msra.gmra.mxu2 %vm286_vm11, %v1828_v1  ;;  %2261 = vmatmul.msk.f32.vlgmr.msra.gmra.mxu3 %vm286_vm11, %v1828_v1 }
0x1919   :  { %v1871_v10 = vpop.f32.mrf.mxu3  ;;  %v1851_v38 = vpop.f32.mrf.mxu2 }
0x191a   :  { %v1875_v60 = vadd.f32 %v1871_v10, %v1290_v51  ;;  %v1874_v40 = vadd.f32 %v1851_v38, %v1289_v50 }
0x191c   :  { %2438 = vtanh.f32 %v1875_v60  ;;  %v2262_v0 = vmul.f32 -1.442695, %v1874_v40  ;;  %v2263_v42 = vmul.f32 -1.442695, %v1875_v60 }
0x191e   :  { %2440 = vpow2.f32 %v2262_v0 }
0x1922   :  { %v2439_v39 = vpop.eup %2438 }
0x1923   :  { %1917 = vrot.lane.b32.xlu0 %v2439_v39, %s2560_s3 }
0x1924   :  { %v2441_v22 = vpop.eup %2440 }
0x1925   :  { %v1882_v31 = vadd.f32 1.0, %v2441_v22 }
0x1927   :  { %2442 = vrcp.f32 %v1882_v31  ;;  %v1895_v27 = vand.u32 2147483648, %v1882_v31  ;;  %vm1889_vm10 = vweird.f32 %v1882_v31  ;;  %v1893_v2 = vand.u32 2147483647, %v1882_v31 }
0x1929   :  { %v1896_v4 = vor.u32 1.1754944e-38, %v1895_v27  ;;  %vm1894_vm13 = vcmp.eq.f32.partialorder %v1893_v2, 8.507059e+37 }
0x192d   :  { %v2443_v17 = vpop.eup %2442 }
0x192e   :  { %v1885_v54 = vmul.f32 %v2443_v17, %v1882_v31  ;;  %vm1890_vm9 = vweird.f32 %v2443_v17 }
0x192f   :  { %vm1891_vm12 = vmor %vm1889_vm10, %vm1890_vm9 }
0x1930   :  { %v1886_v23 = vsub.f32 1.0, %v1885_v54 }
0x1932   :  { %v1887_v48 = vmul.f32 %v2443_v17, %v1886_v23 }
0x1934   :  { %v1888_v51 = vadd.f32 %v2443_v17, %v1887_v48 }
0x1936   :  { %v1892_v32 = vsel %vm1891_vm12, %v2443_v17, %v1888_v51 }
0x1937   :  { %v1897_v55 = vsel %vm1894_vm13, %v1896_v4, %v1892_v32 }
0x1938   :  { %v1915_v16 = vmul.f32 %v1897_v55, %v1822_v11 }
0x1995   :  { %v1918_v35 = vpop.permute.xlu0 %1917 }
0x1996   :  { %v1920_v50 = vmul.f32 %v1918_v35, %v1897_v55 }
0x1998   :  { %1922 = vrot.lane.b32.xlu1 %v1920_v50, %s2560_s3 }
0x1a0a   :  { %v1923_v63 = vpop.permute.xlu1 %1922 }
0x1a0b   :  { %v1925_v25 = vadd.f32 %v1923_v63, %v1915_v16 }
0x1a0d   :  { %2444 = vtanh.f32 %v1925_v25 }
0x1a0e   :  { %2446 = vpow2.f32 %v2263_v42 }
0x1a13   :  { %v2445_v26 = vpop.eup %2444 }
0x1a14   :  { %1928 = vrot.lane.b32.xlu2 %v2445_v26, %s2560_s3  ;;  %v2447_v28 = vpop.eup %2446  ;;  %v3549_v26 = vsel %vm2807_vm1, %v3330_v18, %v3326_v14 }
0x1a15   :  { %v1883_v6 = vadd.f32 1.0, %v2447_v28 }
0x1a17   :  { %2448 = vrcp.f32 %v1883_v6  ;;  %v1910_v61 = vand.u32 2147483648, %v1883_v6  ;;  %vm1904_vm15 = vweird.f32 %v1883_v6  ;;  %v1908_v11 = vand.u32 2147483647, %v1883_v6 }
0x1a19   :  { %v1911_v15 = vor.u32 1.1754944e-38, %v1910_v61  ;;  %vm1909_vm3 = vcmp.eq.f32.partialorder %v1908_v11, 8.507059e+37 }
0x1a1d   :  { %v2449_v9 = vpop.eup %2448 }
0x1a1e   :  { %v1900_v59 = vmul.f32 %v2449_v9, %v1883_v6  ;;  %vm1905_vm14 = vweird.f32 %v2449_v9 }
0x1a1f   :  { %vm1906_vm0 = vmor %vm1904_vm15, %vm1905_vm14 }
0x1a20   :  { %v1901_v24 = vsub.f32 1.0, %v1900_v59 }
0x1a22   :  { %v1902_v45 = vmul.f32 %v2449_v9, %v1901_v24 }
0x1a24   :  { %v1903_v34 = vadd.f32 %v2449_v9, %v1902_v45 }
0x1a26   :  { %v1907_v43 = vsel %vm1906_vm0, %v2449_v9, %v1903_v34  ;;  %v3550_v9 = vsel %vm2864_vm2, %v3328_v36, %v3324_v13 }
0x1a27   :  { %v1912_v19 = vsel %vm1909_vm3, %v1911_v15, %v1907_v43 }
0x1a6e   :  { %v1929_v12 = vpop.permute.xlu2 %1928 }
0x1a6f   :  { %v1931_v47 = vmul.f32 %v1929_v12, %v1912_v19 }
0x1a71   :  { %2264 = vmatmul.msk.f32.vlgmr.msrb.gmra.mxu0 %vm286_vm11, %v1931_v47  ;;  %2265 = vmatmul.msk.f32.vlgmr.msrb.gmra.mxu1 %vm286_vm11, %v1931_v47 }
0x1aee   :  { %v1974_v41 = vpop.f32.mrf.mxu1  ;;  %v1954_v46 = vpop.f32.mrf.mxu0 }
0x1aef   :  { %v1978_v53 = vadd.f32 %v1974_v41, %v1294_v33  ;;  %v1977_v58 = vadd.f32 %v1954_v46, %v1293_v30 }
0x1af1   :  { %2450 = vtanh.f32 %v1978_v53  ;;  %v2266_v5 = vmul.f32 -1.442695, %v1977_v58  ;;  %v2267_v31 = vmul.f32 -1.442695, %v1978_v53 }
0x1af3   :  { %2452 = vpow2.f32 %v2266_v5 }
0x1af7   :  { %v2451_v57 = vpop.eup %2450 }
0x1af8   :  { %2020 = vrot.lane.b32.xlu0 %v2451_v57, %s2560_s3 }
0x1af9   :  { %v2453_v56 = vpop.eup %2452 }
0x1afa   :  { %v1985_v3 = vadd.f32 1.0, %v2453_v56 }
0x1afc   :  { %2454 = vrcp.f32 %v1985_v3  ;;  %v1998_v1 = vand.u32 2147483648, %v1985_v3  ;;  %vm1992_vm6 = vweird.f32 %v1985_v3  ;;  %v1996_v10 = vand.u32 2147483647, %v1985_v3 }
0x1afe   :  { %v1999_v39 = vor.u32 1.1754944e-38, %v1998_v1  ;;  %vm1997_vm8 = vcmp.eq.f32.partialorder %v1996_v10, 8.507059e+37 }
0x1b02   :  { %v2455_v29 = vpop.eup %2454 }
0x1b03   :  { %v1988_v49 = vmul.f32 %v2455_v29, %v1985_v3  ;;  %vm1993_vm5 = vweird.f32 %v2455_v29 }
0x1b04   :  { %vm1994_vm7 = vmor %vm1992_vm6, %vm1993_vm5 }
0x1b05   :  { %v1989_v21 = vsub.f32 1.0, %v1988_v49 }
0x1b07   :  { %v1990_v7 = vmul.f32 %v2455_v29, %v1989_v21 }
0x1b09   :  { %v1991_v33 = vadd.f32 %v2455_v29, %v1990_v7 }
0x1b0b   :  { %v1995_v60 = vsel %vm1994_vm7, %v2455_v29, %v1991_v33 }
0x1b0c   :  { %v2000_v62 = vsel %vm1997_vm8, %v1999_v39, %v1995_v60  ;;  %vm2172_vm8 = vcmask 7168  }
0x1b0d   :  { %v2018_v38 = vmul.f32 %v2000_v62, %v1925_v25 }
0x1b6a   :  { %v2021_v20 = vpop.permute.xlu0 %2020 }
0x1b6b   :  { %v2023_v30 = vmul.f32 %v2021_v20, %v2000_v62  ;;  %v2280_v62 = vld [vmem:[%s3537_s7] ss:$0 sm:$0xff] }
0x1b6d   :  { %2025 = vrot.lane.b32.xlu1 %v2023_v30, %s2560_s3 }
0x1bdf   :  { %v2026_v40 = vpop.permute.xlu1 %2025 }
0x1be0   :  { %v2028_v0 = vadd.f32 %v2026_v40, %v2018_v38 }
0x1be2   :  { %2456 = vtanh.f32 %v2028_v0 }
0x1be3   :  { %2458 = vpow2.f32 %v2267_v31 }
0x1be8   :  { %v2457_v22 = vpop.eup %2456 }
0x1be9   :  { %2031 = vrot.lane.b32.xlu2 %v2457_v22, %s2560_s3  ;;  %v2459_v17 = vpop.eup %2458  ;;  %v2281_v22 = vld [vmem:[#allocation4] ss:$0 sm:$0xff] }
0x1bea   :  { %v1986_v54 = vadd.f32 1.0, %v2459_v17 }
0x1bec   :  { %2460 = vrcp.f32 %v1986_v54  ;;  %v2013_v32 = vand.u32 2147483648, %v1986_v54  ;;  %vm2007_vm10 = vweird.f32 %v1986_v54  ;;  %v2011_v4 = vand.u32 2147483647, %v1986_v54 }
0x1bee   :  { %v2014_v55 = vor.u32 1.1754944e-38, %v2013_v32  ;;  %vm2012_vm13 = vcmp.eq.f32.partialorder %v2011_v4, 8.507059e+37 }
0x1bf2   :  { %v2461_v23 = vpop.eup %2460 }
0x1bf3   :  { %v2003_v48 = vmul.f32 %v2461_v23, %v1986_v54  ;;  %vm2008_vm9 = vweird.f32 %v2461_v23 }
0x1bf4   :  { %vm2009_vm12 = vmor %vm2007_vm10, %vm2008_vm9 }
0x1bf5   :  { %v2004_v51 = vsub.f32 1.0, %v2003_v48 }
0x1bf7   :  { %v2005_v27 = vmul.f32 %v2461_v23, %v2004_v51 }
0x1bf9   :  { %v2006_v2 = vadd.f32 %v2461_v23, %v2005_v27 }
0x1bfb   :  { %v2010_v35 = vsel %vm2009_vm12, %v2461_v23, %v2006_v2 }
0x1bfc   :  { %v2015_v50 = vsel %vm2012_vm13, %v2014_v55, %v2010_v35 }
0x1c43   :  { %v2032_v16 = vpop.permute.xlu2 %2031 }
0x1c44   :  { %v2034_v63 = vmul.f32 %v2032_v16, %v2015_v50 }
0x1c46   :  { %2268 = vmatmul.msk.f32.vlgmr.msrb.gmra.mxu2 %vm286_vm11, %v2034_v63  ;;  %2269 = vmatmul.msk.f32.vlgmr.msrb.gmra.mxu3 %vm286_vm11, %v2034_v63 }
0x1cc9   :  { %v2077_v25 = vpop.f32.mrf.mxu3  ;;  %v2057_v6 = vpop.f32.mrf.mxu2 }
0x1cca   :  { %v2081_v42 = vadd.f32 %v2077_v25, %v3549_v26  ;;  %v2080_v59 = vadd.f32 %v2057_v6, %v3550_v9 }
0x1ccc   :  { %2462 = vtanh.f32 %v2081_v42  ;;  %v2270_v24 = vmul.f32 -1.442695, %v2080_v59  ;;  %v2271_v46 = vmul.f32 -1.442695, %v2081_v42 }
0x1cce   :  { %2464 = vpow2.f32 %v2270_v24 }
0x1cd2   :  { %v2463_v28 = vpop.eup %2462 }
0x1cd3   :  { %2123 = vrot.lane.b32.xlu0 %v2463_v28, %s2560_s3 }
0x1cd4   :  { %v2465_v45 = vpop.eup %2464 }
0x1cd5   :  { %v2088_v34 = vadd.f32 1.0, %v2465_v45 }
0x1cd7   :  { %2466 = vrcp.f32 %v2088_v34  ;;  %v2101_v43 = vand.u32 2147483648, %v2088_v34  ;;  %vm2095_vm14 = vweird.f32 %v2088_v34  ;;  %v2099_v15 = vand.u32 2147483647, %v2088_v34 }
0x1cd9   :  { %v2102_v19 = vor.u32 1.1754944e-38, %v2101_v43  ;;  %vm2100_vm0 = vcmp.eq.f32.partialorder %v2099_v15, 8.507059e+37 }
0x1cdd   :  { %v2467_v52 = vpop.eup %2466 }
0x1cde   :  { %v2091_v61 = vmul.f32 %v2467_v52, %v2088_v34  ;;  %vm2096_vm1 = vweird.f32 %v2467_v52 }
0x1cdf   :  { %vm2097_vm15 = vmor %vm2095_vm14, %vm2096_vm1 }
0x1ce0   :  { %v2092_v14 = vsub.f32 1.0, %v2091_v61 }
0x1ce2   :  { %v2093_v18 = vmul.f32 %v2467_v52, %v2092_v14 }
0x1ce4   :  { %v2094_v11 = vadd.f32 %v2467_v52, %v2093_v18 }
0x1ce6   :  { %v2098_v37 = vsel %vm2097_vm15, %v2467_v52, %v2094_v11 }
0x1ce7   :  { %v2103_v36 = vsel %vm2100_vm0, %v2102_v19, %v2098_v37 }
0x1ce8   :  { %v2121_v47 = vmul.f32 %v2103_v36, %v2028_v0 }
0x1d45   :  { %v2124_v13 = vpop.permute.xlu0 %2123 }
0x1d46   :  { %v2126_v12 = vmul.f32 %v2124_v13, %v2103_v36 }
0x1d48   :  { %2128 = vrot.lane.b32.xlu1 %v2126_v12, %s2560_s3 }
0x1dba   :  { %v2129_v41 = vpop.permute.xlu1 %2128 }
0x1dbb   :  { %v2131_v53 = vadd.f32 %v2129_v41, %v2121_v47 }
0x1dbd   :  { %2468 = vtanh.f32 %v2131_v53 }
0x1dbe   :  { %2470 = vpow2.f32 %v2271_v46 }
0x1dc3   :  { %v2469_v57 = vpop.eup %2468 }
0x1dc4   :  { %2134 = vrot.lane.b32.xlu2 %v2469_v57, %s2560_s3  ;;  %v2471_v58 = vpop.eup %2470 }
0x1dc5   :  { %v2089_v5 = vadd.f32 1.0, %v2471_v58 }
0x1dc7   :  { %2472 = vrcp.f32 %v2089_v5  ;;  %v2116_v7 = vand.u32 2147483648, %v2089_v5  ;;  %vm2110_vm3 = vweird.f32 %v2089_v5  ;;  %v2114_v33 = vand.u32 2147483647, %v2089_v5 }
0x1dc9   :  { %v2117_v10 = vor.u32 1.1754944e-38, %v2116_v7  ;;  %vm2115_vm6 = vcmp.eq.f32.partialorder %v2114_v33, 8.507059e+37 }
0x1dcd   :  { %v2473_v56 = vpop.eup %2472 }
0x1dce   :  { %v2106_v3 = vmul.f32 %v2473_v56, %v2089_v5  ;;  %vm2111_vm2 = vweird.f32 %v2473_v56 }
0x1dcf   :  { %vm2112_vm5 = vmor %vm2110_vm3, %vm2111_vm2 }
0x1dd0   :  { %v2107_v29 = vsub.f32 1.0, %v2106_v3 }
0x1dd2   :  { %v2108_v49 = vmul.f32 %v2473_v56, %v2107_v29 }
0x1dd4   :  { %v2109_v21 = vadd.f32 %v2473_v56, %v2108_v49 }
0x1dd6   :  { %v2113_v1 = vsel %vm2112_vm5, %v2473_v56, %v2109_v21 }
0x1dd7   :  { %v2118_v60 = vsel %vm2115_vm6, %v2117_v10, %v2113_v1 }
0x1e1e   :  { %v2135_v39 = vpop.permute.xlu2 %2134 }
0x1e1f   :  { %v2137_v20 = vmul.f32 %v2135_v39, %v2118_v60 }
0x1e21   :  { %v2138_v30 = vsel %vm110_vm4, %v2137_v20, %v3354_v8 }
0x1e22   :  { %v2139_v38 = vmax.f32 %v2138_v30, 0.0 }
0x1e24   :  { %v2144_v40 = vmul.f32 %v2280_v62, %v2139_v38 }
0x1e26   :  { %v2145_v0 = vsel %vm286_vm11, %v2144_v40, 0.0 }
0x1e27   :  { %2146 = vadd.xlane.f32.xlu0 %v2145_v0 }
0x1e9a   :  { %v2147_v31 = vpop.xlane.xlu0 %2146 }
0x1e9b   :  { %v2152_v17 = vadd.f32 %v2281_v22, %v2147_v31 }
0x1e9d   :  { %v2272_v54 = vmul.f32 -1.442695, %v2152_v17 }
0x1e9f   :  { %2474 = vpow2.f32 %v2272_v54 }
0x1ea5   :  { %v2475_v23 = vpop.eup %2474 }
0x1ea6   :  { %v2156_v48 = vadd.f32 1.0, %v2475_v23 }
0x1ea8   :  { %2476 = vrcp.f32 %v2156_v48  ;;  %v2168_v32 = vand.u32 2147483648, %v2156_v48  ;;  %v2166_v44 = vand.u32 2147483647, %v2156_v48  ;;  %vm2162_vm4 = vweird.f32 %v2156_v48 }
0x1eaa   :  { %v2169_v35 = vor.u32 1.1754944e-38, %v2168_v32  ;;  %vm2167_vm9 = vcmp.eq.f32.partialorder %v2166_v44, 8.507059e+37 }
0x1eae   :  { %v2477_v51 = vpop.eup %2476 }
0x1eaf   :  { %v2158_v27 = vmul.f32 %v2477_v51, %v2156_v48  ;;  %vm2163_vm7 = vweird.f32 %v2477_v51 }
0x1eb0   :  { %vm2164_vm11 = vmor %vm2162_vm4, %vm2163_vm7 }
0x1eb1   :  { %v2159_v2 = vsub.f32 1.0, %v2158_v27 }
0x1eb3   :  { %v2160_v4 = vmul.f32 %v2477_v51, %v2159_v2 }
0x1eb5   :  { %v2161_v8 = vadd.f32 %v2477_v51, %v2160_v4 }
0x1eb7   :  { %v2165_v55 = vsel %vm2164_vm11, %v2477_v51, %v2161_v8 }
0x1eb8   :  { %v2170_v50 = vsel %vm2167_vm9, %v2169_v35, %v2165_v55 }
0x1eb9   :  { %2173 = vst.msk [vmem:[%s3539_s9] sm:$0xff] %vm2172_vm8, %v2170_v50 }
0x1eba   :  { %2178 = vsyncpa [#allocation6], 1 }
0x1ebb   :  { %2179 = vsyncpa [#allocation8], 1 }

</bundles_post_ra>
